<compile_context>
chip_gen: v5e
topology: v5e:2x2
jax: 0.10.0
libtpu: 0.0.40
codegen_flags: <defaults>
</compile_context>

<pallas_src>
import functools

import jax
import jax.numpy as jnp
from jax.experimental import pallas as pl
from jax.experimental.pallas import tpu as pltpu


def _hamburger_kernel(x_ref, basesT_ref, w_in_ref, b_in_ref, w_out_ref, b_out_ref,
                      gamma_ref, beta_ref, out_ref, *,
                      kB, C, N, R, num_groups, steps, inv_t, eps_nmf, eps_gn):
    f32 = jnp.float32
    bf16 = jnp.bfloat16
    cg = C // num_groups
    inv_cnt = 1.0 / float(cg * N)

    w_in = w_in_ref[...]        # (C, C) bf16
    w_out = w_out_ref[...]      # (C, C) bf16
    b_in = b_in_ref[...]        # (C, 1) f32
    b_out = b_out_ref[...]      # (C, 1) f32
    gamma = gamma_ref[...]      # (C, 1) f32
    beta = beta_ref[...]        # (C, 1) f32

    # Static (fully unrolled) loop over the kB batch elements in this block.
    for i in range(kB):
        # ---- ham_in: 1x1 conv (bf16 operands, f32 acc) + ReLU ------------------------------
        enjoy = jnp.dot(w_in, x_ref[i].astype(bf16), preferred_element_type=f32)
        enjoy = jnp.maximum(enjoy + b_in, 0.0)            # (D, N), D == C
        enjoy_bf = enjoy.astype(bf16)
        # NOTE: the f32 x slice is NOT kept live across the NMF loop; it is re-read from the
        # (already VMEM-resident) input block for the residual at the very end.

        # ---- NMF2D (spatial=True, S=1) in transposed layout: basesT (R, D), coefT (R, N) ---
        basesT = basesT_ref[i]                            # (R, D) f32, L2-normalized along D
        basesT_bf = basesT.astype(bf16)

        # coef init: softmax over R of (inv_t * bases^T x), held as columns of (R, N).
        s = jnp.dot(basesT_bf, enjoy_bf, preferred_element_type=f32)          # (R, N)
        if inv_t != 1.0:                                  # static python float -> skip at 1.0
            s = s * inv_t
        s = s - jnp.max(s, axis=0, keepdims=True)
        e = jnp.exp(s)
        coefT = e * pl.reciprocal(jnp.sum(e, axis=0, keepdims=True), approx=True)

        def nmf_step(_, carry):
            basesT, coefT = carry
            basesT_bf = basesT.astype(bf16)
            coefT_bf = coefT.astype(bf16)
            # --- coef multiplicative update (old bases, old coef) ---
            # btb depends only on the old bases -> independent of numT, issued first so the
            # scheduler can overlap the two MXU pushes.
            btb = jax.lax.dot_general(basesT_bf, basesT_bf, (((1,), (1,)), ((), ())),
                                      preferred_element_type=f32)             # (R, R)
            numT = jnp.dot(basesT_bf, enjoy_bf, preferred_element_type=f32)   # (R, N)
            denT = jnp.dot(btb.astype(bf16), coefT_bf,
                           preferred_element_type=f32)                        # (R, N)
            coefT = coefT * numT * pl.reciprocal(denT + eps_nmf, approx=True)
            # --- bases multiplicative update (old bases, NEW coef) ---
            coefT_bf = coefT.astype(bf16)
            num2T = jax.lax.dot_general(coefT_bf, enjoy_bf, (((1,), (1,)), ((), ())),
                                        preferred_element_type=f32)           # (R, D)
            ctc = jax.lax.dot_general(coefT_bf, coefT_bf, (((1,), (1,)), ((), ())),
                                      preferred_element_type=f32)             # (R, R)
            den2T = jnp.dot(ctc.astype(bf16), basesT_bf,
                            preferred_element_type=f32)                       # (R, D)
            basesT = basesT * num2T * pl.reciprocal(den2T + eps_nmf, approx=True)
            return basesT, coefT

        # steps is a small static constant -> fully unroll for LLO scheduler visibility.
        basesT, coefT = jax.lax.fori_loop(0, steps, nmf_step, (basesT, coefT), unroll=True)

        # compute_coef: one final coef update with the converged bases.
        basesT_bf = basesT.astype(bf16)
        btb = jax.lax.dot_general(basesT_bf, basesT_bf, (((1,), (1,)), ((), ())),
                                  preferred_element_type=f32)
        numT = jnp.dot(basesT_bf, enjoy_bf, preferred_element_type=f32)
        denT = jnp.dot(btb.astype(bf16), coefT.astype(bf16), preferred_element_type=f32)
        coefT = coefT * numT * pl.reciprocal(denT + eps_nmf, approx=True)
        coefT_bf = coefT.astype(bf16)

        # ---- ham_out fused with the NMF reconstruction --------------------------------------
        # w_out @ (bases @ coef^T) == (w_out @ bases) @ coef^T : contract over R last so the
        # big (C, N) f32 recon never materializes and the MXU work drops by ~C/R.
        w_out_b = jax.lax.dot_general(w_out, basesT_bf, (((1,), (1,)), ((), ())),
                                      preferred_element_type=f32)             # (C, R)
        y = jnp.dot(w_out_b.astype(bf16), coefT_bf, preferred_element_type=f32) + b_out

        # ---- GroupNorm(num_groups): per-row stats on (C, N), tiny per-group fold ------------
        row_sum = jnp.sum(y, axis=1, keepdims=True)                            # (C, 1)
        row_sq = jnp.sum(y * y, axis=1, keepdims=True)                         # (C, 1)
        mean_g = jnp.sum(row_sum.reshape(num_groups, cg, 1), axis=1, keepdims=True) * inv_cnt
        ex2_g = jnp.sum(row_sq.reshape(num_groups, cg, 1), axis=1, keepdims=True) * inv_cnt
        var_g = jnp.maximum(ex2_g - mean_g * mean_g, 0.0)                      # f32, clamped
        rstd_g = jax.lax.rsqrt(var_g + eps_gn)
        mean = jnp.broadcast_to(mean_g, (num_groups, cg, 1)).reshape(C, 1)
        rstd = jnp.broadcast_to(rstd_g, (num_groups, cg, 1)).reshape(C, 1)
        scale = gamma * rstd                                                   # (C, 1)
        shift = beta - mean * scale                                            # (C, 1)

        # ---- fused normalize + residual + ReLU (x re-read here) -----------------------------
        out_ref[i] = jnp.maximum(x_ref[i] + y * scale + shift, 0.0)


def _pick_batch_block(B, C, N):
    """Batch elements per grid step: amortize per-step overhead while keeping the grid
    length >= 2 (v7x megacore) and the per-step working set well inside VMEM."""
    per_elem_bytes = 16 * C * N  # rough f32 + bf16 working set per batch element
    for kb in (8, 4, 2):
        if B % kb == 0 and B // kb >= 2 and kb * per_elem_bytes <= (24 << 20):
            return kb
    return 1


def _vmem_limit_bytes(C, N, R, kB):
    """Generation-aware scoped-VMEM limit (~80% of physical capacity as the hard cap)."""
    per_b = 4 * C * N           # x block (f32)
    per_b += 4 * C * N          # out block (f32)
    per_b += 2 * C * N          # enjoy (bf16)
    per_b += 4 * C * N          # y (f32)
    per_b += (4 + 2) * R * N    # coefT f32 + bf16
    per_b += (4 + 2) * R * C    # basesT f32 + bf16
    per_b += 8 * R * N          # numT / denT temporaries
    est = 2 * kB * per_b        # double-buffered batch blocks + temp slack
    est += 2 * (2 * C * C) + 6 * 4 * C   # single-buffered bf16 weights + f32 vectors
    est += 8 << 20              # compiler scratch / semaphores / spill headroom
    try:
        cap = int(pltpu.get_tpu_info().vmem_capacity_bytes)
    except Exception:
        cap = 64 << 20          # conservative (v7x per-TC) when the query is unavailable
    hi = int(0.80 * cap)
    return int(min(max(est, 32 << 20), hi))


def hamburger_pallas(x, bases0, w_in, b_in, w_out, b_out, gamma, beta,
                     *, num_groups=32, steps=7, inv_t=1.0, batch_block=None):
    B, C, H, W = x.shape
    N = H * W
    R = bases0.shape[-1]
    assert C % num_groups == 0
    # NOTE: if H*W is not a multiple of 128 the lane dim is not dense (masked partial
    # stores -> perf only, not correctness).

    kB = _pick_batch_block(B, C, N) if batch_block is None else batch_block
    assert B % kB == 0

    x_flat = x.reshape(B, C, N).astype(jnp.float32)

    # bases0 comes in module layout (B, D=C, R), L2-normalized along D.  Transpose once
    # outside the kernel to the lane-dense (R, D) layout the kernel works in.
    basesT0 = jnp.swapaxes(bases0.astype(jnp.float32), 1, 2)          # (B, R, C)

    # bf16 weights for the MXU 1x1 convs (halves weight DMA too); biases/affine stay f32.
    w_in_bf = w_in.astype(jnp.bfloat16)
    w_out_bf = w_out.astype(jnp.bfloat16)

    kernel = functools.partial(
        _hamburger_kernel, kB=kB, C=C, N=N, R=R, num_groups=num_groups,
        steps=steps, inv_t=float(inv_t), eps_nmf=1e-6, eps_gn=1e-5)

    vmem_limit = _vmem_limit_bytes(C, N, R, kB)

    batch_map = lambda b: (b, 0, 0)
    const_map = lambda b: (0, 0)
    single = pl.Buffered(1)   # grid-invariant operands: one VMEM buffer is enough

    out = pl.pallas_call(
        kernel,
        out_shape=jax.ShapeDtypeStruct((B, C, N), jnp.float32),
        grid=(B // kB,),
        in_specs=[
            pl.BlockSpec((kB, C, N), batch_map),                              # x (f32)
            pl.BlockSpec((kB, R, C), batch_map),                              # bases init (R,D)
            pl.BlockSpec((C, C), const_map, pipeline_mode=single),            # w_in (bf16)
            pl.BlockSpec((C, 1), const_map, pipeline_mode=single),            # b_in
            pl.BlockSpec((C, C), const_map, pipeline_mode=single),            # w_out (bf16)
            pl.BlockSpec((C, 1), const_map, pipeline_mode=single),            # b_out
            pl.BlockSpec((C, 1), const_map, pipeline_mode=single),            # gn gamma
            pl.BlockSpec((C, 1), const_map, pipeline_mode=single),            # gn beta
        ],
        out_specs=pl.BlockSpec((kB, C, N), batch_map),
        compiler_params=pltpu.CompilerParams(
            dimension_semantics=("parallel",),
            vmem_limit_bytes=vmem_limit),
    )(x_flat, basesT0, w_in_bf, b_in, w_out_bf, b_out, gamma, beta)
    return out.reshape(B, C, H, W)


def hamburger_ref(x, bases0, w_in, b_in, w_out, b_out, gamma, beta,
                  *, num_groups=32, steps=7, inv_t=1.0):
    """Pure-JAX f32 reference with identical semantics (for verification)."""
    B, C, H, W = x.shape
    N = H * W
    xf = x.reshape(B, C, N)
    enjoy = jnp.einsum('oc,bcn->bon', w_in, xf) + b_in[None]
    enjoy = jnp.maximum(enjoy, 0.0)
    bases = bases0
    xt = jnp.swapaxes(enjoy, 1, 2)
    coef = jax.nn.softmax(inv_t * jnp.einsum('bnd,bdr->bnr', xt, bases), axis=-1)
    for _ in range(steps):
        num = jnp.einsum('bnd,bdr->bnr', xt, bases)
        den = jnp.einsum('bnr,brk->bnk', coef, jnp.einsum('bdr,bdk->brk', bases, bases))
        coef = coef * num / (den + 1e-6)
        num2 = jnp.einsum('bdn,bnr->bdr', enjoy, coef)
        den2 = jnp.einsum('bdr,brk->bdk', bases, jnp.einsum('bnr,bnk->brk', coef, coef))
        bases = bases * num2 / (den2 + 1e-6)
    num = jnp.einsum('bnd,bdr->bnr', xt, bases)
    den = jnp.einsum('bnr,brk->bnk', coef, jnp.einsum('bdr,bdk->brk', bases, bases))
    coef = coef * num / (den + 1e-6)
    recon = jnp.einsum('bdr,bnr->bdn', bases, coef)
    y = jnp.einsum('oc,bcn->bon', w_out, recon) + b_out[None]
    g = y.reshape(B, num_groups, -1)
    mean = g.mean(axis=-1, keepdims=True)
    var = ((g - mean) ** 2).mean(axis=-1, keepdims=True)
    gn = ((g - mean) * jax.lax.rsqrt(var + 1e-5)).reshape(B, C, N)
    y = gn * gamma[None] + beta[None]
    return jnp.maximum(xf + y, 0.0).reshape(B, C, H, W)


if __name__ == "__main__":
    # Small, module-consistent shapes: ham_channels divisible by 32 (GroupNorm);
    # H*W = 256 is a multiple of 128 so all lane dims are dense (no masked stores).
    B, C, H, W = 2, 64, 16, 16
    R = 8            # MD_R (rank) — small for the test
    STEPS = 7        # eval_steps (inference); NMF2D forces inv_t = 1
    INV_T = 1.0

    key = jax.random.PRNGKey(0)
    kx, kb, k1, k2, k3, k4, k5, k6 = jax.random.split(key, 8)

    x = jax.random.normal(kx, (B, C, H, W), dtype=jnp.float32)

    # NMF bases: rand((B*S, D, R)) then L2-normalize along D (rand_init=True, S=1, D=C).
    bases0 = jax.random.uniform(kb, (B, C, R), dtype=jnp.float32)
    bases0 = bases0 / jnp.linalg.norm(bases0, axis=1, keepdims=True)

    # ham_in / ham_out 1x1 conv weights (C_out, C_in) and biases; GroupNorm affine params.
    scale = 1.0 / jnp.sqrt(jnp.float32(C))
    w_in = jax.random.normal(k1, (C, C), dtype=jnp.float32) * scale
    b_in = jax.random.normal(k2, (C, 1), dtype=jnp.float32) * 0.1
    w_out = jax.random.normal(k3, (C, C), dtype=jnp.float32) * scale
    b_out = jax.random.normal(k4, (C, 1), dtype=jnp.float32) * 0.1
    gamma = 1.0 + 0.1 * jax.random.normal(k5, (C, 1), dtype=jnp.float32)
    beta = 0.1 * jax.random.normal(k6, (C, 1), dtype=jnp.float32)

    out = hamburger_pallas(x, bases0, w_in, b_in, w_out, b_out, gamma, beta,
                           num_groups=32, steps=STEPS, inv_t=INV_T)
    out = jax.block_until_ready(out)

    ref = hamburger_ref(x, bases0, w_in, b_in, w_out, b_out, gamma, beta,
                        num_groups=32, steps=STEPS, inv_t=INV_T)
    ref = jax.block_until_ready(ref)

    assert out.shape == (B, C, H, W)
    assert bool(jnp.all(jnp.isfinite(out)))
    # bf16 operands on all matmuls + approx EUP reciprocals across 8 multiplicative NMF
    # updates trade a little precision for throughput; compare at a scale-relative tolerance.
    max_err = float(jnp.max(jnp.abs(out - ref)))
    ref_scale = float(jnp.max(jnp.abs(ref)))
    assert max_err <= 0.05 * ref_scale + 0.05, f"mismatch vs reference: {max_err} (scale {ref_scale})"
    print("KERNEL_OK")
</pallas_src>

<mosaic_0001>
module attributes {stable_mosaic.version = 11 : i64} {
  func.func @_hamburger_kernel(%arg0: i32, %arg1: memref<1x64x256xf32, #tpu.memory_space<vmem>>, %arg2: memref<1x8x64xf32, #tpu.memory_space<vmem>>, %arg3: memref<64x64xbf16, #tpu.memory_space<vmem>>, %arg4: memref<64x1xf32, #tpu.memory_space<vmem>>, %arg5: memref<64x64xbf16, #tpu.memory_space<vmem>>, %arg6: memref<64x1xf32, #tpu.memory_space<vmem>>, %arg7: memref<64x1xf32, #tpu.memory_space<vmem>>, %arg8: memref<64x1xf32, #tpu.memory_space<vmem>>, %arg9: memref<1x64x256xf32, #tpu.memory_space<vmem>>) attributes {dimension_semantics = [#tpu.dimension_semantics<parallel>], iteration_bounds = array<i64: 2>, scalar_prefetch = 0 : i64, scratch_operands = 0 : i64, tpu.core_type = #tpu.core_type<tc>, window_params = [{transform_indices = @transform_0, window_bounds = array<i64: 1, 64, 256>}, {transform_indices = @transform_1, window_bounds = array<i64: 1, 8, 64>}, {pipeline_mode = #tpu.pipeline_mode<synchronous>, transform_indices = @transform_2, window_bounds = array<i64: 64, 64>}, {pipeline_mode = #tpu.pipeline_mode<synchronous>, transform_indices = @transform_3, window_bounds = array<i64: 64, 1>}, {pipeline_mode = #tpu.pipeline_mode<synchronous>, transform_indices = @transform_4, window_bounds = array<i64: 64, 64>}, {pipeline_mode = #tpu.pipeline_mode<synchronous>, transform_indices = @transform_5, window_bounds = array<i64: 64, 1>}, {pipeline_mode = #tpu.pipeline_mode<synchronous>, transform_indices = @transform_6, window_bounds = array<i64: 64, 1>}, {pipeline_mode = #tpu.pipeline_mode<synchronous>, transform_indices = @transform_7, window_bounds = array<i64: 64, 1>}, {transform_indices = @transform_8, window_bounds = array<i64: 1, 64, 256>}]} {
    %c0 = arith.constant 0 : index
    %c0_0 = arith.constant 0 : index
    %0 = vector.load %arg3[%c0, %c0_0] : memref<64x64xbf16, #tpu.memory_space<vmem>>, vector<64x64xbf16>
    %c0_1 = arith.constant 0 : index
    %c0_2 = arith.constant 0 : index
    %1 = vector.load %arg5[%c0_1, %c0_2] : memref<64x64xbf16, #tpu.memory_space<vmem>>, vector<64x64xbf16>
    %c0_3 = arith.constant 0 : index
    %c0_4 = arith.constant 0 : index
    %2 = vector.load %arg4[%c0_3, %c0_4] : memref<64x1xf32, #tpu.memory_space<vmem>>, vector<64x1xf32>
    %c0_5 = arith.constant 0 : index
    %c0_6 = arith.constant 0 : index
    %3 = vector.load %arg6[%c0_5, %c0_6] : memref<64x1xf32, #tpu.memory_space<vmem>>, vector<64x1xf32>
    %c0_7 = arith.constant 0 : index
    %c0_8 = arith.constant 0 : index
    %4 = vector.load %arg7[%c0_7, %c0_8] : memref<64x1xf32, #tpu.memory_space<vmem>>, vector<64x1xf32>
    %c0_9 = arith.constant 0 : index
    %c0_10 = arith.constant 0 : index
    %5 = vector.load %arg8[%c0_9, %c0_10] : memref<64x1xf32, #tpu.memory_space<vmem>>, vector<64x1xf32>
    %c0_11 = arith.constant 0 : index
    %c0_12 = arith.constant 0 : index
    %c0_13 = arith.constant 0 : index
    %6 = vector.load %arg1[%c0_11, %c0_12, %c0_13] : memref<1x64x256xf32, #tpu.memory_space<vmem>>, vector<1x64x256xf32>
    %7 = vector.shape_cast %6 : vector<1x64x256xf32> to vector<64x256xf32>
    %8 = arith.truncf %7 : vector<64x256xf32> to vector<64x256xbf16>
    %cst = arith.constant dense<0.000000e+00> : vector<64x256xf32>
    %9 = tpu.matmul %0, %8, %cst {dimension_numbers = #tpu.dot_dimension_numbers<[1], [0], [0], [1], [0, 0, 1, 1], [], []>} : vector<64x64xbf16>, vector<64x256xbf16>, vector<64x256xf32> -> vector<64x256xf32>
    %10 = vector.broadcast %2 : vector<64x1xf32> to vector<64x256xf32>
    %11 = arith.addf %9, %10 : vector<64x256xf32>
    %cst_14 = arith.constant 0.000000e+00 : f32
    %12 = vector.broadcast %cst_14 : f32 to vector<64x256xf32>
    %13 = arith.maximumf %11, %12 : vector<64x256xf32>
    %14 = arith.truncf %13 : vector<64x256xf32> to vector<64x256xbf16>
    %c0_15 = arith.constant 0 : index
    %c0_16 = arith.constant 0 : index
    %c0_17 = arith.constant 0 : index
    %15 = vector.load %arg2[%c0_15, %c0_16, %c0_17] : memref<1x8x64xf32, #tpu.memory_space<vmem>>, vector<1x8x64xf32>
    %16 = vector.shape_cast %15 : vector<1x8x64xf32> to vector<8x64xf32>
    %17 = arith.truncf %16 : vector<8x64xf32> to vector<8x64xbf16>
    %cst_18 = arith.constant dense<0.000000e+00> : vector<8x256xf32>
    %18 = tpu.matmul %17, %14, %cst_18 {dimension_numbers = #tpu.dot_dimension_numbers<[1], [0], [0], [1], [0, 0, 1, 1], [], []>} : vector<8x64xbf16>, vector<64x256xbf16>, vector<8x256xf32> -> vector<8x256xf32>
    %cst_19 = arith.constant dense<0xFF800000> : vector<256xf32>
    %19 = vector.multi_reduction <maximumf>, %18, %cst_19 [0] : vector<8x256xf32> to vector<256xf32>
    %20 = vector.shape_cast %19 : vector<256xf32> to vector<1x256xf32>
    %21 = vector.broadcast %20 : vector<1x256xf32> to vector<8x256xf32>
    %22 = arith.subf %18, %21 : vector<8x256xf32>
    %23 = math.exp %22 : vector<8x256xf32>
    %cst_20 = arith.constant dense<0.000000e+00> : vector<256xf32>
    %24 = vector.multi_reduction <add>, %23, %cst_20 [0] : vector<8x256xf32> to vector<256xf32>
    %25 = vector.shape_cast %24 : vector<256xf32> to vector<1x256xf32>
    %26 = tpu.reciprocal %25 {approx = true} : vector<1x256xf32> -> vector<1x256xf32>
    %27 = vector.broadcast %26 : vector<1x256xf32> to vector<8x256xf32>
    %28 = arith.mulf %23, %27 : vector<8x256xf32>
    %c0_i32 = arith.constant 0 : i32
    %29 = arith.truncf %16 : vector<8x64xf32> to vector<8x64xbf16>
    %30 = arith.truncf %28 : vector<8x256xf32> to vector<8x256xbf16>
    %cst_21 = arith.constant dense<0.000000e+00> : vector<8x8xf32>
    %31 = tpu.matmul %29, %29, %cst_21 {dimension_numbers = #tpu.dot_dimension_numbers<[1], [1], [0], [0], [0, 0, 1, 0], [], []>} : vector<8x64xbf16>, vector<8x64xbf16>, vector<8x8xf32> -> vector<8x8xf32>
    %cst_22 = arith.constant dense<0.000000e+00> : vector<8x256xf32>
    %32 = tpu.matmul %29, %14, %cst_22 {dimension_numbers = #tpu.dot_dimension_numbers<[1], [0], [0], [1], [0, 0, 1, 1], [], []>} : vector<8x64xbf16>, vector<64x256xbf16>, vector<8x256xf32> -> vector<8x256xf32>
    %33 = arith.truncf %31 : vector<8x8xf32> to vector<8x8xbf16>
    %cst_23 = arith.constant dense<0.000000e+00> : vector<8x256xf32>
    %34 = tpu.matmul %33, %30, %cst_23 {dimension_numbers = #tpu.dot_dimension_numbers<[1], [0], [0], [1], [0, 0, 1, 1], [], []>} : vector<8x8xbf16>, vector<8x256xbf16>, vector<8x256xf32> -> vector<8x256xf32>
    %35 = arith.mulf %28, %32 : vector<8x256xf32>
    %cst_24 = arith.constant 9.99999997E-7 : f32
    %36 = vector.broadcast %cst_24 : f32 to vector<8x256xf32>
    %37 = arith.addf %34, %36 : vector<8x256xf32>
    %38 = tpu.reciprocal %37 {approx = true} : vector<8x256xf32> -> vector<8x256xf32>
    %39 = arith.mulf %35, %38 : vector<8x256xf32>
    %40 = arith.truncf %39 : vector<8x256xf32> to vector<8x256xbf16>
    %cst_25 = arith.constant dense<0.000000e+00> : vector<8x64xf32>
    %41 = tpu.matmul %40, %14, %cst_25 {dimension_numbers = #tpu.dot_dimension_numbers<[1], [1], [0], [0], [0, 0, 1, 0], [], []>} : vector<8x256xbf16>, vector<64x256xbf16>, vector<8x64xf32> -> vector<8x64xf32>
    %cst_26 = arith.constant dense<0.000000e+00> : vector<8x8xf32>
    %42 = tpu.matmul %40, %40, %cst_26 {dimension_numbers = #tpu.dot_dimension_numbers<[1], [1], [0], [0], [0, 0, 1, 0], [], []>} : vector<8x256xbf16>, vector<8x256xbf16>, vector<8x8xf32> -> vector<8x8xf32>
    %43 = arith.truncf %42 : vector<8x8xf32> to vector<8x8xbf16>
    %cst_27 = arith.constant dense<0.000000e+00> : vector<8x64xf32>
    %44 = tpu.matmul %43, %29, %cst_27 {dimension_numbers = #tpu.dot_dimension_numbers<[1], [0], [0], [1], [0, 0, 1, 1], [], []>} : vector<8x8xbf16>, vector<8x64xbf16>, vector<8x64xf32> -> vector<8x64xf32>
    %45 = arith.mulf %16, %41 : vector<8x64xf32>
    %cst_28 = arith.constant 9.99999997E-7 : f32
    %46 = vector.broadcast %cst_28 : f32 to vector<8x64xf32>
    %47 = arith.addf %44, %46 : vector<8x64xf32>
    %48 = tpu.reciprocal %47 {approx = true} : vector<8x64xf32> -> vector<8x64xf32>
    %49 = arith.mulf %45, %48 : vector<8x64xf32>
    %c1_i32 = arith.constant 1 : i32
    %50 = arith.truncf %49 : vector<8x64xf32> to vector<8x64xbf16>
    %51 = arith.truncf %39 : vector<8x256xf32> to vector<8x256xbf16>
    %cst_29 = arith.constant dense<0.000000e+00> : vector<8x8xf32>
    %52 = tpu.matmul %50, %50, %cst_29 {dimension_numbers = #tpu.dot_dimension_numbers<[1], [1], [0], [0], [0, 0, 1, 0], [], []>} : vector<8x64xbf16>, vector<8x64xbf16>, vector<8x8xf32> -> vector<8x8xf32>
    %cst_30 = arith.constant dense<0.000000e+00> : vector<8x256xf32>
    %53 = tpu.matmul %50, %14, %cst_30 {dimension_numbers = #tpu.dot_dimension_numbers<[1], [0], [0], [1], [0, 0, 1, 1], [], []>} : vector<8x64xbf16>, vector<64x256xbf16>, vector<8x256xf32> -> vector<8x256xf32>
    %54 = arith.truncf %52 : vector<8x8xf32> to vector<8x8xbf16>
    %cst_31 = arith.constant dense<0.000000e+00> : vector<8x256xf32>
    %55 = tpu.matmul %54, %51, %cst_31 {dimension_numbers = #tpu.dot_dimension_numbers<[1], [0], [0], [1], [0, 0, 1, 1], [], []>} : vector<8x8xbf16>, vector<8x256xbf16>, vector<8x256xf32> -> vector<8x256xf32>
    %56 = arith.mulf %39, %53 : vector<8x256xf32>
    %cst_32 = arith.constant 9.99999997E-7 : f32
    %57 = vector.broadcast %cst_32 : f32 to vector<8x256xf32>
    %58 = arith.addf %55, %57 : vector<8x256xf32>
    %59 = tpu.reciprocal %58 {approx = true} : vector<8x256xf32> -> vector<8x256xf32>
    %60 = arith.mulf %56, %59 : vector<8x256xf32>
    %61 = arith.truncf %60 : vector<8x256xf32> to vector<8x256xbf16>
    %cst_33 = arith.constant dense<0.000000e+00> : vector<8x64xf32>
    %62 = tpu.matmul %61, %14, %cst_33 {dimension_numbers = #tpu.dot_dimension_numbers<[1], [1], [0], [0], [0, 0, 1, 0], [], []>} : vector<8x256xbf16>, vector<64x256xbf16>, vector<8x64xf32> -> vector<8x64xf32>
    %cst_34 = arith.constant dense<0.000000e+00> : vector<8x8xf32>
    %63 = tpu.matmul %61, %61, %cst_34 {dimension_numbers = #tpu.dot_dimension_numbers<[1], [1], [0], [0], [0, 0, 1, 0], [], []>} : vector<8x256xbf16>, vector<8x256xbf16>, vector<8x8xf32> -> vector<8x8xf32>
    %64 = arith.truncf %63 : vector<8x8xf32> to vector<8x8xbf16>
    %cst_35 = arith.constant dense<0.000000e+00> : vector<8x64xf32>
    %65 = tpu.matmul %64, %50, %cst_35 {dimension_numbers = #tpu.dot_dimension_numbers<[1], [0], [0], [1], [0, 0, 1, 1], [], []>} : vector<8x8xbf16>, vector<8x64xbf16>, vector<8x64xf32> -> vector<8x64xf32>
    %66 = arith.mulf %49, %62 : vector<8x64xf32>
    %cst_36 = arith.constant 9.99999997E-7 : f32
    %67 = vector.broadcast %cst_36 : f32 to vector<8x64xf32>
    %68 = arith.addf %65, %67 : vector<8x64xf32>
    %69 = tpu.reciprocal %68 {approx = true} : vector<8x64xf32> -> vector<8x64xf32>
    %70 = arith.mulf %66, %69 : vector<8x64xf32>
    %c2_i32 = arith.constant 2 : i32
    %71 = arith.truncf %70 : vector<8x64xf32> to vector<8x64xbf16>
    %72 = arith.truncf %60 : vector<8x256xf32> to vector<8x256xbf16>
    %cst_37 = arith.constant dense<0.000000e+00> : vector<8x8xf32>
    %73 = tpu.matmul %71, %71, %cst_37 {dimension_numbers = #tpu.dot_dimension_numbers<[1], [1], [0], [0], [0, 0, 1, 0], [], []>} : vector<8x64xbf16>, vector<8x64xbf16>, vector<8x8xf32> -> vector<8x8xf32>
    %cst_38 = arith.constant dense<0.000000e+00> : vector<8x256xf32>
    %74 = tpu.matmul %71, %14, %cst_38 {dimension_numbers = #tpu.dot_dimension_numbers<[1], [0], [0], [1], [0, 0, 1, 1], [], []>} : vector<8x64xbf16>, vector<64x256xbf16>, vector<8x256xf32> -> vector<8x256xf32>
    %75 = arith.truncf %73 : vector<8x8xf32> to vector<8x8xbf16>
    %cst_39 = arith.constant dense<0.000000e+00> : vector<8x256xf32>
    %76 = tpu.matmul %75, %72, %cst_39 {dimension_numbers = #tpu.dot_dimension_numbers<[1], [0], [0], [1], [0, 0, 1, 1], [], []>} : vector<8x8xbf16>, vector<8x256xbf16>, vector<8x256xf32> -> vector<8x256xf32>
    %77 = arith.mulf %60, %74 : vector<8x256xf32>
    %cst_40 = arith.constant 9.99999997E-7 : f32
    %78 = vector.broadcast %cst_40 : f32 to vector<8x256xf32>
    %79 = arith.addf %76, %78 : vector<8x256xf32>
    %80 = tpu.reciprocal %79 {approx = true} : vector<8x256xf32> -> vector<8x256xf32>
    %81 = arith.mulf %77, %80 : vector<8x256xf32>
    %82 = arith.truncf %81 : vector<8x256xf32> to vector<8x256xbf16>
    %cst_41 = arith.constant dense<0.000000e+00> : vector<8x64xf32>
    %83 = tpu.matmul %82, %14, %cst_41 {dimension_numbers = #tpu.dot_dimension_numbers<[1], [1], [0], [0], [0, 0, 1, 0], [], []>} : vector<8x256xbf16>, vector<64x256xbf16>, vector<8x64xf32> -> vector<8x64xf32>
    %cst_42 = arith.constant dense<0.000000e+00> : vector<8x8xf32>
    %84 = tpu.matmul %82, %82, %cst_42 {dimension_numbers = #tpu.dot_dimension_numbers<[1], [1], [0], [0], [0, 0, 1, 0], [], []>} : vector<8x256xbf16>, vector<8x256xbf16>, vector<8x8xf32> -> vector<8x8xf32>
    %85 = arith.truncf %84 : vector<8x8xf32> to vector<8x8xbf16>
    %cst_43 = arith.constant dense<0.000000e+00> : vector<8x64xf32>
    %86 = tpu.matmul %85, %71, %cst_43 {dimension_numbers = #tpu.dot_dimension_numbers<[1], [0], [0], [1], [0, 0, 1, 1], [], []>} : vector<8x8xbf16>, vector<8x64xbf16>, vector<8x64xf32> -> vector<8x64xf32>
    %87 = arith.mulf %70, %83 : vector<8x64xf32>
    %cst_44 = arith.constant 9.99999997E-7 : f32
    %88 = vector.broadcast %cst_44 : f32 to vector<8x64xf32>
    %89 = arith.addf %86, %88 : vector<8x64xf32>
    %90 = tpu.reciprocal %89 {approx = true} : vector<8x64xf32> -> vector<8x64xf32>
    %91 = arith.mulf %87, %90 : vector<8x64xf32>
    %c3_i32 = arith.constant 3 : i32
    %92 = arith.truncf %91 : vector<8x64xf32> to vector<8x64xbf16>
    %93 = arith.truncf %81 : vector<8x256xf32> to vector<8x256xbf16>
    %cst_45 = arith.constant dense<0.000000e+00> : vector<8x8xf32>
    %94 = tpu.matmul %92, %92, %cst_45 {dimension_numbers = #tpu.dot_dimension_numbers<[1], [1], [0], [0], [0, 0, 1, 0], [], []>} : vector<8x64xbf16>, vector<8x64xbf16>, vector<8x8xf32> -> vector<8x8xf32>
    %cst_46 = arith.constant dense<0.000000e+00> : vector<8x256xf32>
    %95 = tpu.matmul %92, %14, %cst_46 {dimension_numbers = #tpu.dot_dimension_numbers<[1], [0], [0], [1], [0, 0, 1, 1], [], []>} : vector<8x64xbf16>, vector<64x256xbf16>, vector<8x256xf32> -> vector<8x256xf32>
    %96 = arith.truncf %94 : vector<8x8xf32> to vector<8x8xbf16>
    %cst_47 = arith.constant dense<0.000000e+00> : vector<8x256xf32>
    %97 = tpu.matmul %96, %93, %cst_47 {dimension_numbers = #tpu.dot_dimension_numbers<[1], [0], [0], [1], [0, 0, 1, 1], [], []>} : vector<8x8xbf16>, vector<8x256xbf16>, vector<8x256xf32> -> vector<8x256xf32>
    %98 = arith.mulf %81, %95 : vector<8x256xf32>
    %cst_48 = arith.constant 9.99999997E-7 : f32
    %99 = vector.broadcast %cst_48 : f32 to vector<8x256xf32>
    %100 = arith.addf %97, %99 : vector<8x256xf32>
    %101 = tpu.reciprocal %100 {approx = true} : vector<8x256xf32> -> vector<8x256xf32>
    %102 = arith.mulf %98, %101 : vector<8x256xf32>
    %103 = arith.truncf %102 : vector<8x256xf32> to vector<8x256xbf16>
    %cst_49 = arith.constant dense<0.000000e+00> : vector<8x64xf32>
    %104 = tpu.matmul %103, %14, %cst_49 {dimension_numbers = #tpu.dot_dimension_numbers<[1], [1], [0], [0], [0, 0, 1, 0], [], []>} : vector<8x256xbf16>, vector<64x256xbf16>, vector<8x64xf32> -> vector<8x64xf32>
    %cst_50 = arith.constant dense<0.000000e+00> : vector<8x8xf32>
    %105 = tpu.matmul %103, %103, %cst_50 {dimension_numbers = #tpu.dot_dimension_numbers<[1], [1], [0], [0], [0, 0, 1, 0], [], []>} : vector<8x256xbf16>, vector<8x256xbf16>, vector<8x8xf32> -> vector<8x8xf32>
    %106 = arith.truncf %105 : vector<8x8xf32> to vector<8x8xbf16>
    %cst_51 = arith.constant dense<0.000000e+00> : vector<8x64xf32>
    %107 = tpu.matmul %106, %92, %cst_51 {dimension_numbers = #tpu.dot_dimension_numbers<[1], [0], [0], [1], [0, 0, 1, 1], [], []>} : vector<8x8xbf16>, vector<8x64xbf16>, vector<8x64xf32> -> vector<8x64xf32>
    %108 = arith.mulf %91, %104 : vector<8x64xf32>
    %cst_52 = arith.constant 9.99999997E-7 : f32
    %109 = vector.broadcast %cst_52 : f32 to vector<8x64xf32>
    %110 = arith.addf %107, %109 : vector<8x64xf32>
    %111 = tpu.reciprocal %110 {approx = true} : vector<8x64xf32> -> vector<8x64xf32>
    %112 = arith.mulf %108, %111 : vector<8x64xf32>
    %c4_i32 = arith.constant 4 : i32
    %113 = arith.truncf %112 : vector<8x64xf32> to vector<8x64xbf16>
    %114 = arith.truncf %102 : vector<8x256xf32> to vector<8x256xbf16>
    %cst_53 = arith.constant dense<0.000000e+00> : vector<8x8xf32>
    %115 = tpu.matmul %113, %113, %cst_53 {dimension_numbers = #tpu.dot_dimension_numbers<[1], [1], [0], [0], [0, 0, 1, 0], [], []>} : vector<8x64xbf16>, vector<8x64xbf16>, vector<8x8xf32> -> vector<8x8xf32>
    %cst_54 = arith.constant dense<0.000000e+00> : vector<8x256xf32>
    %116 = tpu.matmul %113, %14, %cst_54 {dimension_numbers = #tpu.dot_dimension_numbers<[1], [0], [0], [1], [0, 0, 1, 1], [], []>} : vector<8x64xbf16>, vector<64x256xbf16>, vector<8x256xf32> -> vector<8x256xf32>
    %117 = arith.truncf %115 : vector<8x8xf32> to vector<8x8xbf16>
    %cst_55 = arith.constant dense<0.000000e+00> : vector<8x256xf32>
    %118 = tpu.matmul %117, %114, %cst_55 {dimension_numbers = #tpu.dot_dimension_numbers<[1], [0], [0], [1], [0, 0, 1, 1], [], []>} : vector<8x8xbf16>, vector<8x256xbf16>, vector<8x256xf32> -> vector<8x256xf32>
    %119 = arith.mulf %102, %116 : vector<8x256xf32>
    %cst_56 = arith.constant 9.99999997E-7 : f32
    %120 = vector.broadcast %cst_56 : f32 to vector<8x256xf32>
    %121 = arith.addf %118, %120 : vector<8x256xf32>
    %122 = tpu.reciprocal %121 {approx = true} : vector<8x256xf32> -> vector<8x256xf32>
    %123 = arith.mulf %119, %122 : vector<8x256xf32>
    %124 = arith.truncf %123 : vector<8x256xf32> to vector<8x256xbf16>
    %cst_57 = arith.constant dense<0.000000e+00> : vector<8x64xf32>
    %125 = tpu.matmul %124, %14, %cst_57 {dimension_numbers = #tpu.dot_dimension_numbers<[1], [1], [0], [0], [0, 0, 1, 0], [], []>} : vector<8x256xbf16>, vector<64x256xbf16>, vector<8x64xf32> -> vector<8x64xf32>
    %cst_58 = arith.constant dense<0.000000e+00> : vector<8x8xf32>
    %126 = tpu.matmul %124, %124, %cst_58 {dimension_numbers = #tpu.dot_dimension_numbers<[1], [1], [0], [0], [0, 0, 1, 0], [], []>} : vector<8x256xbf16>, vector<8x256xbf16>, vector<8x8xf32> -> vector<8x8xf32>
    %127 = arith.truncf %126 : vector<8x8xf32> to vector<8x8xbf16>
    %cst_59 = arith.constant dense<0.000000e+00> : vector<8x64xf32>
    %128 = tpu.matmul %127, %113, %cst_59 {dimension_numbers = #tpu.dot_dimension_numbers<[1], [0], [0], [1], [0, 0, 1, 1], [], []>} : vector<8x8xbf16>, vector<8x64xbf16>, vector<8x64xf32> -> vector<8x64xf32>
    %129 = arith.mulf %112, %125 : vector<8x64xf32>
    %cst_60 = arith.constant 9.99999997E-7 : f32
    %130 = vector.broadcast %cst_60 : f32 to vector<8x64xf32>
    %131 = arith.addf %128, %130 : vector<8x64xf32>
    %132 = tpu.reciprocal %131 {approx = true} : vector<8x64xf32> -> vector<8x64xf32>
    %133 = arith.mulf %129, %132 : vector<8x64xf32>
    %c5_i32 = arith.constant 5 : i32
    %134 = arith.truncf %133 : vector<8x64xf32> to vector<8x64xbf16>
    %135 = arith.truncf %123 : vector<8x256xf32> to vector<8x256xbf16>
    %cst_61 = arith.constant dense<0.000000e+00> : vector<8x8xf32>
    %136 = tpu.matmul %134, %134, %cst_61 {dimension_numbers = #tpu.dot_dimension_numbers<[1], [1], [0], [0], [0, 0, 1, 0], [], []>} : vector<8x64xbf16>, vector<8x64xbf16>, vector<8x8xf32> -> vector<8x8xf32>
    %cst_62 = arith.constant dense<0.000000e+00> : vector<8x256xf32>
    %137 = tpu.matmul %134, %14, %cst_62 {dimension_numbers = #tpu.dot_dimension_numbers<[1], [0], [0], [1], [0, 0, 1, 1], [], []>} : vector<8x64xbf16>, vector<64x256xbf16>, vector<8x256xf32> -> vector<8x256xf32>
    %138 = arith.truncf %136 : vector<8x8xf32> to vector<8x8xbf16>
    %cst_63 = arith.constant dense<0.000000e+00> : vector<8x256xf32>
    %139 = tpu.matmul %138, %135, %cst_63 {dimension_numbers = #tpu.dot_dimension_numbers<[1], [0], [0], [1], [0, 0, 1, 1], [], []>} : vector<8x8xbf16>, vector<8x256xbf16>, vector<8x256xf32> -> vector<8x256xf32>
    %140 = arith.mulf %123, %137 : vector<8x256xf32>
    %cst_64 = arith.constant 9.99999997E-7 : f32
    %141 = vector.broadcast %cst_64 : f32 to vector<8x256xf32>
    %142 = arith.addf %139, %141 : vector<8x256xf32>
    %143 = tpu.reciprocal %142 {approx = true} : vector<8x256xf32> -> vector<8x256xf32>
    %144 = arith.mulf %140, %143 : vector<8x256xf32>
    %145 = arith.truncf %144 : vector<8x256xf32> to vector<8x256xbf16>
    %cst_65 = arith.constant dense<0.000000e+00> : vector<8x64xf32>
    %146 = tpu.matmul %145, %14, %cst_65 {dimension_numbers = #tpu.dot_dimension_numbers<[1], [1], [0], [0], [0, 0, 1, 0], [], []>} : vector<8x256xbf16>, vector<64x256xbf16>, vector<8x64xf32> -> vector<8x64xf32>
    %cst_66 = arith.constant dense<0.000000e+00> : vector<8x8xf32>
    %147 = tpu.matmul %145, %145, %cst_66 {dimension_numbers = #tpu.dot_dimension_numbers<[1], [1], [0], [0], [0, 0, 1, 0], [], []>} : vector<8x256xbf16>, vector<8x256xbf16>, vector<8x8xf32> -> vector<8x8xf32>
    %148 = arith.truncf %147 : vector<8x8xf32> to vector<8x8xbf16>
    %cst_67 = arith.constant dense<0.000000e+00> : vector<8x64xf32>
    %149 = tpu.matmul %148, %134, %cst_67 {dimension_numbers = #tpu.dot_dimension_numbers<[1], [0], [0], [1], [0, 0, 1, 1], [], []>} : vector<8x8xbf16>, vector<8x64xbf16>, vector<8x64xf32> -> vector<8x64xf32>
    %150 = arith.mulf %133, %146 : vector<8x64xf32>
    %cst_68 = arith.constant 9.99999997E-7 : f32
    %151 = vector.broadcast %cst_68 : f32 to vector<8x64xf32>
    %152 = arith.addf %149, %151 : vector<8x64xf32>
    %153 = tpu.reciprocal %152 {approx = true} : vector<8x64xf32> -> vector<8x64xf32>
    %154 = arith.mulf %150, %153 : vector<8x64xf32>
    %c6_i32 = arith.constant 6 : i32
    %155 = arith.truncf %154 : vector<8x64xf32> to vector<8x64xbf16>
    %156 = arith.truncf %144 : vector<8x256xf32> to vector<8x256xbf16>
    %cst_69 = arith.constant dense<0.000000e+00> : vector<8x8xf32>
    %157 = tpu.matmul %155, %155, %cst_69 {dimension_numbers = #tpu.dot_dimension_numbers<[1], [1], [0], [0], [0, 0, 1, 0], [], []>} : vector<8x64xbf16>, vector<8x64xbf16>, vector<8x8xf32> -> vector<8x8xf32>
    %cst_70 = arith.constant dense<0.000000e+00> : vector<8x256xf32>
    %158 = tpu.matmul %155, %14, %cst_70 {dimension_numbers = #tpu.dot_dimension_numbers<[1], [0], [0], [1], [0, 0, 1, 1], [], []>} : vector<8x64xbf16>, vector<64x256xbf16>, vector<8x256xf32> -> vector<8x256xf32>
    %159 = arith.truncf %157 : vector<8x8xf32> to vector<8x8xbf16>
    %cst_71 = arith.constant dense<0.000000e+00> : vector<8x256xf32>
    %160 = tpu.matmul %159, %156, %cst_71 {dimension_numbers = #tpu.dot_dimension_numbers<[1], [0], [0], [1], [0, 0, 1, 1], [], []>} : vector<8x8xbf16>, vector<8x256xbf16>, vector<8x256xf32> -> vector<8x256xf32>
    %161 = arith.mulf %144, %158 : vector<8x256xf32>
    %cst_72 = arith.constant 9.99999997E-7 : f32
    %162 = vector.broadcast %cst_72 : f32 to vector<8x256xf32>
    %163 = arith.addf %160, %162 : vector<8x256xf32>
    %164 = tpu.reciprocal %163 {approx = true} : vector<8x256xf32> -> vector<8x256xf32>
    %165 = arith.mulf %161, %164 : vector<8x256xf32>
    %166 = arith.truncf %165 : vector<8x256xf32> to vector<8x256xbf16>
    %cst_73 = arith.constant dense<0.000000e+00> : vector<8x64xf32>
    %167 = tpu.matmul %166, %14, %cst_73 {dimension_numbers = #tpu.dot_dimension_numbers<[1], [1], [0], [0], [0, 0, 1, 0], [], []>} : vector<8x256xbf16>, vector<64x256xbf16>, vector<8x64xf32> -> vector<8x64xf32>
    %cst_74 = arith.constant dense<0.000000e+00> : vector<8x8xf32>
    %168 = tpu.matmul %166, %166, %cst_74 {dimension_numbers = #tpu.dot_dimension_numbers<[1], [1], [0], [0], [0, 0, 1, 0], [], []>} : vector<8x256xbf16>, vector<8x256xbf16>, vector<8x8xf32> -> vector<8x8xf32>
    %169 = arith.truncf %168 : vector<8x8xf32> to vector<8x8xbf16>
    %cst_75 = arith.constant dense<0.000000e+00> : vector<8x64xf32>
    %170 = tpu.matmul %169, %155, %cst_75 {dimension_numbers = #tpu.dot_dimension_numbers<[1], [0], [0], [1], [0, 0, 1, 1], [], []>} : vector<8x8xbf16>, vector<8x64xbf16>, vector<8x64xf32> -> vector<8x64xf32>
    %171 = arith.mulf %154, %167 : vector<8x64xf32>
    %cst_76 = arith.constant 9.99999997E-7 : f32
    %172 = vector.broadcast %cst_76 : f32 to vector<8x64xf32>
    %173 = arith.addf %170, %172 : vector<8x64xf32>
    %174 = tpu.reciprocal %173 {approx = true} : vector<8x64xf32> -> vector<8x64xf32>
    %175 = arith.mulf %171, %174 : vector<8x64xf32>
    %176 = arith.truncf %175 : vector<8x64xf32> to vector<8x64xbf16>
    %cst_77 = arith.constant dense<0.000000e+00> : vector<8x8xf32>
    %177 = tpu.matmul %176, %176, %cst_77 {dimension_numbers = #tpu.dot_dimension_numbers<[1], [1], [0], [0], [0, 0, 1, 0], [], []>} : vector<8x64xbf16>, vector<8x64xbf16>, vector<8x8xf32> -> vector<8x8xf32>
    %cst_78 = arith.constant dense<0.000000e+00> : vector<8x256xf32>
    %178 = tpu.matmul %176, %14, %cst_78 {dimension_numbers = #tpu.dot_dimension_numbers<[1], [0], [0], [1], [0, 0, 1, 1], [], []>} : vector<8x64xbf16>, vector<64x256xbf16>, vector<8x256xf32> -> vector<8x256xf32>
    %179 = arith.truncf %177 : vector<8x8xf32> to vector<8x8xbf16>
    %180 = arith.truncf %165 : vector<8x256xf32> to vector<8x256xbf16>
    %cst_79 = arith.constant dense<0.000000e+00> : vector<8x256xf32>
    %181 = tpu.matmul %179, %180, %cst_79 {dimension_numbers = #tpu.dot_dimension_numbers<[1], [0], [0], [1], [0, 0, 1, 1], [], []>} : vector<8x8xbf16>, vector<8x256xbf16>, vector<8x256xf32> -> vector<8x256xf32>
    %182 = arith.mulf %165, %178 : vector<8x256xf32>
    %cst_80 = arith.constant 9.99999997E-7 : f32
    %183 = vector.broadcast %cst_80 : f32 to vector<8x256xf32>
    %184 = arith.addf %181, %183 : vector<8x256xf32>
    %185 = tpu.reciprocal %184 {approx = true} : vector<8x256xf32> -> vector<8x256xf32>
    %186 = arith.mulf %182, %185 : vector<8x256xf32>
    %187 = arith.truncf %186 : vector<8x256xf32> to vector<8x256xbf16>
    %cst_81 = arith.constant dense<0.000000e+00> : vector<64x8xf32>
    %188 = tpu.matmul %1, %176, %cst_81 {dimension_numbers = #tpu.dot_dimension_numbers<[1], [1], [0], [0], [0, 0, 1, 0], [], []>} : vector<64x64xbf16>, vector<8x64xbf16>, vector<64x8xf32> -> vector<64x8xf32>
    %189 = arith.truncf %188 : vector<64x8xf32> to vector<64x8xbf16>
    %cst_82 = arith.constant dense<0.000000e+00> : vector<64x256xf32>
    %190 = tpu.matmul %189, %187, %cst_82 {dimension_numbers = #tpu.dot_dimension_numbers<[1], [0], [0], [1], [0, 0, 1, 1], [], []>} : vector<64x8xbf16>, vector<8x256xbf16>, vector<64x256xf32> -> vector<64x256xf32>
    %191 = vector.broadcast %3 : vector<64x1xf32> to vector<64x256xf32>
    %192 = arith.addf %190, %191 : vector<64x256xf32>
    %cst_83 = arith.constant dense<0.000000e+00> : vector<64xf32>
    %193 = vector.multi_reduction <add>, %192, %cst_83 [1] : vector<64x256xf32> to vector<64xf32>
    %194 = vector.shape_cast %193 : vector<64xf32> to vector<64x1xf32>
    %195 = arith.mulf %192, %192 : vector<64x256xf32>
    %cst_84 = arith.constant dense<0.000000e+00> : vector<64xf32>
    %196 = vector.multi_reduction <add>, %195, %cst_84 [1] : vector<64x256xf32> to vector<64xf32>
    %197 = vector.shape_cast %196 : vector<64xf32> to vector<64x1xf32>
    %198 = vector.shape_cast %194 : vector<64x1xf32> to vector<32x2x1xf32>
    %cst_85 = arith.constant dense<0.000000e+00> : vector<32x1xf32>
    %199 = vector.multi_reduction <add>, %198, %cst_85 [1] : vector<32x2x1xf32> to vector<32x1xf32>
    %200 = vector.shape_cast %199 : vector<32x1xf32> to vector<32x1x1xf32>
    %cst_86 = arith.constant 0.001953125 : f32
    %201 = vector.broadcast %cst_86 : f32 to vector<32x1x1xf32>
    %202 = arith.mulf %200, %201 : vector<32x1x1xf32>
    %203 = vector.shape_cast %197 : vector<64x1xf32> to vector<32x2x1xf32>
    %cst_87 = arith.constant dense<0.000000e+00> : vector<32x1xf32>
    %204 = vector.multi_reduction <add>, %203, %cst_87 [1] : vector<32x2x1xf32> to vector<32x1xf32>
    %205 = vector.shape_cast %204 : vector<32x1xf32> to vector<32x1x1xf32>
    %cst_88 = arith.constant 0.001953125 : f32
    %206 = vector.broadcast %cst_88 : f32 to vector<32x1x1xf32>
    %207 = arith.mulf %205, %206 : vector<32x1x1xf32>
    %208 = arith.mulf %202, %202 : vector<32x1x1xf32>
    %209 = arith.subf %207, %208 : vector<32x1x1xf32>
    %cst_89 = arith.constant 0.000000e+00 : f32
    %210 = vector.broadcast %cst_89 : f32 to vector<32x1x1xf32>
    %211 = arith.maximumf %209, %210 : vector<32x1x1xf32>
    %cst_90 = arith.constant 9.99999974E-6 : f32
    %212 = vector.broadcast %cst_90 : f32 to vector<32x1x1xf32>
    %213 = arith.addf %211, %212 : vector<32x1x1xf32>
    %214 = math.rsqrt %213 : vector<32x1x1xf32>
    %215 = vector.shape_cast %202 : vector<32x1x1xf32> to vector<32x1x1xf32>
    %216 = vector.broadcast %215 : vector<32x1x1xf32> to vector<32x2x1xf32>
    %217 = vector.shape_cast %216 : vector<32x2x1xf32> to vector<64x1xf32>
    %218 = vector.shape_cast %214 : vector<32x1x1xf32> to vector<32x1x1xf32>
    %219 = vector.broadcast %218 : vector<32x1x1xf32> to vector<32x2x1xf32>
    %220 = vector.shape_cast %219 : vector<32x2x1xf32> to vector<64x1xf32>
    %221 = arith.mulf %4, %220 : vector<64x1xf32>
    %222 = arith.mulf %217, %221 : vector<64x1xf32>
    %223 = arith.subf %5, %222 : vector<64x1xf32>
    %c0_91 = arith.constant 0 : index
    %c0_92 = arith.constant 0 : index
    %c0_93 = arith.constant 0 : index
    %224 = vector.load %arg1[%c0_91, %c0_92, %c0_93] : memref<1x64x256xf32, #tpu.memory_space<vmem>>, vector<1x64x256xf32>
    %225 = vector.shape_cast %224 : vector<1x64x256xf32> to vector<64x256xf32>
    %226 = vector.broadcast %221 : vector<64x1xf32> to vector<64x256xf32>
    %227 = arith.mulf %192, %226 : vector<64x256xf32>
    %228 = arith.addf %225, %227 : vector<64x256xf32>
    %229 = vector.broadcast %223 : vector<64x1xf32> to vector<64x256xf32>
    %230 = arith.addf %228, %229 : vector<64x256xf32>
    %cst_94 = arith.constant 0.000000e+00 : f32
    %231 = vector.broadcast %cst_94 : f32 to vector<64x256xf32>
    %232 = arith.maximumf %230, %231 : vector<64x256xf32>
    %c0_95 = arith.constant 0 : index
    %c0_96 = arith.constant 0 : index
    %c0_97 = arith.constant 0 : index
    %233 = vector.load %arg9[%c0_95, %c0_96, %c0_97] : memref<1x64x256xf32, #tpu.memory_space<vmem>>, vector<1x64x256xf32>
    %234 = vector.shape_cast %233 : vector<1x64x256xf32> to vector<64x256xf32>
    %235 = vector.shape_cast %232 : vector<64x256xf32> to vector<1x64x256xf32>
    tpu.vector_store %arg9[%c0_95, %c0_96, %c0_97], %235 {strides = array<i32>} : memref<1x64x256xf32, #tpu.memory_space<vmem>>, vector<1x64x256xf32>,
    return
  }
  func.func @transform_0(%arg0: i32) -> (i32, i32, i32) {
    %c0_i32 = arith.constant 0 : i32
    %c0_i32_0 = arith.constant 0 : i32
    %c0_i32_1 = arith.constant 0 : i32
    return %arg0, %c0_i32, %c0_i32_0 : i32, i32, i32
  }
  func.func @transform_1(%arg0: i32) -> (i32, i32, i32) {
    %c0_i32 = arith.constant 0 : i32
    %c0_i32_0 = arith.constant 0 : i32
    %c0_i32_1 = arith.constant 0 : i32
    return %arg0, %c0_i32, %c0_i32_0 : i32, i32, i32
  }
  func.func @transform_2(%arg0: i32) -> (i32, i32) {
    %c0_i32 = arith.constant 0 : i32
    %c0_i32_0 = arith.constant 0 : i32
    %c0_i32_1 = arith.constant 0 : i32
    return %c0_i32, %c0_i32_0 : i32, i32
  }
  func.func @transform_3(%arg0: i32) -> (i32, i32) {
    %c0_i32 = arith.constant 0 : i32
    %c0_i32_0 = arith.constant 0 : i32
    %c0_i32_1 = arith.constant 0 : i32
    return %c0_i32, %c0_i32_0 : i32, i32
  }
  func.func @transform_4(%arg0: i32) -> (i32, i32) {
    %c0_i32 = arith.constant 0 : i32
    %c0_i32_0 = arith.constant 0 : i32
    %c0_i32_1 = arith.constant 0 : i32
    return %c0_i32, %c0_i32_0 : i32, i32
  }
  func.func @transform_5(%arg0: i32) -> (i32, i32) {
    %c0_i32 = arith.constant 0 : i32
    %c0_i32_0 = arith.constant 0 : i32
    %c0_i32_1 = arith.constant 0 : i32
    return %c0_i32, %c0_i32_0 : i32, i32
  }
  func.func @transform_6(%arg0: i32) -> (i32, i32) {
    %c0_i32 = arith.constant 0 : i32
    %c0_i32_0 = arith.constant 0 : i32
    %c0_i32_1 = arith.constant 0 : i32
    return %c0_i32, %c0_i32_0 : i32, i32
  }
  func.func @transform_7(%arg0: i32) -> (i32, i32) {
    %c0_i32 = arith.constant 0 : i32
    %c0_i32_0 = arith.constant 0 : i32
    %c0_i32_1 = arith.constant 0 : i32
    return %c0_i32, %c0_i32_0 : i32, i32
  }
  func.func @transform_8(%arg0: i32) -> (i32, i32, i32) {
    %c0_i32 = arith.constant 0 : i32
    %c0_i32_0 = arith.constant 0 : i32
    %c0_i32_1 = arith.constant 0 : i32
    return %arg0, %c0_i32, %c0_i32_0 : i32, i32, i32
  }
}

</mosaic_0001>

<bundles_post_ra>
// kernel: tpu_custom_call.1
= control target key start
LH: loop header
LB: loop body
LE: loop exit
PB: predicated region body
PF: predicated region fallthrough
CT: control target
= control target key end

     0   :  { %13 = vsyncpa [#allocation3], 0  ;;  %s5810_s0 = inlined_call_operand.hbm [shape: f32[2,64,256], index: 0, kind: input, shape index: {}]   ;;  %s5811_s1 = inlined_call_operand.vmem [shape: f32[2,8,64], index: 1, kind: input, shape index: {}]   ;;  %s5812_s2 = inlined_call_operand.vmem [shape: bf16[64,64], index: 2, kind: input, shape index: {}]   ;;  %s5813_s3 = inlined_call_operand.vmem [shape: f32[64,1], index: 3, kind: input, shape index: {}]   ;;  %s5814_s4 = inlined_call_operand.vmem [shape: bf16[64,64], index: 4, kind: input, shape index: {}]   ;;  %s5815_s5 = inlined_call_operand.vmem [shape: f32[64,1], index: 5, kind: input, shape index: {}]   ;;  %s5816_s6 = inlined_call_operand.vmem [shape: f32[64,1], index: 6, kind: input, shape index: {}]   ;;  %s5817_s7 = inlined_call_operand.vmem [shape: f32[64,1], index: 7, kind: input, shape index: {}]   ;;  %s5818_s8 = inlined_call_operand.hbm [shape: f32[2,64,256], index: 8, kind: output, shape index: {}]  }
   0x1   :  { %15 = vsyncpa [#allocation3 + $0x1], 0 }
   0x2   :  { %16 = vsyncpa [#allocation4], 0 }
   0x3   :  { %18 = vsyncpa [#allocation4 + $0x1], 0  ;;  %s4369_s27 = smov 0   ;;  %s4371_s28 = smov 0  }
   0x4   :  { %s4373_s29 = smov 0   ;;  %s4375_s30 = smov 0  }
   0x5 LB: > { %5841 = sst [smem:[#allocation8_spill]] %s4309_s29  ;;  %s4390_s9 = sadd.s32 4294967295, %s4313_s30   ;;  %s4313_s30 = sphi %s4375_s30, %s5895_s30   ;;  %s4309_s29 = sphi %s4373_s29, %s5892_s29   ;;  %s4305_s28 = sphi %s4371_s28, %s5894_s28   ;;  %s4301_s27 = sphi %s4369_s27, %s5893_s27  }
   0x6   : > { %s3897_s10 = sadd.s32 4294967294, %s4313_s30   ;;  %s4394_s11 = sadd.s32 1, %s4313_s30  }
   0x7   : > { %s31_s12 = sadd.s32 1, %s4309_s29  ;;  %s28_s13 = ssub.s32 %s4313_s30, %s4394_s11 }
   0x8   : > { %p38_p0 = scmp.ne.s32.totalorder %s4309_s29, %s4305_s28  ;;  %p29_p1 = scmp.eq.s32.totalorder %s28_s13, 0 }
   0x9   : > { %p39_p2 = scmp.eq.s32.totalorder %s4313_s30, 0  ;;  %p44_p3 = scmp.ne.s32.totalorder %s4305_s28, %s4301_s27 }
   0xa   : > { %p45_p4 = scmp.eq.s32.totalorder %s4390_s9, 0  ;;  %p220_p7 = scmp.eq.s32.totalorder %s4390_s9, 1 }
   0xb   : > { %s4406_s14 = scalar_select %p29_p1, %s4309_s29, %s31_s12  }
   0xc   : > { %p4408_p5 = por %p39_p2, %p38_p0  ;;  %p4412_p6 = por %p45_p4, %p44_p3 }
   0xd   : > { %5842 = sst [smem:[#allocation9_spill]] %s4406_s14  ;;  %p226_p8 = scmp.eq.s32.totalorder %s3897_s10, 1 }
   0xe   : > { %p4037_p10 = scmp.lt.s32.totalorder %s4313_s30, 2  ;;  %p4419_p11 = por %p220_p7, %p38_p0 }
   0xf   : > { %p4423_p12 = por %p226_p8, %p44_p3  ;;  %s264_s19 = sand.u32 1, %s4309_s29  }
  0x10   : > { %s4011_s20 = sshll.u32 %s4313_s30, 7  ;;  %s3900_s21 = sshll.u32 %s264_s19, 7 }
  0x11   : > { %s273_s24 = scalar_lea.hbm %s5810_s0, %s4011_s20  ;;  %s268_s26 = scalar_lea.vmem [#allocation2], %s3900_s21 }
  0x12   : > { %s274_s25 = sshll.u32 %s273_s24, 4  ;;  %s276_s10 = sshll.u32 %s268_s26, 4  ;;  %s275_s25 = int_to_ptr.hbm [resolvable:$true] %s274_s25  ;;  %s277_s10 = int_to_ptr.vmem [resolvable:$true] %s276_s10 }
  0x13   : > { %p4434_p13 = pnand %p4037_p10, %p4408_p5  ;;  %p3903_p0 = scmp.ge.s32.totalorder %s4313_s30, 1 }
  0x14   : > { %p291_p1 = scmp.lt.s32.totalorder %s4313_s30, 3  ;;  %s265_s13 = scalar_lea.sflag [#allocation3], %s264_s19 }
  0x15   : > { %s4217_s14 = sshra.s32 %s275_s25, 4  ;;  %p4221_p3 = pneg %p4434_p13  ;;  %s4218_s14 = int_to_ptr.hbm [resolvable:$true] %s4217_s14 }
  0x16   : > { %s4219_s29 = scalar_lea.hbm %s4218_s14, 128  ;;  %s4224_s15 = scalar_lea.hbm %s5810_s0, 256 }
  0x17   : > { %p4220_p2 = scmp.ne.s32.totalorder %s4218_s14, %s4219_s29  ;;  %p4225_p5 = scmp.lt.s32.totalorder %s4218_s14, %s5810_s0 }
  0x18   : > { %p4226_p8 = scmp.lt.s32.totalorder %s4224_s15, %s4219_s29 }
  0x19   : > { %p4222_p4 = pnand %p4221_p3, %p4220_p2 }
  0x1a   : > { %p4227_p10 = por %p4226_p8, %p4225_p5 }
  0x1b   : > { %p4223_p7 = pneg %p4222_p4 }
  0x1d   : > { %p4228_p9 = pnand %p4227_p10, %p4223_p7 }
  0x1f   : > { %4231 = shalt.err (!%p4228_p9)
}
  0x20   : > { %s4315_s19 = smov 256   ;;  %s4316_s24 = smov 16  }
  0x21   : > { %4032 = dma.hbm_to_vmem [thread:$0]  (!%p4434_p13), %s275_s25, 2048, %s277_s10, %s265_s13, %s4315_s19, %s4315_s19, %s4316_s24  }
  0x22   : > { %p292_p2 = pnand %p3903_p0, %p291_p1 }
  0x24   : > { %295 = sbr.rel (%p292_p2) target bundleno = 5338 (0x14da), region = 52 }
  0x29   : > { %s4455_s26 = sand.u32 1, %s4305_s28  }
  0x2a   : > { %s3904_s29 = sshll.u32 %s4455_s26, 7  ;;  %s298_s14 = scalar_lea.sflag [#allocation3], %s4455_s26 }
  0x2b   : > { %s4461_s20 = scalar_lea.vmem [#allocation2], %s3904_s29 }
  0x2c   : > { %4292 = dma.done.wait (%p4412_p6), %s298_s14, 2048  }
  0x2d   : > { %4294 = vsyncadd (%p4412_p6), %s298_s14, 4294965248  ;;  %v4317_v0 = vmov 0   ;;  %v404_v1 = vld [vmem:[%s4461_s20 + $0x60] sm:$0xff]  ;;  %v406_v2 = vld [vmem:[%s4461_s20 + $0x70] sm:$0xff]  ;;  %vm476_vm0 = vcmask 523264   ;;  %p339_p6 = scmp.lt.s32.totalorder %s4390_s9, 1 }
  0x2e   : > { %4080 = vset.pattern.permute.xlu0 %v4317_v0  ;;  %4081 = vset.pattern.permute.xlu1 %v4317_v0  ;;  %v405_v3 = vld [vmem:[%s4461_s20 + $0x68] sm:$0xff]  ;;  %v414_v4 = vpack.c.bf16 %v406_v2, %v404_v1  ;;  %v407_v5 = vld [vmem:[%s4461_s20 + $0x78] sm:$0xff]  ;;  %v400_v6 = vld [vmem:[%s4461_s20 + $0x40] sm:$0xff]  ;;  %vm658_vm1 = vcmask 1043456   ;;  %vm654_vm2 = vcmask 64512   ;;  %vm2237_vm3 = vcmask 1041408  }
  0x2f   : > { %4082 = vset.pattern.permute.xlu2 %v4317_v0  ;;  %v402_v7 = vld [vmem:[%s4461_s20 + $0x50] sm:$0xff]  ;;  %v415_v8 = vpack.c.bf16 %v407_v5, %v405_v3  ;;  %v401_v9 = vld [vmem:[%s4461_s20 + $0x48] sm:$0xff]  ;;  %v403_v10 = vld [vmem:[%s4461_s20 + $0x58] sm:$0xff]  ;;  %s340_s13 = scalar_select %p339_p6, %s4390_s9, 1 }
  0x30   : > { %4021 = vmatpush.bf16.msra.mxu3 %v414_v4  ;;  %v412_v11 = vpack.c.bf16 %v402_v7, %v400_v6  ;;  %493 = vmatpush.bf16.msra.mxu0 %v414_v4  ;;  %v413_v12 = vpack.c.bf16 %v403_v10, %v401_v9  ;;  %v396_v13 = vld [vmem:[%s4461_s20 + $0x20] sm:$0xff]  ;;  %v398_v14 = vld [vmem:[%s4461_s20 + $0x30] sm:$0xff]  ;;  %v366_v15 = vld [vmem:[%s5813_s3 + $0x30] sm:$0xff]  ;;  %s5724_s25 = scalar_lea.vmem [#allocation5], %s3904_s29  ;;  %s4020_s29 = sshll.u32 %s4390_s9, 7 }
  0x31   : > { %522 = vmatpush.bf16.msra.mxu1 %v415_v8  ;;  %v397_v16 = vld [vmem:[%s4461_s20 + $0x28] sm:$0xff]  ;;  %v399_v17 = vld [vmem:[%s4461_s20 + $0x38] sm:$0xff]  ;;  %448 = vperm.xlu0 %4080, %v366_v15   ;;  %v410_v19 = vpack.c.bf16 %v398_v14, %v396_v13  ;;  %v392_v21 = vld [vmem:[%s4461_s20] sm:$0xff]  ;;  %s3906_s21 = sshll.u32 %s340_s13, 3  ;;  %s3808_s13 = scalar_lea.hbm %s5818_s8, %s4020_s29 }
  0x32   : > { %v364_v18 = vld [vmem:[%s5813_s3 + $0x20] sm:$0xff]  ;;  %v411_v20 = vpack.c.bf16 %v399_v17, %v397_v16  ;;  %v394_v22 = vld [vmem:[%s4461_s20 + $0x10] sm:$0xff]  ;;  %v393_v23 = vld [vmem:[%s4461_s20 + $0x8] sm:$0xff]  ;;  %s342_s23 = scalar_lea.vmem %s5811_s1, %s3906_s21  ;;  %s3809_s9 = sshll.u32 %s5724_s25, 4  ;;  %s3810_s9 = int_to_ptr.vmem [resolvable:$true] %s3809_s9 }
  0x33   : > { %438 = vperm.xlu1 %4081, %v364_v18   ;;  %v395_v24 = vld [vmem:[%s4461_s20 + $0x18] sm:$0xff]  ;;  %v367_v25 = vld [vmem:[%s5813_s3 + $0x38] sm:$0xff]  ;;  %v408_v26 = vpack.c.bf16 %v394_v22, %v392_v21  ;;  %v365_v28 = vld [vmem:[%s5813_s3 + $0x28] sm:$0xff]  ;;  %s3811_s21 = sshll.u32 %s3808_s13, 4  ;;  %s3797_s15 = scalar_lea.sflag [#allocation4], %s4455_s26  ;;  %s3812_s21 = int_to_ptr.hbm [resolvable:$true] %s3811_s21 }
  0x34   : > { %4022 = vmatpush.bf16.msra.mxu3 %v412_v11  ;;  %494 = vmatpush.bf16.msra.mxu0 %v412_v11  ;;  %v409_v27 = vpack.c.bf16 %v395_v24, %v393_v23  ;;  %v4014_v29 = vld [vmem:[%s5812_s2 + $0x10] sm:$0xff]  ;;  %v4012_v30 = vld [vmem:[%s5812_s2] sm:$0xff]  ;;  %v361_v33 = vld [vmem:[%s5813_s3 + $0x8] sm:$0xff]  ;;  %s4261_s22 = sshra.s32 %s3812_s21, 4  ;;  %s4267_s24 = scalar_lea.hbm %s5818_s8, 256  ;;  %s4262_s22 = int_to_ptr.hbm [resolvable:$true] %s4261_s22 }
  0x35   : > { %523 = vmatpush.bf16.msra.mxu1 %v413_v12  ;;  %v360_v31 = vld [vmem:[%s5813_s3] sm:$0xff]  ;;  %v362_v32 = vld [vmem:[%s5813_s3 + $0x10] sm:$0xff]  ;;  %v369_v34 = vld [vmem:[%s5815_s5 + $0x8] sm:$0xff]  ;;  %p4268_p1 = scmp.lt.s32.totalorder %s4262_s22, %s5818_s8 }
  0x36   : > { %428 = vperm.xlu2 %4082, %v362_v32   ;;  %v370_v35 = vld [vmem:[%s5815_s5 + $0x10] sm:$0xff]  ;;  %v4015_v36 = vld [vmem:[%s5812_s2 + $0x18] sm:$0xff]  ;;  %v4013_v37 = vld [vmem:[%s5812_s2 + $0x8] sm:$0xff] }
  0x37   : > { %v372_v38 = vld [vmem:[%s5815_s5 + $0x20] sm:$0xff]  ;;  %v363_v39 = vld [vmem:[%s5813_s3 + $0x18] sm:$0xff]  ;;  %v373_v40 = vld [vmem:[%s5815_s5 + $0x28] sm:$0xff] }
  0x38   : > { %4023 = vmatpush.bf16.msra.mxu3 %v410_v19  ;;  %495 = vmatpush.bf16.msra.mxu0 %v410_v19  ;;  %v368_v41 = vld [vmem:[%s5815_s5] sm:$0xff]  ;;  %v375_v42 = vld [vmem:[%s5815_s5 + $0x38] sm:$0xff]  ;;  %v374_v44 = vld [vmem:[%s5815_s5 + $0x30] sm:$0xff] }
  0x39   : > { %524 = vmatpush.bf16.msra.mxu1 %v411_v20  ;;  %453 = vperm.xlu0 %4080, %v367_v25   ;;  %v371_v43 = vld [vmem:[%s5815_s5 + $0x18] sm:$0xff]  ;;  %v4569_v22 = vld [vmem:[%s342_s23] sm:$0xff]  ;;  %s4263_s23 = scalar_lea.hbm %s4262_s22, 128 }
  0x3a   : > { %v4575_v24 = vpack.c.bf16 %v4569_v22, %v4569_v22  ;;  %p4264_p9 = scmp.ne.s32.totalorder %s4262_s22, %s4263_s23  ;;  %p4269_p3 = scmp.lt.s32.totalorder %s4267_s24, %s4263_s23 }
  0x3b   : > { %443 = vperm.xlu1 %4081, %v365_v28  }
  0x3c   : > { %4024 = vmatpush.bf16.msra.mxu3 %v408_v26  ;;  %496 = vmatpush.bf16.msra.mxu0 %v408_v26  ;;  %p4265_p13 = pnand %p4264_p9, %p4419_p11  ;;  %p4270_p4 = por %p4269_p3, %p4268_p1 }
  0x3d   : > { %525 = vmatpush.bf16.msra.mxu1 %v409_v27 }
  0x3e   : > { %433 = vperm.xlu2 %4082, %v363_v39   ;;  %p4266_p0 = pneg %p4265_p13 }
  0x3f   : > { %3925 = vmatmul.msk.bf16.vlgmr.msra.gmra.mxu3 %vm476_vm0, %v4014_v29  ;;  %3923 = vmatmul.msk.bf16.vlgmr.msra.gmra.mxu0 %vm476_vm0, %v4012_v30 }
  0x40   : > { %3927 = vmatmul.msk.bf16.vlgmr.msra.gmra.mxu1 %vm476_vm0, %v4012_v30  ;;  %p4271_p7 = pnand %p4270_p4, %p4266_p0 }
  0x41   : > { %418 = vperm.xlu0 %4080, %v360_v31  }
  0x43   : > { %423 = vperm.xlu1 %4081, %v361_v33  }
  0x46   : > { %1891 = vperm.xlu2 %4082, %v368_v41  }
  0x49   : > { %1896 = vperm.xlu0 %4080, %v369_v34  }
  0x4b   : > { %1901 = vperm.xlu1 %4081, %v370_v35  }
  0x4e   : > { %1906 = vperm.xlu2 %4082, %v371_v43  }
  0x4f   : > { %3926 = vmatmul.msk.bf16.gmra.mxu3 %vm476_vm0, %v4015_v36  ;;  %3924 = vmatmul.msk.bf16.gmra.mxu0 %vm476_vm0, %v4013_v37 }
  0x50   : > { %3928 = vmatmul.msk.bf16.gmra.mxu1 %vm476_vm0, %v4013_v37 }
  0x51   : > { %1911 = vperm.xlu0 %4080, %v372_v38  }
  0x53   : > { %1916 = vperm.xlu1 %4081, %v373_v40  }
  0x56   : > { %1921 = vperm.xlu2 %4082, %v374_v44  }
  0x59   : > { %1926 = vperm.xlu0 %4080, %v375_v42  }
  0x60   : > { %3929 = vmatmul.msk.bf16.gmra.mxu1 %vm476_vm0, %v4014_v29 }
  0x70   : > { %3930 = vmatmul.msk.bf16.gmra.mxu1 %vm476_vm0, %v4015_v36  ;;  %v574_v36 = vsel %vm476_vm0, %v4575_v24, 0 }
  0x71   : > { %645 = vmatpush.bf16.xpose.msra.mxu2 %v574_v36 }
  0x78   : > { %3933 = vmatmul.msk.bf16.vlgmr.msra.gmra.mxu2 %vm476_vm0, %v4575_v24 }
  0x90   : > { %v429_v55 = vpop.permute.xlu2 %428 }
  0x98   : > { %v434_v3 = vpop.permute.xlu2 %433 }
  0xa3   : > { %v449_v52 = vpop.permute.xlu0 %448 }
  0xa5   : > { %v439_v53 = vpop.permute.xlu1 %438 }
  0xab   : > { %v454_v59 = vpop.permute.xlu0 %453 }
  0xad   : > { %v444_v60 = vpop.permute.xlu1 %443 }
  0xb3   : > { %v419_v13 = vpop.permute.xlu0 %418 }
  0xb5   : > { %v424_v14 = vpop.permute.xlu1 %423 }
  0xbc   : > { %v498_v45 = vpop.f32.mrf.mxu0 }
  0xbd   : > { %v4551_v46 = vpop.f32.mrf.mxu1  ;;  %v499_v15 = vadd.f32 %v498_v45, %v419_v13 }
  0xbe   : > { %v528_v42 = vadd.f32 %v4551_v46, %v419_v13 }
  0xbf   : > { %v547_v20 = vmax.f32 %v499_v15, 0.0 }
  0xc2   : > { %v508_v47 = vpop.f32.mrf.mxu3 }
  0xc3   : > { %v509_v63 = vadd.f32 %v508_v47, %v439_v53  ;;  %v548_v47 = vmax.f32 %v528_v42, 0.0 }
  0xc4   : > { %v500_v49 = vpop.f32.mrf.mxu0 }
  0xc5   : > { %v4553_v48 = vpop.f32.mrf.mxu1  ;;  %v555_v8 = vmax.f32 %v509_v63, 0.0  ;;  %v501_v17 = vadd.f32 %v500_v49, %v424_v14 }
  0xc6   : > { %v530_v39 = vadd.f32 %v4553_v48, %v424_v14 }
  0xc7   : > { %v549_v21 = vmax.f32 %v501_v17, 0.0 }
  0xc8   : > { %v550_v44 = vmax.f32 %v530_v39, 0.0 }
  0xc9   : > { %v4571_v23 = vpack.c.bf16 %v549_v21, %v547_v20 }
  0xca   : > { %v510_v50 = vpop.f32.mrf.mxu3  ;;  %v4600_v48 = vpack.c.bf16 %v550_v44, %v548_v47  ;;  %v754_v47 = vsel %vm658_vm1, %v4575_v24, 0 }
  0xcb   : > { %v511_v0 = vadd.f32 %v510_v50, %v444_v60 }
  0xcc   : > { %v503_v54 = vpop.f32.mrf.mxu0 }
  0xcd   : > { %v532_v51 = vpop.f32.mrf.mxu1  ;;  %v504_v4 = vadd.f32 %v503_v54, %v429_v55  ;;  %v557_v9 = vmax.f32 %v511_v0, 0.0 }
  0xce   : > { %v533_v37 = vadd.f32 %v532_v51, %v429_v55 }
  0xcf   : > { %v551_v11 = vmax.f32 %v504_v4, 0.0  ;;  %v4560_v16 = vpack.c.bf16 %v557_v9, %v555_v8 }
  0xd0   : > { %v552_v43 = vmax.f32 %v533_v37, 0.0 }
  0xd2   : > { %v513_v56 = vpop.f32.mrf.mxu3 }
  0xd3   : > { %v514_v58 = vadd.f32 %v513_v56, %v449_v52 }
  0xd4   : > { %v505_v62 = vpop.f32.mrf.mxu0 }
  0xd5   : > { %v534_v57 = vpop.f32.mrf.mxu1  ;;  %v559_v1 = vmax.f32 %v514_v58, 0.0  ;;  %v506_v7 = vadd.f32 %v505_v62, %v434_v3 }
  0xd6   : > { %v535_v33 = vadd.f32 %v534_v57, %v434_v3 }
  0xd7   : > { %v553_v12 = vmax.f32 %v506_v7, 0.0 }
  0xd8   : > { %v554_v40 = vmax.f32 %v535_v33, 0.0 }
  0xd9   : > { %v4562_v18 = vpack.c.bf16 %v553_v12, %v551_v11 }
  0xda   : > { %v515_v61 = vpop.f32.mrf.mxu3  ;;  %v4593_v45 = vpack.c.bf16 %v554_v40, %v552_v43 }
  0xdb   : > { %v516_v2 = vadd.f32 %v515_v61, %v454_v59 }
  0xdd   : > { %v561_v5 = vmax.f32 %v516_v2, 0.0  ;;  %v537_v6 = vpop.f32.mrf.mxu1 }
  0xde   : > { %v538_v30 = vadd.f32 %v537_v6, %v439_v53 }
  0xdf   : > { %v4556_v10 = vpack.c.bf16 %v561_v5, %v559_v1 }
  0xe0   : > { %v556_v38 = vmax.f32 %v538_v30, 0.0 }
  0xe1   : > { %580 = vmatpush.bf16.msrb.mxu3 %v4556_v10 }
  0xe5   : > { %v539_v19 = vpop.f32.mrf.mxu1  ;;  %581 = vmatpush.bf16.msrb.mxu3 %v4560_v16 }
  0xe6   : > { %v540_v28 = vadd.f32 %v539_v19, %v444_v60 }
  0xe8   : > { %v558_v34 = vmax.f32 %v540_v28, 0.0 }
  0xe9   : > { %582 = vmatpush.bf16.msrb.mxu3 %v4562_v18 }
  0xea   : > { %v4588_v41 = vpack.c.bf16 %v558_v34, %v556_v38 }
  0xed   : > { %v542_v25 = vpop.f32.mrf.mxu1  ;;  %583 = vmatpush.bf16.msrb.mxu3 %v4571_v23 }
  0xee   : > { %v543_v26 = vadd.f32 %v542_v25, %v449_v52 }
  0xf0   : > { %3931 = vmatmul.msk.bf16.vlgmr.msrb.gmra.mxu3 %vm476_vm0, %v4575_v24  ;;  %v560_v31 = vmax.f32 %v543_v26, 0.0 }
  0xf5   : > { %v544_v27 = vpop.f32.mrf.mxu1 }
  0xf6   : > { %v545_v29 = vadd.f32 %v544_v27, %v454_v59 }
  0xf8   : > { %v562_v32 = vmax.f32 %v545_v29, 0.0 }
  0xfa   : > { %v4580_v35 = vpack.c.bf16 %v562_v32, %v560_v31 }
  0xfb   : > { %v647_v58 = vpop.f32.mrf.mxu2 }
  0xfc   : > { %593 = vmatpush.bf16.msra.mxu3 %v4580_v35  ;;  %714 = vmatpush.bf16.xpose.msrb.mxu0 %v4580_v35  ;;  %v651_v20 = vpack.c.bf16 %v647_v58, %v647_v58 }
  0xfd   : > { %805 = vmatpush.bf16.msrb.mxu1 %v4580_v35 }
 0x100   : > { %594 = vmatpush.bf16.msra.mxu3 %v4588_v41 }
 0x101   : > { %806 = vmatpush.bf16.msrb.mxu1 %v4588_v41 }
 0x103   : > { %v649_v62 = vpop.f32.mrf.mxu2 }
 0x104   : > { %595 = vmatpush.bf16.msra.mxu3 %v4593_v45  ;;  %715 = vmatpush.bf16.xpose.msrb.mxu0 %v4588_v41 }
 0x105   : > { %807 = vmatpush.bf16.msrb.mxu1 %v4593_v45 }
 0x108   : > { %596 = vmatpush.bf16.msra.mxu3 %v4600_v48 }
 0x109   : > { %808 = vmatpush.bf16.msrb.mxu1 %v4600_v48 }
 0x10b   : > { %3932 = vmatmul.msk.bf16.vlgmr.msra.gmra.mxu3 %vm476_vm0, %v4575_v24 }
 0x10c   : > { %716 = vmatpush.bf16.xpose.msrb.mxu0 %v4593_v45 }
 0x10d   : > { %875 = vmatpush.bf16.xpose.msra.mxu1 %v4580_v35 }
 0x114   : > { %717 = vmatpush.bf16.xpose.msrb.mxu0 %v4600_v48 }
 0x115   : > { %876 = vmatpush.bf16.xpose.msra.mxu1 %v4588_v41 }
 0x11d   : > { %877 = vmatpush.bf16.xpose.msra.mxu1 %v4593_v45 }
 0x125   : > { %878 = vmatpush.bf16.xpose.msra.mxu1 %v4600_v48 }
 0x173   : > { %v585_v46 = vpop.f32.mrf.mxu3 }
 0x174   : > { %v602_v49 = vrot.slane %v585_v46, 4 }
 0x176   : > { %v603_v50 = vmax.f32 %v585_v46, %v602_v49 }
 0x178   : > { %v604_v51 = vrot.slane %v603_v50, 2 }
 0x17a   : > { %v605_v52 = vmax.f32 %v603_v50, %v604_v51 }
 0x17b   : > { %v587_v53 = vpop.f32.mrf.mxu3 }
 0x17c   : > { %v606_v54 = vrot.slane %v605_v52, 1 }
 0x17e   : > { %v607_v55 = vmax.f32 %v605_v52, %v606_v54 }
 0x180   : > { %v614_v56 = vsub.f32 %v585_v46, %v607_v55 }
 0x182   : > { %v616_v57 = vmul.f32 1.442695, %v614_v56 }
 0x184   : > { %4083 = vpow2.f32 %v616_v57 }
 0x18a   : > { %v4084_v59 = vpop.eup %4083 }
 0x18b   : > { %v620_v60 = vrot.slane %v4084_v59, 4 }
 0x18d   : > { %v621_v61 = vadd.f32 %v4084_v59, %v620_v60 }
 0x18e   : > { %v598_v63 = vpop.f32.mrf.mxu3 }
 0x18f   : > { %v622_v0 = vrot.slane %v621_v61, 2  ;;  %v608_v1 = vrot.slane %v598_v63, 4 }
 0x191   : > { %v623_v2 = vadd.f32 %v622_v0, %v621_v61  ;;  %v609_v3 = vmax.f32 %v598_v63, %v608_v1 }
 0x193   : > { %v624_v4 = vrot.slane %v623_v2, 1  ;;  %v610_v5 = vrot.slane %v609_v3, 2 }
 0x195   : > { %v625_v6 = vadd.f32 %v624_v4, %v623_v2  ;;  %v611_v7 = vmax.f32 %v609_v3, %v610_v5 }
 0x196   : > { %v600_v8 = vpop.f32.mrf.mxu3 }
 0x197   : > { %4085 = vrcp.f32 %v625_v6  ;;  %v612_v9 = vrot.slane %v611_v7, 1 }
 0x199   : > { %v613_v11 = vmax.f32 %v611_v7, %v612_v9 }
 0x19b   : > { %v615_v12 = vsub.f32 %v598_v63, %v613_v11 }
 0x19d   : > { %v4086_v13 = vpop.eup %4085  ;;  %v618_v14 = vmul.f32 1.442695, %v615_v12 }
 0x19e   : > { %v634_v15 = vmul.f32 %v4086_v13, %v4084_v59 }
 0x19f   : > { %4087 = vpow2.f32 %v618_v14 }
 0x1a0   : > { %v652_v17 = vmul.f32 %v634_v15, %v585_v46  ;;  %v636_v19 = vpack.c.bf16 %v634_v15, %v634_v15 }
 0x1a2   : > { %v660_v21 = vsel %vm658_vm1, %v636_v19, 0 }
 0x1a3   : > { %672 = vmatpush.bf16.msrb.mxu3 %v660_v21 }
 0x1a5   : > { %v4088_v25 = vpop.eup %4087 }
 0x1a6   : > { %3934 = vmatmul.msk.bf16.vlgmr.msrb.gmra.mxu3 %vm654_vm2, %v651_v20  ;;  %v626_v26 = vrot.slane %v4088_v25, 4 }
 0x1a7   : > { %701 = vmatpush.bf16.xpose.msra.mxu3 %v4556_v10 }
 0x1a8   : > { %v627_v27 = vadd.f32 %v4088_v25, %v626_v26 }
 0x1aa   : > { %v628_v28 = vrot.slane %v627_v27, 2 }
 0x1ac   : > { %v629_v29 = vadd.f32 %v628_v28, %v627_v27 }
 0x1ae   : > { %v630_v30 = vrot.slane %v629_v29, 1 }
 0x1af   : > { %702 = vmatpush.bf16.xpose.msra.mxu3 %v4560_v16 }
 0x1b0   : > { %v631_v31 = vadd.f32 %v630_v30, %v629_v29 }
 0x1b2   : > { %4089 = vrcp.f32 %v631_v31 }
 0x1b7   : > { %703 = vmatpush.bf16.xpose.msra.mxu3 %v4562_v18 }
 0x1b8   : > { %v4090_v32 = vpop.eup %4089 }
 0x1b9   : > { %v635_v33 = vmul.f32 %v4090_v32, %v4088_v25 }
 0x1bb   : > { %v637_v34 = vpack.c.bf16 %v635_v33, %v635_v33  ;;  %v653_v36 = vmul.f32 %v635_v33, %v598_v63 }
 0x1bd   : > { %v663_v37 = vsel %vm658_vm1, %v637_v34, 0 }
 0x1be   : > { %685 = vmatpush.bf16.msrb.mxu2 %v663_v37 }
 0x1bf   : > { %704 = vmatpush.bf16.xpose.msra.mxu3 %v4571_v23 }
 0x1c1   : > { %3935 = vmatmul.msk.bf16.vlgmr.msrb.gmra.mxu2 %vm654_vm2, %v651_v20 }
 0x229   : > { %v674_v38 = vpop.f32.mrf.mxu3 }
 0x22a   : > { %v675_v39 = vadd.f32 1e-06, %v674_v38 }
 0x22c   : > { %4091 = vrcp.f32 %v675_v39 }
 0x231   : > { %v676_v40 = vpop.f32.mrf.mxu3 }
 0x232   : > { %v4092_v42 = vpop.eup %4091 }
 0x233   : > { %v4620_v43 = vmul.f32 %v4092_v42, %v652_v17 }
 0x235   : > { %v695_v44 = vpack.c.bf16 %v4620_v43, %v4620_v43 }
 0x237   : > { %705 = vmatmul.bf16.vlgmr.msra.gmra.mxu3 %v695_v44  ;;  %730 = vmatpush.bf16.xpose.msra.mxu2 %v695_v44  ;;  %v821_v46 = vsel %vm658_vm1, %v695_v44, 0 }
 0x23e   : > { %731 = vmatmul.bf16.vlgmr.msra.gmra.mxu2 %v695_v44 }
 0x23f   : > { %763 = vmatpush.bf16.msrb.mxu2 %v754_v47 }
 0x243   : > { %833 = vmatpush.bf16.msra.mxu2 %v821_v46 }
 0x244   : > { %v687_v49 = vpop.f32.mrf.mxu2 }
 0x245   : > { %v688_v50 = vadd.f32 1e-06, %v687_v49 }
 0x247   : > { %4093 = vrcp.f32 %v688_v50 }
 0x24c   : > { %v689_v51 = vpop.f32.mrf.mxu2 }
 0x24d   : > { %v4094_v52 = vpop.eup %4093 }
 0x24e   : > { %v4627_v53 = vmul.f32 %v4094_v52, %v653_v36 }
 0x250   : > { %v696_v54 = vpack.c.bf16 %v4627_v53, %v4627_v53 }
 0x252   : > { %718 = vmatmul.bf16.vlgmr.msrb.gmra.mxu0 %v696_v54 }
 0x253   : > { %743 = vmatpush.bf16.xpose.msra.mxu0 %v696_v54 }
 0x25b   : > { %792 = vmatpush.bf16.msrb.mxu0 %v4556_v10 }
 0x25f   : > { %793 = vmatpush.bf16.msrb.mxu0 %v4560_v16 }
 0x262   : > { %744 = vmatmul.bf16.vlgmr.msra.gmra.mxu0 %v696_v54 }
 0x263   : > { %794 = vmatpush.bf16.msrb.mxu0 %v4562_v18 }
 0x267   : > { %795 = vmatpush.bf16.msrb.mxu0 %v4571_v23 }
 0x26b   : > { %862 = vmatpush.bf16.xpose.msra.mxu0 %v4556_v10 }
 0x273   : > { %863 = vmatpush.bf16.xpose.msra.mxu0 %v4560_v16 }
 0x27b   : > { %864 = vmatpush.bf16.xpose.msra.mxu0 %v4562_v18 }
 0x283   : > { %865 = vmatpush.bf16.xpose.msra.mxu0 %v4571_v23 }
 0x2ba   : > { %v706_v24 = vpop.f32.mrf.mxu3 }
 0x2c1   : > { %v732_v55 = vpop.f32.mrf.mxu2 }
 0x2c2   : > { %v708_v56 = vpop.f32.mrf.mxu3 }
 0x2c9   : > { %v734_v57 = vpop.f32.mrf.mxu2 }
 0x2cf   : > { %v719_v58 = vpop.f32.mrf.mxu0 }
 0x2d0   : > { %v720_v59 = vadd.f32 %v719_v58, %v706_v24 }
 0x2d2   : > { %v750_v3 = vmul.f32 %v720_v59, %v4569_v22  ;;  %v824_v22 = vsel %vm658_vm1, %v696_v54, 0 }
 0x2d7   : > { %v721_v60 = vpop.f32.mrf.mxu0 }
 0x2df   : > { %v745_v61 = vpop.f32.mrf.mxu0 }
 0x2e0   : > { %v746_v62 = vadd.f32 %v745_v61, %v732_v55 }
 0x2e2   : > { %v749_v63 = vpack.c.bf16 %v746_v62, %v746_v62 }
 0x2e4   : > { %3936 = vmatmul.msk.bf16.vlgmr.msrb.gmra.mxu2 %vm654_vm2, %v749_v63 }
 0x2e7   : > { %v747_v0 = vpop.f32.mrf.mxu0 }
 0x367   : > { %v765_v1 = vpop.f32.mrf.mxu2 }
 0x368   : > { %v766_v2 = vadd.f32 1e-06, %v765_v1 }
 0x36a   : > { %4095 = vrcp.f32 %v766_v2 }
 0x36f   : > { %v767_v4 = vpop.f32.mrf.mxu2 }
 0x370   : > { %v4096_v5 = vpop.eup %4095 }
 0x371   : > { %v4641_v6 = vmul.f32 %v4096_v5, %v750_v3 }
 0x373   : > { %v771_v7 = vpack.c.bf16 %v4641_v6, %v4641_v6 }
 0x375   : > { %3938 = vmatmul.msk.bf16.vlgmr.msrb.gmra.mxu0 %vm476_vm0, %v771_v7  ;;  %3939 = vmatmul.msk.bf16.vlgmr.msrb.gmra.mxu1 %vm476_vm0, %v771_v7  ;;  %v773_v8 = vsel %vm476_vm0, %v771_v7, 0  ;;  %v915_v37 = vsel %vm658_vm1, %v771_v7, 0 }
 0x376   : > { %953 = vmatpush.bf16.msrb.mxu0 %v4556_v10  ;;  %966 = vmatpush.bf16.msrb.mxu1 %v4580_v35 }
 0x377   : > { %782 = vmatpush.bf16.xpose.msrb.mxu3 %v773_v8 }
 0x37a   : > { %954 = vmatpush.bf16.msrb.mxu0 %v4560_v16  ;;  %967 = vmatpush.bf16.msrb.mxu1 %v4588_v41 }
 0x37e   : > { %3937 = vmatmul.msk.bf16.vlgmr.msrb.gmra.mxu3 %vm476_vm0, %v771_v7  ;;  %955 = vmatpush.bf16.msrb.mxu0 %v4562_v18 }
 0x37f   : > { %846 = vmatpush.bf16.msra.mxu3 %v824_v22  ;;  %968 = vmatpush.bf16.msrb.mxu1 %v4593_v45 }
 0x382   : > { %956 = vmatpush.bf16.msrb.mxu0 %v4571_v23 }
 0x383   : > { %969 = vmatpush.bf16.msrb.mxu1 %v4600_v48 }
 0x3f2   : > { %v797_v9 = vpop.f32.mrf.mxu0  ;;  %v810_v11 = vpop.f32.mrf.mxu1 }
 0x3f3   : > { %v815_v26 = vmul.f32 %v797_v9, %v4620_v43  ;;  %v816_v30 = vmul.f32 %v810_v11, %v4627_v53 }
 0x3fa   : > { %v799_v12 = vpop.f32.mrf.mxu0  ;;  %v812_v13 = vpop.f32.mrf.mxu1 }
 0x401   : > { %v784_v14 = vpop.f32.mrf.mxu3 }
 0x402   : > { %v814_v15 = vpack.c.bf16 %v784_v14, %v784_v14 }
 0x404   : > { %3940 = vmatmul.msk.bf16.vlgmr.msra.gmra.mxu2 %vm654_vm2, %v814_v15  ;;  %3941 = vmatmul.msk.bf16.vlgmr.msra.gmra.mxu3 %vm654_vm2, %v814_v15 }
 0x409   : > { %v786_v17 = vpop.f32.mrf.mxu3 }
 0x487   : > { %v835_v19 = vpop.f32.mrf.mxu2  ;;  %v848_v20 = vpop.f32.mrf.mxu3 }
 0x488   : > { %v836_v21 = vadd.f32 1e-06, %v835_v19  ;;  %v849_v25 = vadd.f32 1e-06, %v848_v20 }
 0x48a   : > { %4097 = vrcp.f32 %v836_v21 }
 0x48b   : > { %4099 = vrcp.f32 %v849_v25 }
 0x48f   : > { %v837_v27 = vpop.f32.mrf.mxu2  ;;  %v850_v28 = vpop.f32.mrf.mxu3 }
 0x490   : > { %v4098_v29 = vpop.eup %4097 }
 0x491   : > { %v4100_v31 = vpop.eup %4099  ;;  %v4662_v32 = vmul.f32 %v4098_v29, %v815_v26 }
 0x492   : > { %v4664_v33 = vmul.f32 %v4100_v31, %v816_v30 }
 0x493   : > { %v856_v34 = vpack.c.bf16 %v4662_v32, %v4662_v32 }
 0x494   : > { %v857_v36 = vpack.c.bf16 %v4664_v33, %v4664_v33 }
 0x495   : > { %866 = vmatmul.bf16.vlgmr.msra.gmra.mxu0 %v856_v34  ;;  %891 = vmatpush.bf16.xpose.msrb.mxu2 %v856_v34  ;;  %v982_v38 = vsel %vm658_vm1, %v856_v34, 0 }
 0x496   : > { %879 = vmatmul.bf16.vlgmr.msra.gmra.mxu1 %v857_v36  ;;  %904 = vmatpush.bf16.xpose.msrb.mxu3 %v857_v36  ;;  %v985_v60 = vsel %vm658_vm1, %v857_v36, 0 }
 0x497   : > { %1023 = vmatpush.bf16.xpose.msra.mxu0 %v4556_v10  ;;  %1036 = vmatpush.bf16.xpose.msra.mxu1 %v4580_v35 }
 0x49c   : > { %892 = vmatmul.bf16.vlgmr.msrb.gmra.mxu2 %v856_v34 }
 0x49d   : > { %924 = vmatpush.bf16.msra.mxu2 %v915_v37  ;;  %905 = vmatmul.bf16.vlgmr.msrb.gmra.mxu3 %v857_v36 }
 0x49f   : > { %1024 = vmatpush.bf16.xpose.msra.mxu0 %v4560_v16  ;;  %1037 = vmatpush.bf16.xpose.msra.mxu1 %v4588_v41 }
 0x4a1   : > { %994 = vmatpush.bf16.msrb.mxu2 %v982_v38 }
 0x4a7   : > { %1025 = vmatpush.bf16.xpose.msra.mxu0 %v4562_v18  ;;  %1038 = vmatpush.bf16.xpose.msra.mxu1 %v4593_v45 }
 0x4af   : > { %1026 = vmatpush.bf16.xpose.msra.mxu0 %v4571_v23  ;;  %1039 = vmatpush.bf16.xpose.msra.mxu1 %v4600_v48 }
 0x512   : > { %v867_v39 = vpop.f32.mrf.mxu0 }
 0x513   : > { %v880_v40 = vpop.f32.mrf.mxu1 }
 0x514   : > { %v881_v42 = vadd.f32 %v880_v40, %v867_v39 }
 0x516   : > { %v911_v24 = vmul.f32 %v881_v42, %v4641_v6 }
 0x51a   : > { %v869_v43 = vpop.f32.mrf.mxu0 }
 0x51b   : > { %v882_v44 = vpop.f32.mrf.mxu1 }
 0x51f   : > { %v893_v47 = vpop.f32.mrf.mxu2 }
 0x520   : > { %v906_v46 = vpop.f32.mrf.mxu3 }
 0x521   : > { %v907_v49 = vadd.f32 %v906_v46, %v893_v47 }
 0x523   : > { %v910_v50 = vpack.c.bf16 %v907_v49, %v907_v49 }
 0x525   : > { %3942 = vmatmul.msk.bf16.vlgmr.msra.gmra.mxu2 %vm654_vm2, %v910_v50 }
 0x527   : > { %v895_v51 = vpop.f32.mrf.mxu2 }
 0x528   : > { %v908_v52 = vpop.f32.mrf.mxu3 }
 0x5a8   : > { %v926_v53 = vpop.f32.mrf.mxu2 }
 0x5a9   : > { %v927_v54 = vadd.f32 1e-06, %v926_v53 }
 0x5ab   : > { %4101 = vrcp.f32 %v927_v54 }
 0x5b0   : > { %v928_v55 = vpop.f32.mrf.mxu2 }
 0x5b1   : > { %v4102_v56 = vpop.eup %4101 }
 0x5b2   : > { %v4682_v57 = vmul.f32 %v4102_v56, %v911_v24 }
 0x5b4   : > { %v932_v58 = vpack.c.bf16 %v4682_v57, %v4682_v57 }
 0x5b6   : > { %3944 = vmatmul.msk.bf16.vlgmr.msrb.gmra.mxu0 %vm476_vm0, %v932_v58  ;;  %3945 = vmatmul.msk.bf16.vlgmr.msrb.gmra.mxu1 %vm476_vm0, %v932_v58  ;;  %v934_v59 = vsel %vm476_vm0, %v932_v58, 0  ;;  %v1076_v20 = vsel %vm658_vm1, %v932_v58, 0 }
 0x5b7   : > { %1114 = vmatpush.bf16.msrb.mxu0 %v4556_v10  ;;  %1127 = vmatpush.bf16.msrb.mxu1 %v4580_v35 }
 0x5b8   : > { %943 = vmatpush.bf16.xpose.msra.mxu3 %v934_v59 }
 0x5bb   : > { %1115 = vmatpush.bf16.msrb.mxu0 %v4560_v16  ;;  %1128 = vmatpush.bf16.msrb.mxu1 %v4588_v41 }
 0x5bf   : > { %3943 = vmatmul.msk.bf16.vlgmr.msra.gmra.mxu3 %vm476_vm0, %v932_v58  ;;  %1116 = vmatpush.bf16.msrb.mxu0 %v4562_v18 }
 0x5c0   : > { %1007 = vmatpush.bf16.msrb.mxu3 %v985_v60  ;;  %1129 = vmatpush.bf16.msrb.mxu1 %v4593_v45 }
 0x5c3   : > { %1117 = vmatpush.bf16.msrb.mxu0 %v4571_v23 }
 0x5c4   : > { %1130 = vmatpush.bf16.msrb.mxu1 %v4600_v48 }
 0x633   : > { %v958_v61 = vpop.f32.mrf.mxu0  ;;  %v971_v62 = vpop.f32.mrf.mxu1 }
 0x634   : > { %v976_v8 = vmul.f32 %v958_v61, %v4662_v32  ;;  %v977_v12 = vmul.f32 %v971_v62, %v4664_v33 }
 0x63b   : > { %v960_v63 = vpop.f32.mrf.mxu0  ;;  %v973_v0 = vpop.f32.mrf.mxu1 }
 0x642   : > { %v945_v1 = vpop.f32.mrf.mxu3 }
 0x643   : > { %v975_v2 = vpack.c.bf16 %v945_v1, %v945_v1 }
 0x645   : > { %3946 = vmatmul.msk.bf16.vlgmr.msrb.gmra.mxu2 %vm654_vm2, %v975_v2  ;;  %3947 = vmatmul.msk.bf16.vlgmr.msrb.gmra.mxu3 %vm654_vm2, %v975_v2 }
 0x64a   : > { %v947_v3 = vpop.f32.mrf.mxu3 }
 0x6c8   : > { %v996_v4 = vpop.f32.mrf.mxu2  ;;  %v1009_v5 = vpop.f32.mrf.mxu3 }
 0x6c9   : > { %v997_v6 = vadd.f32 1e-06, %v996_v4  ;;  %v1010_v7 = vadd.f32 1e-06, %v1009_v5 }
 0x6cb   : > { %4103 = vrcp.f32 %v997_v6 }
 0x6cc   : > { %4105 = vrcp.f32 %v1010_v7 }
 0x6d0   : > { %v998_v22 = vpop.f32.mrf.mxu2  ;;  %v1011_v9 = vpop.f32.mrf.mxu3 }
 0x6d1   : > { %v4104_v11 = vpop.eup %4103 }
 0x6d2   : > { %v4106_v13 = vpop.eup %4105  ;;  %v4703_v14 = vmul.f32 %v4104_v11, %v976_v8 }
 0x6d3   : > { %v4705_v15 = vmul.f32 %v4106_v13, %v977_v12 }
 0x6d4   : > { %v1017_v17 = vpack.c.bf16 %v4703_v14, %v4703_v14 }
 0x6d5   : > { %v1018_v19 = vpack.c.bf16 %v4705_v15, %v4705_v15 }
 0x6d6   : > { %1027 = vmatmul.bf16.vlgmr.msra.gmra.mxu0 %v1017_v17  ;;  %1052 = vmatpush.bf16.xpose.msra.mxu2 %v1017_v17  ;;  %v1143_v21 = vsel %vm658_vm1, %v1017_v17, 0 }
 0x6d7   : > { %1040 = vmatmul.bf16.vlgmr.msra.gmra.mxu1 %v1018_v19  ;;  %1065 = vmatpush.bf16.xpose.msra.mxu3 %v1018_v19  ;;  %v1146_v46 = vsel %vm658_vm1, %v1018_v19, 0 }
 0x6d8   : > { %1184 = vmatpush.bf16.xpose.msra.mxu0 %v4556_v10  ;;  %1197 = vmatpush.bf16.xpose.msra.mxu1 %v4580_v35 }
 0x6dd   : > { %1053 = vmatmul.bf16.vlgmr.msra.gmra.mxu2 %v1017_v17 }
 0x6de   : > { %1085 = vmatpush.bf16.msrb.mxu2 %v1076_v20  ;;  %1066 = vmatmul.bf16.vlgmr.msra.gmra.mxu3 %v1018_v19 }
 0x6e0   : > { %1185 = vmatpush.bf16.xpose.msra.mxu0 %v4560_v16  ;;  %1198 = vmatpush.bf16.xpose.msra.mxu1 %v4588_v41 }
 0x6e2   : > { %1155 = vmatpush.bf16.msra.mxu2 %v1143_v21 }
 0x6e8   : > { %1186 = vmatpush.bf16.xpose.msra.mxu0 %v4562_v18  ;;  %1199 = vmatpush.bf16.xpose.msra.mxu1 %v4593_v45 }
 0x6f0   : > { %1187 = vmatpush.bf16.xpose.msra.mxu0 %v4571_v23  ;;  %1200 = vmatpush.bf16.xpose.msra.mxu1 %v4600_v48 }
 0x753   : > { %v1028_v25 = vpop.f32.mrf.mxu0 }
 0x754   : > { %v1041_v26 = vpop.f32.mrf.mxu1 }
 0x755   : > { %v1042_v27 = vadd.f32 %v1041_v26, %v1028_v25 }
 0x757   : > { %v1072_v39 = vmul.f32 %v1042_v27, %v4682_v57 }
 0x75b   : > { %v1030_v28 = vpop.f32.mrf.mxu0 }
 0x75c   : > { %v1043_v29 = vpop.f32.mrf.mxu1 }
 0x760   : > { %v1054_v30 = vpop.f32.mrf.mxu2 }
 0x761   : > { %v1067_v31 = vpop.f32.mrf.mxu3 }
 0x762   : > { %v1068_v32 = vadd.f32 %v1067_v31, %v1054_v30 }
 0x764   : > { %v1071_v33 = vpack.c.bf16 %v1068_v32, %v1068_v32 }
 0x766   : > { %3948 = vmatmul.msk.bf16.vlgmr.msrb.gmra.mxu2 %vm654_vm2, %v1071_v33 }
 0x768   : > { %v1056_v34 = vpop.f32.mrf.mxu2 }
 0x769   : > { %v1069_v36 = vpop.f32.mrf.mxu3 }
 0x7e9   : > { %v1087_v37 = vpop.f32.mrf.mxu2 }
 0x7ea   : > { %v1088_v38 = vadd.f32 1e-06, %v1087_v37 }
 0x7ec   : > { %4107 = vrcp.f32 %v1088_v38 }
 0x7f1   : > { %v1089_v40 = vpop.f32.mrf.mxu2 }
 0x7f2   : > { %v4108_v42 = vpop.eup %4107 }
 0x7f3   : > { %v4723_v43 = vmul.f32 %v4108_v42, %v1072_v39 }
 0x7f5   : > { %v1093_v44 = vpack.c.bf16 %v4723_v43, %v4723_v43 }
 0x7f7   : > { %3950 = vmatmul.msk.bf16.vlgmr.msrb.gmra.mxu0 %vm476_vm0, %v1093_v44  ;;  %3951 = vmatmul.msk.bf16.vlgmr.msrb.gmra.mxu1 %vm476_vm0, %v1093_v44  ;;  %v1095_v47 = vsel %vm476_vm0, %v1093_v44, 0  ;;  %v1237_v5 = vsel %vm658_vm1, %v1093_v44, 0 }
 0x7f8   : > { %1275 = vmatpush.bf16.msrb.mxu0 %v4556_v10  ;;  %1288 = vmatpush.bf16.msrb.mxu1 %v4580_v35 }
 0x7f9   : > { %1104 = vmatpush.bf16.xpose.msrb.mxu3 %v1095_v47 }
 0x7fc   : > { %1276 = vmatpush.bf16.msrb.mxu0 %v4560_v16  ;;  %1289 = vmatpush.bf16.msrb.mxu1 %v4588_v41 }
 0x800   : > { %3949 = vmatmul.msk.bf16.vlgmr.msrb.gmra.mxu3 %vm476_vm0, %v1093_v44  ;;  %1277 = vmatpush.bf16.msrb.mxu0 %v4562_v18 }
 0x801   : > { %1168 = vmatpush.bf16.msra.mxu3 %v1146_v46  ;;  %1290 = vmatpush.bf16.msrb.mxu1 %v4593_v45 }
 0x804   : > { %1278 = vmatpush.bf16.msrb.mxu0 %v4571_v23 }
 0x805   : > { %1291 = vmatpush.bf16.msrb.mxu1 %v4600_v48 }
 0x874   : > { %v1119_v49 = vpop.f32.mrf.mxu0  ;;  %v1132_v50 = vpop.f32.mrf.mxu1 }
 0x875   : > { %v1137_v59 = vmul.f32 %v1119_v49, %v4703_v14  ;;  %v1138_v63 = vmul.f32 %v1132_v50, %v4705_v15 }
 0x87c   : > { %v1121_v51 = vpop.f32.mrf.mxu0  ;;  %v1134_v52 = vpop.f32.mrf.mxu1 }
 0x883   : > { %v1106_v53 = vpop.f32.mrf.mxu3 }
 0x884   : > { %v1136_v54 = vpack.c.bf16 %v1106_v53, %v1106_v53 }
 0x886   : > { %3952 = vmatmul.msk.bf16.vlgmr.msra.gmra.mxu2 %vm654_vm2, %v1136_v54  ;;  %3953 = vmatmul.msk.bf16.vlgmr.msra.gmra.mxu3 %vm654_vm2, %v1136_v54 }
 0x88b   : > { %v1108_v24 = vpop.f32.mrf.mxu3 }
 0x909   : > { %v1157_v55 = vpop.f32.mrf.mxu2  ;;  %v1170_v56 = vpop.f32.mrf.mxu3 }
 0x90a   : > { %v1158_v57 = vadd.f32 1e-06, %v1157_v55  ;;  %v1171_v58 = vadd.f32 1e-06, %v1170_v56 }
 0x90c   : > { %4109 = vrcp.f32 %v1158_v57 }
 0x90d   : > { %4111 = vrcp.f32 %v1171_v58 }
 0x911   : > { %v1159_v60 = vpop.f32.mrf.mxu2  ;;  %v1172_v61 = vpop.f32.mrf.mxu3 }
 0x912   : > { %v4110_v62 = vpop.eup %4109 }
 0x913   : > { %v4112_v0 = vpop.eup %4111  ;;  %v4744_v1 = vmul.f32 %v4110_v62, %v1137_v59 }
 0x914   : > { %v4746_v2 = vmul.f32 %v4112_v0, %v1138_v63 }
 0x915   : > { %v1178_v3 = vpack.c.bf16 %v4744_v1, %v4744_v1 }
 0x916   : > { %v1179_v4 = vpack.c.bf16 %v4746_v2, %v4746_v2 }
 0x917   : > { %1188 = vmatmul.bf16.vlgmr.msra.gmra.mxu0 %v1178_v3  ;;  %1213 = vmatpush.bf16.xpose.msrb.mxu2 %v1178_v3  ;;  %v1304_v6 = vsel %vm658_vm1, %v1178_v3, 0 }
 0x918   : > { %1201 = vmatmul.bf16.vlgmr.msra.gmra.mxu1 %v1179_v4  ;;  %1226 = vmatpush.bf16.xpose.msrb.mxu3 %v1179_v4  ;;  %v1307_v31 = vsel %vm658_vm1, %v1179_v4, 0 }
 0x919   : > { %1345 = vmatpush.bf16.xpose.msra.mxu0 %v4556_v10  ;;  %1358 = vmatpush.bf16.xpose.msra.mxu1 %v4580_v35 }
 0x91e   : > { %1214 = vmatmul.bf16.vlgmr.msrb.gmra.mxu2 %v1178_v3 }
 0x91f   : > { %1246 = vmatpush.bf16.msra.mxu2 %v1237_v5  ;;  %1227 = vmatmul.bf16.vlgmr.msrb.gmra.mxu3 %v1179_v4 }
 0x921   : > { %1346 = vmatpush.bf16.xpose.msra.mxu0 %v4560_v16  ;;  %1359 = vmatpush.bf16.xpose.msra.mxu1 %v4588_v41 }
 0x923   : > { %1316 = vmatpush.bf16.msrb.mxu2 %v1304_v6 }
 0x929   : > { %1347 = vmatpush.bf16.xpose.msra.mxu0 %v4562_v18  ;;  %1360 = vmatpush.bf16.xpose.msra.mxu1 %v4593_v45 }
 0x931   : > { %1348 = vmatpush.bf16.xpose.msra.mxu0 %v4571_v23  ;;  %1361 = vmatpush.bf16.xpose.msra.mxu1 %v4600_v48 }
 0x994   : > { %v1189_v7 = vpop.f32.mrf.mxu0 }
 0x995   : > { %v1202_v8 = vpop.f32.mrf.mxu1 }
 0x996   : > { %v1203_v22 = vadd.f32 %v1202_v8, %v1189_v7 }
 0x998   : > { %v1233_v25 = vmul.f32 %v1203_v22, %v4723_v43 }
 0x99c   : > { %v1191_v9 = vpop.f32.mrf.mxu0 }
 0x99d   : > { %v1204_v11 = vpop.f32.mrf.mxu1 }
 0x9a1   : > { %v1215_v12 = vpop.f32.mrf.mxu2 }
 0x9a2   : > { %v1228_v13 = vpop.f32.mrf.mxu3 }
 0x9a3   : > { %v1229_v14 = vadd.f32 %v1228_v13, %v1215_v12 }
 0x9a5   : > { %v1232_v15 = vpack.c.bf16 %v1229_v14, %v1229_v14 }
 0x9a7   : > { %3954 = vmatmul.msk.bf16.vlgmr.msra.gmra.mxu2 %vm654_vm2, %v1232_v15 }
 0x9a9   : > { %v1217_v17 = vpop.f32.mrf.mxu2 }
 0x9aa   : > { %v1230_v19 = vpop.f32.mrf.mxu3 }
 0xa2a   : > { %v1248_v20 = vpop.f32.mrf.mxu2 }
 0xa2b   : > { %v1249_v21 = vadd.f32 1e-06, %v1248_v20 }
 0xa2d   : > { %4113 = vrcp.f32 %v1249_v21 }
 0xa32   : > { %v1250_v26 = vpop.f32.mrf.mxu2 }
 0xa33   : > { %v4114_v27 = vpop.eup %4113 }
 0xa34   : > { %v4764_v28 = vmul.f32 %v4114_v27, %v1233_v25 }
 0xa36   : > { %v1254_v29 = vpack.c.bf16 %v4764_v28, %v4764_v28 }
 0xa38   : > { %3956 = vmatmul.msk.bf16.vlgmr.msrb.gmra.mxu0 %vm476_vm0, %v1254_v29  ;;  %3957 = vmatmul.msk.bf16.vlgmr.msrb.gmra.mxu1 %vm476_vm0, %v1254_v29  ;;  %v1256_v30 = vsel %vm476_vm0, %v1254_v29, 0  ;;  %v1398_v56 = vsel %vm658_vm1, %v1254_v29, 0 }
 0xa39   : > { %1436 = vmatpush.bf16.msrb.mxu0 %v4556_v10  ;;  %1449 = vmatpush.bf16.msrb.mxu1 %v4580_v35 }
 0xa3a   : > { %1265 = vmatpush.bf16.xpose.msra.mxu3 %v1256_v30 }
 0xa3d   : > { %1437 = vmatpush.bf16.msrb.mxu0 %v4560_v16  ;;  %1450 = vmatpush.bf16.msrb.mxu1 %v4588_v41 }
 0xa41   : > { %3955 = vmatmul.msk.bf16.vlgmr.msra.gmra.mxu3 %vm476_vm0, %v1254_v29  ;;  %1438 = vmatpush.bf16.msrb.mxu0 %v4562_v18 }
 0xa42   : > { %1329 = vmatpush.bf16.msrb.mxu3 %v1307_v31  ;;  %1451 = vmatpush.bf16.msrb.mxu1 %v4593_v45 }
 0xa45   : > { %1439 = vmatpush.bf16.msrb.mxu0 %v4571_v23 }
 0xa46   : > { %1452 = vmatpush.bf16.msrb.mxu1 %v4600_v48 }
 0xab5   : > { %v1280_v32 = vpop.f32.mrf.mxu0  ;;  %v1293_v33 = vpop.f32.mrf.mxu1 }
 0xab6   : > { %v1298_v47 = vmul.f32 %v1280_v32, %v4744_v1  ;;  %v1299_v51 = vmul.f32 %v1293_v33, %v4746_v2 }
 0xabd   : > { %v1282_v34 = vpop.f32.mrf.mxu0  ;;  %v1295_v36 = vpop.f32.mrf.mxu1 }
 0xac4   : > { %v1267_v37 = vpop.f32.mrf.mxu3 }
 0xac5   : > { %v1297_v38 = vpack.c.bf16 %v1267_v37, %v1267_v37 }
 0xac7   : > { %3958 = vmatmul.msk.bf16.vlgmr.msrb.gmra.mxu2 %vm654_vm2, %v1297_v38  ;;  %3959 = vmatmul.msk.bf16.vlgmr.msrb.gmra.mxu3 %vm654_vm2, %v1297_v38 }
 0xacc   : > { %v1269_v39 = vpop.f32.mrf.mxu3 }
 0xb4a   : > { %v1318_v40 = vpop.f32.mrf.mxu2  ;;  %v1331_v42 = vpop.f32.mrf.mxu3 }
 0xb4b   : > { %v1319_v43 = vadd.f32 1e-06, %v1318_v40  ;;  %v1332_v44 = vadd.f32 1e-06, %v1331_v42 }
 0xb4d   : > { %4115 = vrcp.f32 %v1319_v43 }
 0xb4e   : > { %4117 = vrcp.f32 %v1332_v44 }
 0xb52   : > { %v1320_v46 = vpop.f32.mrf.mxu2  ;;  %v1333_v49 = vpop.f32.mrf.mxu3 }
 0xb53   : > { %v4116_v50 = vpop.eup %4115 }
 0xb54   : > { %v4118_v52 = vpop.eup %4117  ;;  %v4785_v53 = vmul.f32 %v4116_v50, %v1298_v47 }
 0xb55   : > { %v4787_v54 = vmul.f32 %v4118_v52, %v1299_v51 }
 0xb56   : > { %v1339_v24 = vpack.c.bf16 %v4785_v53, %v4785_v53 }
 0xb57   : > { %v1340_v55 = vpack.c.bf16 %v4787_v54, %v4787_v54 }
 0xb58   : > { %1349 = vmatmul.bf16.vlgmr.msra.gmra.mxu0 %v1339_v24  ;;  %1374 = vmatpush.bf16.xpose.msra.mxu2 %v1339_v24  ;;  %v1465_v57 = vsel %vm658_vm1, %v1339_v24, 0 }
 0xb59   : > { %1362 = vmatmul.bf16.vlgmr.msra.gmra.mxu1 %v1340_v55  ;;  %1387 = vmatpush.bf16.xpose.msra.mxu3 %v1340_v55  ;;  %v1468_v13 = vsel %vm658_vm1, %v1340_v55, 0 }
 0xb5a   : > { %1506 = vmatpush.bf16.xpose.msra.mxu0 %v4556_v10  ;;  %1519 = vmatpush.bf16.xpose.msra.mxu1 %v4580_v35 }
 0xb5f   : > { %1375 = vmatmul.bf16.vlgmr.msra.gmra.mxu2 %v1339_v24 }
 0xb60   : > { %1407 = vmatpush.bf16.msrb.mxu2 %v1398_v56  ;;  %1388 = vmatmul.bf16.vlgmr.msra.gmra.mxu3 %v1340_v55 }
 0xb62   : > { %1507 = vmatpush.bf16.xpose.msra.mxu0 %v4560_v16  ;;  %1520 = vmatpush.bf16.xpose.msra.mxu1 %v4588_v41 }
 0xb64   : > { %1477 = vmatpush.bf16.msra.mxu2 %v1465_v57 }
 0xb6a   : > { %1508 = vmatpush.bf16.xpose.msra.mxu0 %v4562_v18  ;;  %1521 = vmatpush.bf16.xpose.msra.mxu1 %v4593_v45 }
 0xb72   : > { %1509 = vmatpush.bf16.xpose.msra.mxu0 %v4571_v23  ;;  %1522 = vmatpush.bf16.xpose.msra.mxu1 %v4600_v48 }
 0xbd5   : > { %v1350_v58 = vpop.f32.mrf.mxu0 }
 0xbd6   : > { %v1363_v59 = vpop.f32.mrf.mxu1 }
 0xbd7   : > { %v1364_v60 = vadd.f32 %v1363_v59, %v1350_v58 }
 0xbd9   : > { %v1394_v7 = vmul.f32 %v1364_v60, %v4764_v28 }
 0xbdd   : > { %v1352_v61 = vpop.f32.mrf.mxu0 }
 0xbde   : > { %v1365_v62 = vpop.f32.mrf.mxu1 }
 0xbe2   : > { %v1376_v63 = vpop.f32.mrf.mxu2 }
 0xbe3   : > { %v1389_v0 = vpop.f32.mrf.mxu3 }
 0xbe4   : > { %v1390_v1 = vadd.f32 %v1389_v0, %v1376_v63 }
 0xbe6   : > { %v1393_v2 = vpack.c.bf16 %v1390_v1, %v1390_v1 }
 0xbe8   : > { %3960 = vmatmul.msk.bf16.vlgmr.msrb.gmra.mxu2 %vm654_vm2, %v1393_v2 }
 0xbea   : > { %v1378_v3 = vpop.f32.mrf.mxu2 }
 0xbeb   : > { %v1391_v4 = vpop.f32.mrf.mxu3 }
 0xc6b   : > { %v1409_v5 = vpop.f32.mrf.mxu2 }
 0xc6c   : > { %v1410_v6 = vadd.f32 1e-06, %v1409_v5 }
 0xc6e   : > { %4119 = vrcp.f32 %v1410_v6 }
 0xc73   : > { %v1411_v8 = vpop.f32.mrf.mxu2 }
 0xc74   : > { %v4120_v22 = vpop.eup %4119 }
 0xc75   : > { %v4805_v9 = vmul.f32 %v4120_v22, %v1394_v7 }
 0xc77   : > { %v1415_v11 = vpack.c.bf16 %v4805_v9, %v4805_v9 }
 0xc79   : > { %3962 = vmatmul.msk.bf16.vlgmr.msrb.gmra.mxu0 %vm476_vm0, %v1415_v11  ;;  %3963 = vmatmul.msk.bf16.vlgmr.msrb.gmra.mxu1 %vm476_vm0, %v1415_v11  ;;  %v1417_v12 = vsel %vm476_vm0, %v1415_v11, 0  ;;  %v1559_v42 = vsel %vm658_vm1, %v1415_v11, 0 }
 0xc7a   : > { %1597 = vmatpush.bf16.msrb.mxu0 %v4556_v10  ;;  %1610 = vmatpush.bf16.msrb.mxu1 %v4580_v35 }
 0xc7b   : > { %1426 = vmatpush.bf16.xpose.msrb.mxu3 %v1417_v12 }
 0xc7e   : > { %1598 = vmatpush.bf16.msrb.mxu0 %v4560_v16  ;;  %1611 = vmatpush.bf16.msrb.mxu1 %v4588_v41 }
 0xc82   : > { %3961 = vmatmul.msk.bf16.vlgmr.msrb.gmra.mxu3 %vm476_vm0, %v1415_v11  ;;  %1599 = vmatpush.bf16.msrb.mxu0 %v4562_v18 }
 0xc83   : > { %1490 = vmatpush.bf16.msra.mxu3 %v1468_v13  ;;  %1612 = vmatpush.bf16.msrb.mxu1 %v4593_v45 }
 0xc86   : > { %1600 = vmatpush.bf16.msrb.mxu0 %v4571_v23 }
 0xc87   : > { %1613 = vmatpush.bf16.msrb.mxu1 %v4600_v48 }
 0xcf6   : > { %v1441_v14 = vpop.f32.mrf.mxu0  ;;  %v1454_v15 = vpop.f32.mrf.mxu1 }
 0xcf7   : > { %v1459_v30 = vmul.f32 %v1441_v14, %v4785_v53  ;;  %v1460_v34 = vmul.f32 %v1454_v15, %v4787_v54 }
 0xcfe   : > { %v1443_v17 = vpop.f32.mrf.mxu0  ;;  %v1456_v19 = vpop.f32.mrf.mxu1 }
 0xd05   : > { %v1428_v20 = vpop.f32.mrf.mxu3 }
 0xd06   : > { %v1458_v21 = vpack.c.bf16 %v1428_v20, %v1428_v20 }
 0xd08   : > { %3964 = vmatmul.msk.bf16.vlgmr.msra.gmra.mxu2 %vm654_vm2, %v1458_v21  ;;  %3965 = vmatmul.msk.bf16.vlgmr.msra.gmra.mxu3 %vm654_vm2, %v1458_v21 }
 0xd0d   : > { %v1430_v25 = vpop.f32.mrf.mxu3 }
 0xd8b   : > { %v1479_v26 = vpop.f32.mrf.mxu2  ;;  %v1492_v27 = vpop.f32.mrf.mxu3 }
 0xd8c   : > { %v1480_v28 = vadd.f32 1e-06, %v1479_v26  ;;  %v1493_v29 = vadd.f32 1e-06, %v1492_v27 }
 0xd8e   : > { %4121 = vrcp.f32 %v1480_v28 }
 0xd8f   : > { %4123 = vrcp.f32 %v1493_v29 }
 0xd93   : > { %v1481_v31 = vpop.f32.mrf.mxu2  ;;  %v1494_v32 = vpop.f32.mrf.mxu3 }
 0xd94   : > { %v4122_v33 = vpop.eup %4121 }
 0xd95   : > { %v4124_v36 = vpop.eup %4123  ;;  %v4826_v37 = vmul.f32 %v4122_v33, %v1459_v30 }
 0xd96   : > { %v4828_v38 = vmul.f32 %v4124_v36, %v1460_v34 }
 0xd97   : > { %v1500_v39 = vpack.c.bf16 %v4826_v37, %v4826_v37 }
 0xd98   : > { %v1501_v40 = vpack.c.bf16 %v4828_v38, %v4828_v38 }
 0xd99   : > { %1510 = vmatmul.bf16.vlgmr.msra.gmra.mxu0 %v1500_v39  ;;  %1535 = vmatpush.bf16.xpose.msrb.mxu2 %v1500_v39  ;;  %v1626_v43 = vsel %vm658_vm1, %v1500_v39, 0 }
 0xd9a   : > { %1523 = vmatmul.bf16.vlgmr.msra.gmra.mxu1 %v1501_v40  ;;  %1548 = vmatpush.bf16.xpose.msrb.mxu3 %v1501_v40  ;;  %v1629_v0 = vsel %vm658_vm1, %v1501_v40, 0 }
 0xd9b   : > { %1667 = vmatpush.bf16.xpose.msra.mxu0 %v4556_v10  ;;  %1680 = vmatpush.bf16.xpose.msra.mxu1 %v4580_v35 }
 0xda0   : > { %1536 = vmatmul.bf16.vlgmr.msrb.gmra.mxu2 %v1500_v39 }
 0xda1   : > { %1568 = vmatpush.bf16.msra.mxu2 %v1559_v42  ;;  %1549 = vmatmul.bf16.vlgmr.msrb.gmra.mxu3 %v1501_v40 }
 0xda3   : > { %1668 = vmatpush.bf16.xpose.msra.mxu0 %v4560_v16  ;;  %1681 = vmatpush.bf16.xpose.msra.mxu1 %v4588_v41 }
 0xda5   : > { %1638 = vmatpush.bf16.msrb.mxu2 %v1626_v43  ;;  %v4016_v43 = vld [vmem:[%s5814_s4] sm:$0xff] }
 0xdab   : > { %1669 = vmatpush.bf16.xpose.msra.mxu0 %v4562_v18  ;;  %1682 = vmatpush.bf16.xpose.msra.mxu1 %v4593_v45 }
 0xdb3   : > { %1670 = vmatpush.bf16.xpose.msra.mxu0 %v4571_v23  ;;  %1683 = vmatpush.bf16.xpose.msra.mxu1 %v4600_v48 }
 0xe16   : > { %v1511_v44 = vpop.f32.mrf.mxu0 }
 0xe17   : > { %v1524_v47 = vpop.f32.mrf.mxu1 }
 0xe18   : > { %v1525_v46 = vadd.f32 %v1524_v47, %v1511_v44 }
 0xe1a   : > { %v1555_v58 = vmul.f32 %v1525_v46, %v4805_v9  ;;  %v4017_v46 = vld [vmem:[%s5814_s4 + $0x8] sm:$0xff] }
 0xe1e   : > { %v1513_v49 = vpop.f32.mrf.mxu0 }
 0xe1f   : > { %v1526_v50 = vpop.f32.mrf.mxu1 }
 0xe23   : > { %v1537_v51 = vpop.f32.mrf.mxu2 }
 0xe24   : > { %v1550_v52 = vpop.f32.mrf.mxu3 }
 0xe25   : > { %v1551_v53 = vadd.f32 %v1550_v52, %v1537_v51 }
 0xe27   : > { %v1554_v54 = vpack.c.bf16 %v1551_v53, %v1551_v53  ;;  %v4018_v53 = vld [vmem:[%s5814_s4 + $0x10] sm:$0xff] }
 0xe29   : > { %3966 = vmatmul.msk.bf16.vlgmr.msra.gmra.mxu2 %vm654_vm2, %v1554_v54 }
 0xe2b   : > { %v1539_v24 = vpop.f32.mrf.mxu2 }
 0xe2c   : > { %v1552_v55 = vpop.f32.mrf.mxu3  ;;  %v4019_v24 = vld [vmem:[%s5814_s4 + $0x18] sm:$0xff] }
 0xeac   : > { %v1570_v56 = vpop.f32.mrf.mxu2 }
 0xead   : > { %v1571_v57 = vadd.f32 1e-06, %v1570_v56 }
 0xeaf   : > { %4125 = vrcp.f32 %v1571_v57 }
 0xeb4   : > { %v1572_v59 = vpop.f32.mrf.mxu2 }
 0xeb5   : > { %v4126_v60 = vpop.eup %4125 }
 0xeb6   : > { %v4846_v61 = vmul.f32 %v4126_v60, %v1555_v58 }
 0xeb8   : > { %v1576_v62 = vpack.c.bf16 %v4846_v61, %v4846_v61 }
 0xeba   : > { %3968 = vmatmul.msk.bf16.vlgmr.msrb.gmra.mxu0 %vm476_vm0, %v1576_v62  ;;  %3969 = vmatmul.msk.bf16.vlgmr.msrb.gmra.mxu1 %vm476_vm0, %v1576_v62  ;;  %v1578_v63 = vsel %vm476_vm0, %v1576_v62, 0  ;;  %v1720_v14 = vsel %vm658_vm1, %v1576_v62, 0 }
 0xebb   : > { %1758 = vmatpush.bf16.msrb.mxu0 %v4556_v10  ;;  %1771 = vmatpush.bf16.msrb.mxu1 %v4580_v35 }
 0xebc   : > { %1587 = vmatpush.bf16.xpose.msra.mxu3 %v1578_v63 }
 0xebf   : > { %1759 = vmatpush.bf16.msrb.mxu0 %v4560_v16  ;;  %1772 = vmatpush.bf16.msrb.mxu1 %v4588_v41 }
 0xec3   : > { %3967 = vmatmul.msk.bf16.vlgmr.msra.gmra.mxu3 %vm476_vm0, %v1576_v62  ;;  %1760 = vmatpush.bf16.msrb.mxu0 %v4562_v18 }
 0xec4   : > { %1651 = vmatpush.bf16.msrb.mxu3 %v1629_v0  ;;  %1773 = vmatpush.bf16.msrb.mxu1 %v4593_v45 }
 0xec7   : > { %1761 = vmatpush.bf16.msrb.mxu0 %v4571_v23 }
 0xec8   : > { %1774 = vmatpush.bf16.msrb.mxu1 %v4600_v48 }
 0xf37   : > { %v1602_v10 = vpop.f32.mrf.mxu0  ;;  %v1615_v35 = vpop.f32.mrf.mxu1 }
 0xf38   : > { %v1620_v23 = vmul.f32 %v1602_v10, %v4826_v37  ;;  %v1621_v8 = vmul.f32 %v1615_v35, %v4828_v38 }
 0xf3f   : > { %v1604_v1 = vpop.f32.mrf.mxu0  ;;  %v1617_v2 = vpop.f32.mrf.mxu1 }
 0xf46   : > { %v1589_v3 = vpop.f32.mrf.mxu3 }
 0xf47   : > { %v1619_v4 = vpack.c.bf16 %v1589_v3, %v1589_v3 }
 0xf49   : > { %3970 = vmatmul.msk.bf16.vlgmr.msrb.gmra.mxu2 %vm654_vm2, %v1619_v4  ;;  %3971 = vmatmul.msk.bf16.vlgmr.msrb.gmra.mxu3 %vm654_vm2, %v1619_v4 }
 0xf4e   : > { %v1591_v16 = vpop.f32.mrf.mxu3 }
 0xfcc   : > { %v1640_v41 = vpop.f32.mrf.mxu2  ;;  %v1653_v5 = vpop.f32.mrf.mxu3 }
 0xfcd   : > { %v1641_v18 = vadd.f32 1e-06, %v1640_v41  ;;  %v1654_v6 = vadd.f32 1e-06, %v1653_v5 }
 0xfcf   : > { %4127 = vrcp.f32 %v1641_v18 }
 0xfd0   : > { %4129 = vrcp.f32 %v1654_v6 }
 0xfd4   : > { %v1642_v45 = vpop.f32.mrf.mxu2  ;;  %v1655_v48 = vpop.f32.mrf.mxu3 }
 0xfd5   : > { %v4128_v7 = vpop.eup %4127 }
 0xfd6   : > { %v4130_v22 = vpop.eup %4129  ;;  %v4867_v9 = vmul.f32 %v4128_v7, %v1620_v23 }
 0xfd7   : > { %v4869_v11 = vmul.f32 %v4130_v22, %v1621_v8 }
 0xfd8   : > { %v1661_v12 = vpack.c.bf16 %v4867_v9, %v4867_v9 }
 0xfd9   : > { %v1662_v13 = vpack.c.bf16 %v4869_v11, %v4869_v11 }
 0xfda   : > { %1671 = vmatmul.bf16.vlgmr.msra.gmra.mxu0 %v1661_v12  ;;  %1696 = vmatpush.bf16.xpose.msra.mxu2 %v1661_v12  ;;  %v1787_v15 = vsel %vm658_vm1, %v1661_v12, 0 }
 0xfdb   : > { %1684 = vmatmul.bf16.vlgmr.msra.gmra.mxu1 %v1662_v13  ;;  %1709 = vmatpush.bf16.xpose.msra.mxu3 %v1662_v13  ;;  %v1790_v42 = vsel %vm658_vm1, %v1662_v13, 0 }
 0xfe1   : > { %1697 = vmatmul.bf16.vlgmr.msra.gmra.mxu2 %v1661_v12  ;;  %v1892_v12 = vpop.permute.xlu2 %1891 }
 0xfe2   : > { %1729 = vmatpush.bf16.msrb.mxu2 %v1720_v14  ;;  %1710 = vmatmul.bf16.vlgmr.msra.gmra.mxu3 %v1662_v13 }
 0xfe6   : > { %1799 = vmatpush.bf16.msra.mxu2 %v1787_v15 }
0x1057   : > { %v1672_v17 = vpop.f32.mrf.mxu0 }
0x1058   : > { %v1685_v19 = vpop.f32.mrf.mxu1 }
0x1059   : > { %v1686_v20 = vadd.f32 %v1685_v19, %v1672_v17 }
0x105b   : > { %v1716_v34 = vmul.f32 %v1686_v20, %v4846_v61 }
0x105f   : > { %v1674_v21 = vpop.f32.mrf.mxu0 }
0x1060   : > { %v1687_v25 = vpop.f32.mrf.mxu1 }
0x1064   : > { %v1698_v26 = vpop.f32.mrf.mxu2 }
0x1065   : > { %v1711_v27 = vpop.f32.mrf.mxu3 }
0x1066   : > { %v1712_v28 = vadd.f32 %v1711_v27, %v1698_v26  ;;  %v1897_v26 = vpop.permute.xlu0 %1896 }
0x1068   : > { %v1715_v29 = vpack.c.bf16 %v1712_v28, %v1712_v28 }
0x106a   : > { %3972 = vmatmul.msk.bf16.vlgmr.msrb.gmra.mxu2 %vm654_vm2, %v1715_v29 }
0x106c   : > { %v1700_v30 = vpop.f32.mrf.mxu2 }
0x106d   : > { %v1713_v31 = vpop.f32.mrf.mxu3 }
0x10ed   : > { %v1731_v32 = vpop.f32.mrf.mxu2 }
0x10ee   : > { %v1732_v33 = vadd.f32 1e-06, %v1731_v32  ;;  %v1902_v32 = vpop.permute.xlu1 %1901 }
0x10f0   : > { %4131 = vrcp.f32 %v1732_v33 }
0x10f5   : > { %v1733_v36 = vpop.f32.mrf.mxu2 }
0x10f6   : > { %v4132_v37 = vpop.eup %4131 }
0x10f7   : > { %v1736_v38 = vmul.f32 %v4132_v37, %v1716_v34 }
0x10f9   : > { %v1737_v39 = vpack.c.bf16 %v1736_v38, %v1736_v38 }
0x10fb   : > { %3974 = vmatmul.msk.bf16.vlgmr.msrb.gmra.mxu0 %vm476_vm0, %v1737_v39  ;;  %3975 = vmatmul.msk.bf16.vlgmr.msrb.gmra.mxu1 %vm476_vm0, %v1737_v39  ;;  %v1739_v40 = vsel %vm476_vm0, %v1737_v39, 0 }
0x10fc   : > { %1748 = vmatpush.bf16.xpose.msrb.mxu3 %v1739_v40  ;;  %1863 = vmatpush.bf16.xpose.msra.mxu0 %v1739_v40 }
0x1103   : > { %3973 = vmatmul.msk.bf16.vlgmr.msrb.gmra.mxu3 %vm476_vm0, %v1737_v39 }
0x1104   : > { %1812 = vmatpush.bf16.msra.mxu3 %v1790_v42 }
0x110b   : > { %3994 = vmatmul.msk.bf16.vlgmr.msra.gmra.mxu0 %vm476_vm0, %v4016_v43 }
0x111b   : > { %3995 = vmatmul.msk.bf16.gmra.mxu0 %vm476_vm0, %v4017_v46  ;;  %v1907_v46 = vpop.permute.xlu2 %1906 }
0x112b   : > { %3996 = vmatmul.msk.bf16.gmra.mxu0 %vm476_vm0, %v4018_v53 }
0x113b   : > { %3997 = vmatmul.msk.bf16.gmra.mxu0 %vm476_vm0, %v4019_v24 }
0x1178   : > { %v1763_v44 = vpop.f32.mrf.mxu0  ;;  %v1776_v47 = vpop.f32.mrf.mxu1 }
0x1179   : > { %v1781_v61 = vmul.f32 %v1763_v44, %v4867_v9  ;;  %v1782_v10 = vmul.f32 %v1776_v47, %v4869_v11 }
0x1180   : > { %v1765_v49 = vpop.f32.mrf.mxu0  ;;  %v1778_v50 = vpop.f32.mrf.mxu1 }
0x1186   : > { %v1750_v51 = vpop.f32.mrf.mxu3 }
0x1187   : > { %v1780_v52 = vpack.c.bf16 %v1750_v51, %v1750_v51 }
0x1188   : > { %v1865_v55 = vpop.f32.mrf.mxu0 }
0x1189   : > { %3976 = vmatmul.msk.bf16.vlgmr.msra.gmra.mxu2 %vm654_vm2, %v1780_v52  ;;  %3977 = vmatmul.msk.bf16.vlgmr.msra.gmra.mxu3 %vm654_vm2, %v1780_v52 }
0x118e   : > { %v1752_v54 = vpop.f32.mrf.mxu3 }
0x1190   : > { %v1867_v60 = vpop.f32.mrf.mxu0 }
0x1191   : > { %v1885_v18 = vpack.c.bf16 %v1867_v60, %v1865_v55 }
0x1198   : > { %v1870_v3 = vpop.f32.mrf.mxu0 }
0x11a0   : > { %v1872_v6 = vpop.f32.mrf.mxu0 }
0x11a1   : > { %v1886_v45 = vpack.c.bf16 %v1872_v6, %v1870_v3 }
0x11a8   : > { %v1875_v23 = vpop.f32.mrf.mxu0 }
0x11b0   : > { %v1877_v48 = vpop.f32.mrf.mxu0 }
0x11b1   : > { %v1887_v7 = vpack.c.bf16 %v1877_v48, %v1875_v23 }
0x11b8   : > { %v1880_v8 = vpop.f32.mrf.mxu0 }
0x11c0   : > { %v1882_v22 = vpop.f32.mrf.mxu0 }
0x11c1   : > { %v1888_v9 = vpack.c.bf16 %v1882_v22, %v1880_v8 }
0x120c   : > { %v1801_v56 = vpop.f32.mrf.mxu2  ;;  %v1814_v57 = vpop.f32.mrf.mxu3 }
0x120d   : > { %v1802_v58 = vadd.f32 1e-06, %v1801_v56  ;;  %v1815_v59 = vadd.f32 1e-06, %v1814_v57  ;;  %v1912_v56 = vpop.permute.xlu0 %1911 }
0x120f   : > { %4133 = vrcp.f32 %v1802_v58 }
0x1210   : > { %4135 = vrcp.f32 %v1815_v59 }
0x1214   : > { %v1803_v62 = vpop.f32.mrf.mxu2  ;;  %v1816_v63 = vpop.f32.mrf.mxu3 }
0x1215   : > { %v4134_v0 = vpop.eup %4133 }
0x1216   : > { %v4136_v35 = vpop.eup %4135  ;;  %v1820_v1 = vmul.f32 %v4134_v0, %v1781_v61 }
0x1217   : > { %v1821_v2 = vmul.f32 %v4136_v35, %v1782_v10  ;;  %v1917_v10 = vpop.permute.xlu1 %1916 }
0x1218   : > { %v1822_v4 = vpack.c.bf16 %v1820_v1, %v1820_v1 }
0x1219   : > { %v1823_v16 = vpack.c.bf16 %v1821_v2, %v1821_v2 }
0x121a   : > { %v1942_v41 = vsel %vm658_vm1, %v1822_v4, 0 }
0x121b   : > { %1954 = vmatpush.bf16.msra.mxu1 %v1942_v41  ;;  %v1945_v5 = vsel %vm658_vm1, %v1823_v16, 0 }
0x121c   : > { %1983 = vmatpush.bf16.msrb.mxu2 %v1945_v5 }
0x121e   : > { %3998 = vmatmul.msk.bf16.vlgmr.msra.gmra.mxu1 %vm654_vm2, %v1885_v18 }
0x121f   : > { %4002 = vmatmul.msk.bf16.vlgmr.msrb.gmra.mxu2 %vm654_vm2, %v1885_v18  ;;  %v1922_v18 = vpop.permute.xlu2 %1921 }
0x122e   : > { %3999 = vmatmul.msk.bf16.gmra.mxu1 %vm654_vm2, %v1886_v45 }
0x122f   : > { %4003 = vmatmul.msk.bf16.gmra.mxu2 %vm654_vm2, %v1886_v45 }
0x123e   : > { %4000 = vmatmul.msk.bf16.gmra.mxu1 %vm654_vm2, %v1887_v7 }
0x123f   : > { %4004 = vmatmul.msk.bf16.gmra.mxu2 %vm654_vm2, %v1887_v7 }
0x124e   : > { %4001 = vmatmul.msk.bf16.gmra.mxu1 %vm654_vm2, %v1888_v9 }
0x124f   : > { %4005 = vmatmul.msk.bf16.gmra.mxu2 %vm654_vm2, %v1888_v9 }
0x129b   : > { %v1956_v11 = vpop.f32.mrf.mxu1 }
0x129c   : > { %v4914_v13 = vadd.f32 %v1956_v11, %v1892_v12  ;;  %v1927_v11 = vpop.permute.xlu0 %1926 }
0x129e   : > { %5848 = vst [vmem:[#allocation10_spill] sm:$0xff] %v4914_v13  ;;  %v2029_v20 = vmul.f32 %v4914_v13, %v4914_v13 }
0x12a2   : > { %v1985_v14 = vpop.f32.mrf.mxu2 }
0x12a3   : > { %v4916_v15 = vadd.f32 %v1985_v14, %v1892_v12  ;;  %v1958_v17 = vpop.f32.mrf.mxu1 }
0x12a4   : > { %v4924_v28 = vadd.f32 %v1958_v17, %v1897_v26 }
0x12a5   : > { %5849 = vst [vmem:[#allocation11_spill] sm:$0xff] %v4916_v15  ;;  %v2005_v19 = vadd.f32 %v4916_v15, %v4914_v13  ;;  %v2030_v21 = vmul.f32 %v4916_v15, %v4916_v15 }
0x12a6   : > { %5850 = vst [vmem:[#allocation12_spill] sm:$0xff] %v4924_v28  ;;  %v2031_v39 = vmul.f32 %v4924_v28, %v4924_v28 }
0x12a7   : > { %2006 = vadd.xlane.f32.xlu1 %v2005_v19  ;;  %v2045_v25 = vadd.f32 %v2030_v21, %v2029_v20 }
0x12a9   : > { %2046 = vadd.xlane.f32.xlu0 %v2045_v25 }
0x12aa   : > { %v1987_v27 = vpop.f32.mrf.mxu2 }
0x12ab   : > { %v4926_v29 = vadd.f32 %v1987_v27, %v1897_v26  ;;  %v1961_v30 = vpop.f32.mrf.mxu1  ;;  %v4318_v26 = vmov 269488144  }
0x12ac   : > { %v4930_v33 = vadd.f32 %v1961_v30, %v1902_v32  ;;  %v2078_v27 = vunpack.c.l.s4 %v4318_v26  ;;  %v4319_v30 = vmov 842150450  }
0x12ad   : > { %5851 = vst [vmem:[#allocation13_spill] sm:$0xff] %v4926_v29  ;;  %v2008_v31 = vadd.f32 %v4926_v29, %v4924_v28  ;;  %v2032_v34 = vmul.f32 %v4926_v29, %v4926_v29 }
0x12ae   : > { %5852 = vst [vmem:[#allocation14_spill] sm:$0xff] %v4930_v33  ;;  %v2033_v43 = vmul.f32 %v4930_v33, %v4930_v33 }
0x12af   : > { %2009 = vadd.xlane.f32.xlu2 %v2008_v31  ;;  %v2048_v40 = vadd.f32 %v2032_v34, %v2031_v39  ;;  %v2082_v31 = vunpack.c.l.s4 %v4319_v30  ;;  %v4994_v39 = vunpack.c.0.s8 %v2078_v27 }
0x12b2   : > { %v1990_v36 = vpop.f32.mrf.mxu2 }
0x12b3   : > { %v4934_v37 = vadd.f32 %v1990_v36, %v1902_v32  ;;  %v1963_v38 = vpop.f32.mrf.mxu1  ;;  %v4320_v32 = vmov 1414812756   ;;  %v4321_v36 = vmov 1987475062  }
0x12b4   : > { %v4944_v49 = vadd.f32 %v1963_v38, %v1907_v46  ;;  %v2086_v34 = vunpack.c.l.s4 %v4320_v32  ;;  %v2090_v38 = vunpack.c.l.s4 %v4321_v36 }
0x12b5   : > { %5853 = vst [vmem:[#allocation15_spill] sm:$0xff] %v4934_v37  ;;  %v2011_v42 = vadd.f32 %v4934_v37, %v4930_v33  ;;  %v2034_v44 = vmul.f32 %v4934_v37, %v4934_v37 }
0x12b6   : > { %5854 = vst [vmem:[#allocation16_spill] sm:$0xff] %v4944_v49  ;;  %v2035_v54 = vmul.f32 %v4944_v49, %v4944_v49 }
0x12b7   : > { %2049 = vadd.xlane.f32.xlu2 %v2048_v40  ;;  %2012 = vadd.xlane.f32.xlu1 %v2011_v42  ;;  %v2051_v47 = vadd.f32 %v2034_v44, %v2033_v43  ;;  %v4996_v40 = vunpack.c.0.s8 %v2082_v31  ;;  %v4998_v42 = vunpack.c.0.s8 %v2086_v34  ;;  %v5000_v43 = vunpack.c.0.s8 %v2090_v38 }
0x12b9   : > { %2052 = vadd.xlane.f32.xlu0 %v2051_v47 }
0x12ba   : > { %v1992_v50 = vpop.f32.mrf.mxu2 }
0x12bb   : > { %v4946_v51 = vadd.f32 %v1992_v50, %v1907_v46  ;;  %v1966_v52 = vpop.f32.mrf.mxu1 }
0x12bc   : > { %v4954_v57 = vadd.f32 %v1966_v52, %v1912_v56 }
0x12bd   : > { %5855 = vst [vmem:[#allocation17_spill] sm:$0xff] %v4946_v51  ;;  %v2014_v53 = vadd.f32 %v4946_v51, %v4944_v49  ;;  %v2036_v24 = vmul.f32 %v4946_v51, %v4946_v51 }
0x12be   : > { %5856 = vst [vmem:[#allocation18_spill] sm:$0xff] %v4954_v57  ;;  %v2037_v62 = vmul.f32 %v4954_v57, %v4954_v57 }
0x12bf   : > { %2015 = vadd.xlane.f32.xlu2 %v2014_v53  ;;  %v2054_v55 = vadd.f32 %v2036_v24, %v2035_v54 }
0x12c1   : > { %2055 = vadd.xlane.f32.xlu1 %v2054_v55 }
0x12c2   : > { %v1995_v58 = vpop.f32.mrf.mxu2 }
0x12c3   : > { %v4956_v59 = vadd.f32 %v1995_v58, %v1912_v56  ;;  %v1968_v60 = vpop.f32.mrf.mxu1 }
0x12c4   : > { %v4964_v35 = vadd.f32 %v1968_v60, %v1917_v10 }
0x12c5   : > { %5857 = vst [vmem:[#allocation19_spill] sm:$0xff] %v4956_v59  ;;  %v2017_v61 = vadd.f32 %v4956_v59, %v4954_v57  ;;  %v2038_v63 = vmul.f32 %v4956_v59, %v4956_v59 }
0x12c6   : > { %5858 = vst [vmem:[#allocation20_spill] sm:$0xff] %v4964_v35  ;;  %v2039_v16 = vmul.f32 %v4964_v35, %v4964_v35 }
0x12c7   : > { %2018 = vadd.xlane.f32.xlu2 %v2017_v61  ;;  %v2057_v0 = vadd.f32 %v2038_v63, %v2037_v62 }
0x12c9   : > { %2058 = vadd.xlane.f32.xlu1 %v2057_v0 }
0x12ca   : > { %v1997_v1 = vpop.f32.mrf.mxu2 }
0x12cb   : > { %v4966_v2 = vadd.f32 %v1997_v1, %v1917_v10  ;;  %v1971_v3 = vpop.f32.mrf.mxu1 }
0x12cc   : > { %v4974_v6 = vadd.f32 %v1971_v3, %v1922_v18 }
0x12cd   : > { %5859 = vst [vmem:[#allocation21_spill] sm:$0xff] %v4966_v2  ;;  %v2020_v4 = vadd.f32 %v4966_v2, %v4964_v35  ;;  %v2040_v41 = vmul.f32 %v4966_v2, %v4966_v2 }
0x12ce   : > { %5860 = vst [vmem:[#allocation22_spill] sm:$0xff] %v4974_v6  ;;  %v2041_v7 = vmul.f32 %v4974_v6, %v4974_v6 }
0x12cf   : > { %2021 = vadd.xlane.f32.xlu0 %v2020_v4  ;;  %v2060_v5 = vadd.f32 %v2040_v41, %v2039_v16 }
0x12d1   : > { %2061 = vadd.xlane.f32.xlu2 %v2060_v5 }
0x12d2   : > { %v2000_v23 = vpop.f32.mrf.mxu2 }
0x12d3   : > { %v4976_v45 = vadd.f32 %v2000_v23, %v1922_v18  ;;  %v1973_v22 = vpop.f32.mrf.mxu1 }
0x12d4   : > { %v4984_v12 = vadd.f32 %v1973_v22, %v1927_v11 }
0x12d5   : > { %5861 = vst [vmem:[#allocation23_spill] sm:$0xff] %v4976_v45  ;;  %v2023_v48 = vadd.f32 %v4976_v45, %v4974_v6  ;;  %v2042_v8 = vmul.f32 %v4976_v45, %v4976_v45 }
0x12d6   : > { %5862 = vst [vmem:[#allocation24_spill] sm:$0xff] %v4984_v12  ;;  %v2043_v20 = vmul.f32 %v4984_v12, %v4984_v12 }
0x12d7   : > { %2024 = vadd.xlane.f32.xlu0 %v2023_v48  ;;  %v2063_v9 = vadd.f32 %v2042_v8, %v2041_v7 }
0x12d9   : > { %2064 = vadd.xlane.f32.xlu2 %v2063_v9 }
0x12da   : > { %v2002_v14 = vpop.f32.mrf.mxu2 }
0x12db   : > { %v4986_v17 = vadd.f32 %v2002_v14, %v1927_v11 }
0x12dd   : > { %5863 = vst [vmem:[#allocation25_spill] sm:$0xff] %v4986_v17  ;;  %v2026_v19 = vadd.f32 %v4986_v17, %v4984_v12  ;;  %v2044_v21 = vmul.f32 %v4986_v17, %v4986_v17 }
0x12df   : > { %2027 = vadd.xlane.f32.xlu1 %v2026_v19  ;;  %v2066_v25 = vadd.f32 %v2044_v21, %v2043_v20 }
0x12e1   : > { %2067 = vadd.xlane.f32.xlu0 %v2066_v25 }
0x131a   : > { %v2007_v44 = vpop.xlane.xlu1 %2006 }
0x131b   : > { %v2080_v47 = vperm.slane %v2007_v44, %v4994_v39  ;;  %v2084_v46 = vperm.slane %v2007_v44, %v4996_v40  ;;  %v2088_v50 = vperm.slane %v2007_v44, %v4998_v42  ;;  %v2092_v52 = vperm.slane %v2007_v44, %v5000_v43 }
0x131c   : > { %v2047_v53 = vpop.xlane.xlu0 %2046 }
0x131d   : > { %v2238_v54 = vsel %vm2237_vm3, %v2080_v47, 0.0  ;;  %v2245_v24 = vsel %vm2237_vm3, %v2084_v46, 0.0  ;;  %v2252_v55 = vsel %vm2237_vm3, %v2088_v50, 0.0  ;;  %v2259_v56 = vsel %vm2237_vm3, %v2092_v52, 0.0 }
0x131e   : > { %v2239_v58 = vrot.slane %v2238_v54, 4  ;;  %v2246_v60 = vrot.slane %v2245_v24, 4  ;;  %v2253_v61 = vrot.slane %v2252_v55, 4  ;;  %v2260_v62 = vrot.slane %v2259_v56, 4 }
0x131f   : > { %v2505_v63 = vperm.slane %v2047_v53, %v4994_v39  ;;  %v2509_v0 = vperm.slane %v2047_v53, %v4996_v40  ;;  %v2513_v10 = vperm.slane %v2047_v53, %v4998_v42  ;;  %v2517_v1 = vperm.slane %v2047_v53, %v5000_v43 }
0x1320   : > { %v2240_v3 = vadd.f32 %v2239_v58, %v2238_v54  ;;  %v2247_v4 = vadd.f32 %v2246_v60, %v2245_v24  ;;  %v2254_v16 = vadd.f32 %v2253_v61, %v2252_v55  ;;  %v2261_v41 = vadd.f32 %v2260_v62, %v2259_v56 }
0x1321   : > { %v2662_v5 = vsel %vm2237_vm3, %v2505_v63, 0.0  ;;  %v2669_v18 = vsel %vm2237_vm3, %v2509_v0, 0.0  ;;  %v2676_v23 = vsel %vm2237_vm3, %v2513_v10, 0.0  ;;  %v2683_v48 = vsel %vm2237_vm3, %v2517_v1, 0.0 }
0x1322   : > { %v2241_v7 = vrot.slane %v2240_v3, 2  ;;  %v2248_v8 = vrot.slane %v2247_v4, 2  ;;  %v2255_v22 = vrot.slane %v2254_v16, 2  ;;  %v2262_v9 = vrot.slane %v2261_v41, 2 }
0x1323   : > { %v2663_v11 = vrot.slane %v2662_v5, 4  ;;  %v2670_v14 = vrot.slane %v2669_v18, 4  ;;  %v2677_v19 = vrot.slane %v2676_v23, 4  ;;  %v2684_v20 = vrot.slane %v2683_v48, 4 }
0x1324   : > { %v2242_v21 = vadd.f32 %v2241_v7, %v2240_v3  ;;  %v2249_v25 = vadd.f32 %v2248_v8, %v2247_v4  ;;  %v2256_v26 = vadd.f32 %v2255_v22, %v2254_v16  ;;  %v2263_v27 = vadd.f32 %v2262_v9, %v2261_v41  ;;  %v2010_v3 = vpop.xlane.xlu2 %2009 }
0x1325   : > { %v2664_v30 = vadd.f32 %v2663_v11, %v2662_v5  ;;  %v2671_v31 = vadd.f32 %v2670_v14, %v2669_v18  ;;  %v2678_v32 = vadd.f32 %v2677_v19, %v2676_v23  ;;  %v2685_v34 = vadd.f32 %v2684_v20, %v2683_v48 }
0x1326   : > { %v2243_v36 = vrot.slane %v2242_v21, 1  ;;  %v2250_v38 = vrot.slane %v2249_v25, 1  ;;  %v2257_v44 = vrot.slane %v2256_v26, 1  ;;  %v2264_v47 = vrot.slane %v2263_v27, 1 }
0x1327   : > { %v2665_v46 = vrot.slane %v2664_v30, 2  ;;  %v2672_v50 = vrot.slane %v2671_v31, 2  ;;  %v2679_v52 = vrot.slane %v2678_v32, 2  ;;  %v2686_v53 = vrot.slane %v2685_v34, 2 }
0x1328   : > { %v2244_v54 = vadd.f32 %v2243_v36, %v2242_v21  ;;  %v2251_v24 = vadd.f32 %v2250_v38, %v2249_v25  ;;  %v2258_v55 = vadd.f32 %v2257_v44, %v2256_v26  ;;  %v2265_v56 = vadd.f32 %v2264_v47, %v2263_v27 }
0x1329   : > { %v2666_v58 = vadd.f32 %v2665_v46, %v2664_v30  ;;  %v2673_v60 = vadd.f32 %v2672_v50, %v2671_v31  ;;  %v2680_v61 = vadd.f32 %v2679_v52, %v2678_v32  ;;  %v2687_v62 = vadd.f32 %v2686_v53, %v2685_v34 }
0x132a   : > { %v5018_v63 = vmul.f32 0.001953125, %v2244_v54  ;;  %v5020_v0 = vmul.f32 0.001953125, %v2251_v24  ;;  %v5022_v10 = vmul.f32 0.001953125, %v2258_v55  ;;  %v5024_v1 = vmul.f32 0.001953125, %v2265_v56 }
0x132b   : > { %v2667_v4 = vrot.slane %v2666_v58, 1  ;;  %v2674_v16 = vrot.slane %v2673_v60, 1  ;;  %v2681_v41 = vrot.slane %v2680_v61, 1  ;;  %v2688_v5 = vrot.slane %v2687_v62, 1 }
0x132c   : > { %v2918_v18 = vmul.f32 %v5018_v63, %v5018_v63  ;;  %v2919_v23 = vmul.f32 %v5020_v0, %v5020_v0  ;;  %v2920_v48 = vmul.f32 %v5022_v10, %v5022_v10  ;;  %v2921_v7 = vmul.f32 %v5024_v1, %v5024_v1 }
0x132d   : > { %v2668_v8 = vadd.f32 %v2667_v4, %v2666_v58  ;;  %v2675_v22 = vadd.f32 %v2674_v16, %v2673_v60  ;;  %v2682_v9 = vadd.f32 %v2681_v41, %v2680_v61  ;;  %v2689_v11 = vadd.f32 %v2688_v5, %v2687_v62 }
0x132e   : > { %v2096_v14 = vperm.slane %v2010_v3, %v4994_v39  ;;  %v2100_v19 = vperm.slane %v2010_v3, %v4996_v40  ;;  %v2104_v20 = vperm.slane %v2010_v3, %v4998_v42  ;;  %v2108_v21 = vperm.slane %v2010_v3, %v5000_v43  ;;  %v5042_v3 = vpop.xlane.xlu2 %2049 }
0x132f   : > { %v2886_v25 = vmul.f32 0.001953125, %v2668_v8  ;;  %v2887_v26 = vmul.f32 0.001953125, %v2675_v22  ;;  %v2888_v27 = vmul.f32 0.001953125, %v2682_v9  ;;  %v2889_v30 = vmul.f32 0.001953125, %v2689_v11 }
0x1330   : > { %v2266_v31 = vsel %vm2237_vm3, %v2096_v14, 0.0  ;;  %v2273_v32 = vsel %vm2237_vm3, %v2100_v19, 0.0  ;;  %v2280_v34 = vsel %vm2237_vm3, %v2104_v20, 0.0  ;;  %v2287_v36 = vsel %vm2237_vm3, %v2108_v21, 0.0 }
0x1331   : > { %v2950_v38 = vsub.f32 %v2886_v25, %v2918_v18  ;;  %v2951_v44 = vsub.f32 %v2887_v26, %v2919_v23  ;;  %v2952_v47 = vsub.f32 %v2888_v27, %v2920_v48  ;;  %v2953_v46 = vsub.f32 %v2889_v30, %v2921_v7 }
0x1332   : > { %v2267_v50 = vrot.slane %v2266_v31, 4  ;;  %v2274_v52 = vrot.slane %v2273_v32, 4  ;;  %v2281_v53 = vrot.slane %v2280_v34, 4  ;;  %v2288_v54 = vrot.slane %v2287_v36, 4 }
0x1333   : > { %v2982_v24 = vmax.f32 %v2950_v38, 0.0  ;;  %v2983_v55 = vmax.f32 %v2951_v44, 0.0  ;;  %v2984_v56 = vmax.f32 %v2952_v47, 0.0  ;;  %v2985_v58 = vmax.f32 %v2953_v46, 0.0 }
0x1334   : > { %v2268_v60 = vadd.f32 %v2267_v50, %v2266_v31  ;;  %v2275_v61 = vadd.f32 %v2274_v52, %v2273_v32  ;;  %v2282_v62 = vadd.f32 %v2281_v53, %v2280_v34  ;;  %v2289_v5 = vadd.f32 %v2288_v54, %v2287_v36 }
0x1335   : > { %v5044_v4 = vadd.f32 1e-05, %v2982_v24  ;;  %v5046_v16 = vadd.f32 1e-05, %v2983_v55  ;;  %v5048_v41 = vadd.f32 1e-05, %v2984_v56  ;;  %v2521_v8 = vperm.slane %v5042_v3, %v4994_v39 }
0x1336   : > { %v5050_v18 = vadd.f32 1e-05, %v2985_v58  ;;  %v2269_v23 = vrot.slane %v2268_v60, 2  ;;  %v2276_v48 = vrot.slane %v2275_v61, 2  ;;  %v2283_v7 = vrot.slane %v2282_v62, 2  ;;  %v2016_v35 = vpop.xlane.xlu2 %2015 }
0x1337   : > { %4137 = vrsqrt.f32 %v5044_v4  ;;  %v2290_v14 = vrot.slane %v2289_v5, 2  ;;  %v2525_v19 = vperm.slane %v5042_v3, %v4996_v40  ;;  %v2529_v25 = vperm.slane %v5042_v3, %v4998_v42 }
0x1338   : > { %4139 = vrsqrt.f32 %v5046_v16  ;;  %v2270_v22 = vadd.f32 %v2269_v23, %v2268_v60  ;;  %v2277_v9 = vadd.f32 %v2276_v48, %v2275_v61  ;;  %v2284_v11 = vadd.f32 %v2283_v7, %v2282_v62 }
0x1339   : > { %4141 = vrsqrt.f32 %v5048_v41  ;;  %v2291_v27 = vadd.f32 %v2290_v14, %v2289_v5  ;;  %v2533_v30 = vperm.slane %v5042_v3, %v5000_v43  ;;  %v2690_v31 = vsel %vm2237_vm3, %v2521_v8, 0.0 }
0x133a   : > { %4143 = vrsqrt.f32 %v5050_v18  ;;  %v2271_v20 = vrot.slane %v2270_v22, 1  ;;  %v2278_v21 = vrot.slane %v2277_v9, 1  ;;  %v2285_v26 = vrot.slane %v2284_v11, 1 }
0x133b   : > { %v2691_v36 = vrot.slane %v2690_v31, 4  ;;  %v2697_v38 = vsel %vm2237_vm3, %v2525_v19, 0.0  ;;  %v2292_v46 = vrot.slane %v2291_v27, 1  ;;  %v2704_v52 = vsel %vm2237_vm3, %v2529_v25, 0.0 }
0x133c   : > { %v2272_v32 = vadd.f32 %v2271_v20, %v2270_v22  ;;  %v2279_v34 = vadd.f32 %v2278_v21, %v2277_v9  ;;  %v2286_v47 = vadd.f32 %v2285_v26, %v2284_v11  ;;  %v2698_v50 = vrot.slane %v2697_v38, 4 }
0x133d   : > { %v4138_v44 = vpop.eup %4137  ;;  %vm3052_vm4 = vweird.f32 %v5044_v4  ;;  %vm3062_vm6 = vweird.f32 %v5046_v16  ;;  %v2293_v60 = vadd.f32 %v2292_v46, %v2291_v27  ;;  %vm3072_vm8 = vweird.f32 %v5048_v41 }
0x133e   : > { %v4140_v53 = vpop.eup %4139  ;;  %v3047_v54 = vmul.f32 %v4138_v44, %v5044_v4  ;;  %vm3053_vm5 = vweird.f32 %v4138_v44  ;;  %v5069_v24 = vmul.f32 0.001953125, %v2272_v32  ;;  %v5071_v55 = vmul.f32 0.001953125, %v2279_v34  ;;  %v2019_v28 = vpop.xlane.xlu2 %2018 }
0x133f   : > { %v4142_v56 = vpop.eup %4141  ;;  %v3057_v58 = vmul.f32 %v4140_v53, %v5046_v16  ;;  %vm3063_vm7 = vweird.f32 %v4140_v53  ;;  %v5075_v61 = vmul.f32 0.001953125, %v2286_v47  ;;  %vm3082_vm10 = vweird.f32 %v5050_v18  ;;  %vm3054_vm12 = vmor %vm3052_vm4, %vm3053_vm5 }
0x1340   : > { %v4144_v62 = vpop.eup %4143  ;;  %v3048_v3 = vmul.f32 %v4138_v44, %v3047_v54  ;;  %v3067_v5 = vmul.f32 %v4142_v56, %v5048_v41  ;;  %vm3073_vm9 = vweird.f32 %v4142_v56  ;;  %v5081_v23 = vmul.f32 %v5069_v24, %v5069_v24  ;;  %vm3064_vm13 = vmor %vm3062_vm6, %vm3063_vm7 }
0x1341   : > { %v3058_v48 = vmul.f32 %v4140_v53, %v3057_v58  ;;  %v3077_v7 = vmul.f32 %v4144_v62, %v5050_v18  ;;  %vm3083_vm11 = vweird.f32 %v4144_v62  ;;  %v5085_v8 = vmul.f32 0.001953125, %v2293_v60  ;;  %vm3074_vm14 = vmor %vm3072_vm8, %vm3073_vm9 }
0x1342   : > { %v3049_v22 = vmul.f32 0.5, %v3048_v3  ;;  %v3068_v9 = vmul.f32 %v4142_v56, %v3067_v5  ;;  %v5089_v11 = vmul.f32 %v5071_v55, %v5071_v55  ;;  %v5093_v14 = vmul.f32 %v5075_v61, %v5075_v61  ;;  %vm3084_vm15 = vmor %vm3082_vm10, %vm3083_vm11 }
0x1343   : > { %v3059_v19 = vmul.f32 0.5, %v3058_v48  ;;  %v3078_v20 = vmul.f32 %v4144_v62, %v3077_v7  ;;  %v5097_v21 = vmul.f32 %v5085_v8, %v5085_v8  ;;  %v2692_v25 = vadd.f32 %v2691_v36, %v2690_v31 }
0x1344   : > { %v3050_v26 = vsub.f32 1.5, %v3049_v22  ;;  %v3069_v27 = vmul.f32 0.5, %v3068_v9  ;;  %v2699_v32 = vadd.f32 %v2698_v50, %v2697_v38  ;;  %v2705_v34 = vrot.slane %v2704_v52, 4  ;;  %v2013_v22 = vpop.xlane.xlu1 %2012 }
0x1345   : > { %v3060_v47 = vsub.f32 1.5, %v3059_v19  ;;  %v3079_v46 = vmul.f32 0.5, %v3078_v20  ;;  %v2693_v54 = vrot.slane %v2692_v25, 2  ;;  %v2711_v58 = vsel %vm2237_vm3, %v2533_v30, 0.0 }
0x1346   : > { %v3051_v60 = vmul.f32 %v4138_v44, %v3050_v26  ;;  %v3070_v3 = vsub.f32 1.5, %v3069_v27  ;;  %v2700_v5 = vrot.slane %v2699_v32, 2  ;;  %v2706_v17 = vadd.f32 %v2705_v34, %v2704_v52 }
0x1347   : > { %v3061_v48 = vmul.f32 %v4140_v53, %v3060_v47  ;;  %v3080_v7 = vsub.f32 1.5, %v3079_v46  ;;  %v2694_v31 = vadd.f32 %v2693_v54, %v2692_v25  ;;  %v2712_v36 = vrot.slane %v2711_v58, 4 }
0x1348   : > { %v3055_v38 = vsel %vm3054_vm12, %v4138_v44, %v3051_v60  ;;  %v3071_v50 = vmul.f32 %v4142_v56, %v3070_v3  ;;  %v2701_v30 = vadd.f32 %v2700_v5, %v2699_v32  ;;  %v2707_v9 = vrot.slane %v2706_v17, 2 }
0x1349   : > { %v3065_v19 = vsel %vm3064_vm13, %v4140_v53, %v3061_v48  ;;  %v3081_v4 = vmul.f32 %v4144_v62, %v3080_v7  ;;  %3398 = vst [vmem:[#allocation1] ss:$4 sm:$0xff] %v3055_v38  ;;  %v2695_v52 = vrot.slane %v2694_v31, 1  ;;  %v2713_v20 = vadd.f32 %v2712_v36, %v2711_v58 }
0x134a   : > { %v3075_v25 = vsel %vm3074_vm14, %v4142_v56, %v3071_v50  ;;  %3400 = vst [vmem:[#allocation1 + $0x1] ss:$4 sm:$0xff] %v3065_v19  ;;  %v2702_v16 = vrot.slane %v2701_v30, 1  ;;  %v2708_v44 = vadd.f32 %v2707_v9, %v2706_v17  ;;  %v2112_v26 = vperm.slane %v2013_v22, %v4994_v39 }
0x134b   : > { %v3085_v27 = vsel %vm3084_vm15, %v4144_v62, %v3081_v4  ;;  %3402 = vst [vmem:[#allocation1 + $0x2] ss:$4 sm:$0xff] %v3075_v25  ;;  %v2696_v53 = vadd.f32 %v2695_v52, %v2694_v31  ;;  %v2714_v32 = vrot.slane %v2713_v20, 2  ;;  %v2116_v41 = vperm.slane %v2013_v22, %v4996_v40 }
0x134c   : > { %3404 = vst [vmem:[#allocation1 + $0x3] ss:$4 sm:$0xff] %v3085_v27  ;;  %v2703_v34 = vadd.f32 %v2702_v16, %v2701_v30  ;;  %v2709_v47 = vrot.slane %v2708_v44, 1  ;;  %v2120_v56 = vperm.slane %v2013_v22, %v4998_v42  ;;  %v2124_v46 = vperm.slane %v2013_v22, %v5000_v43 }
0x134d   : > { %v2715_v18 = vadd.f32 %v2714_v32, %v2713_v20  ;;  %v2890_v54 = vmul.f32 0.001953125, %v2696_v53  ;;  %v2294_v58 = vsel %vm2237_vm3, %v2112_v26, 0.0  ;;  %v2301_v17 = vsel %vm2237_vm3, %v2116_v41, 0.0 }
0x134e   : > { %v2710_v60 = vadd.f32 %v2709_v47, %v2708_v44  ;;  %v2891_v62 = vmul.f32 0.001953125, %v2703_v34  ;;  %v2295_v3 = vrot.slane %v2294_v58, 4  ;;  %v2302_v5 = vrot.slane %v2301_v17, 4 }
0x134f   : > { %v2716_v48 = vrot.slane %v2715_v18, 1  ;;  %v2954_v7 = vsub.f32 %v2890_v54, %v5081_v23  ;;  %v2308_v31 = vsel %vm2237_vm3, %v2120_v56, 0.0  ;;  %v2315_v36 = vsel %vm2237_vm3, %v2124_v46, 0.0 }
0x1350   : > { %v2892_v38 = vmul.f32 0.001953125, %v2710_v60  ;;  %v2955_v22 = vsub.f32 %v2891_v62, %v5089_v11  ;;  %v2296_v50 = vadd.f32 %v2295_v3, %v2294_v58  ;;  %v2303_v30 = vadd.f32 %v2302_v5, %v2301_v17  ;;  %v2053_v60 = vpop.xlane.xlu0 %2052 }
0x1351   : > { %v2717_v9 = vadd.f32 %v2716_v48, %v2715_v18  ;;  %v2986_v19 = vmax.f32 %v2954_v7, 0.0  ;;  %v2309_v4 = vrot.slane %v2308_v31, 4  ;;  %v2316_v52 = vrot.slane %v2315_v36, 4 }
0x1352   : > { %v2956_v20 = vsub.f32 %v2892_v38, %v5093_v14  ;;  %v2987_v25 = vmax.f32 %v2955_v22, 0.0  ;;  %v2297_v16 = vrot.slane %v2296_v50, 2  ;;  %v2304_v44 = vrot.slane %v2303_v30, 2 }
0x1353   : > { %v2893_v26 = vmul.f32 0.001953125, %v2717_v9  ;;  %v5123_v23 = vadd.f32 1e-05, %v2986_v19  ;;  %v2310_v27 = vadd.f32 %v2309_v4, %v2308_v31  ;;  %v2317_v53 = vadd.f32 %v2316_v52, %v2315_v36  ;;  %v5255_v37 = vld.sshfl [vmem:[#allocation1] sm:$0xff pattern:$0x73625140] }
0x1354   : > { %v2988_v32 = vmax.f32 %v2956_v20, 0.0  ;;  %v5125_v41 = vadd.f32 1e-05, %v2987_v25  ;;  %v2298_v11 = vadd.f32 %v2297_v16, %v2296_v50  ;;  %v2305_v34 = vadd.f32 %v2304_v44, %v2303_v30 }
0x1355   : > { %v2957_v47 = vsub.f32 %v2893_v26, %v5097_v21  ;;  %4145 = vrsqrt.f32 %v5123_v23  ;;  %v2311_v56 = vrot.slane %v2310_v27, 2  ;;  %v2318_v17 = vrot.slane %v2317_v53, 2 }
0x1356   : > { %v5129_v46 = vadd.f32 1e-05, %v2988_v32  ;;  %4147 = vrsqrt.f32 %v5125_v41  ;;  %v2299_v14 = vrot.slane %v2298_v11, 1  ;;  %v2306_v54 = vrot.slane %v2305_v34, 1 }
0x1357   : > { %v2989_v18 = vmax.f32 %v2957_v47, 0.0  ;;  %v2312_v58 = vadd.f32 %v2311_v56, %v2310_v27  ;;  %v2319_v48 = vadd.f32 %v2318_v17, %v2317_v53  ;;  %v2537_v31 = vperm.slane %v2053_v60, %v4994_v39 }
0x1358   : > { %4149 = vrsqrt.f32 %v5129_v46  ;;  %v2300_v62 = vadd.f32 %v2299_v14, %v2298_v11  ;;  %v2307_v5 = vadd.f32 %v2306_v54, %v2305_v34  ;;  %v2541_v36 = vperm.slane %v2053_v60, %v4996_v40  ;;  %v2022_v51 = vpop.xlane.xlu0 %2021 }
0x1359   : > { %v5133_v3 = vadd.f32 1e-05, %v2989_v18  ;;  %v2313_v21 = vrot.slane %v2312_v58, 1  ;;  %v2545_v38 = vperm.slane %v2053_v60, %v4998_v42  ;;  %v2320_v30 = vrot.slane %v2319_v48, 1 }
0x135a   : > { %v5135_v7 = vmul.f32 0.001953125, %v2300_v62  ;;  %v2549_v9 = vperm.slane %v2053_v60, %v5000_v43  ;;  %vm3092_vm0 = vweird.f32 %v5123_v23  ;;  %v5144_v52 = vmul.f32 0.001953125, %v2307_v5 }
0x135b   : > { %v4146_v22 = vpop.eup %4145  ;;  %4151 = vrsqrt.f32 %v5133_v3  ;;  %v2314_v50 = vadd.f32 %v2313_v21, %v2312_v58  ;;  %vm3102_vm2 = vweird.f32 %v5125_v41  ;;  %v2321_v16 = vadd.f32 %v2320_v30, %v2319_v48 }
0x135c   : > { %v4148_v19 = vpop.eup %4147  ;;  %v3087_v4 = vmul.f32 %v4146_v22, %v5123_v23  ;;  %vm3093_vm1 = vweird.f32 %v4146_v22  ;;  %v5148_v20 = vmul.f32 %v5135_v7, %v5135_v7  ;;  %v5156_v53 = vmul.f32 %v5144_v52, %v5144_v52 }
0x135d   : > { %v3097_v25 = vmul.f32 %v4148_v19, %v5125_v41  ;;  %vm3103_vm4 = vweird.f32 %v4148_v19  ;;  %v5152_v44 = vmul.f32 0.001953125, %v2314_v50  ;;  %v2718_v32 = vsel %vm2237_vm3, %v2537_v31, 0.0  ;;  %vm3094_vm9 = vmor %vm3092_vm0, %vm3093_vm1 }
0x135e   : > { %v4150_v26 = vpop.eup %4149  ;;  %v3088_v27 = vmul.f32 %v4146_v22, %v3087_v4  ;;  %v2725_v11 = vsel %vm2237_vm3, %v2541_v36, 0.0  ;;  %vm3112_vm5 = vweird.f32 %v5129_v46  ;;  %v5162_v56 = vmul.f32 0.001953125, %v2321_v16  ;;  %vm3104_vm10 = vmor %vm3102_vm2, %vm3103_vm4 }
0x135f   : > { %v3098_v34 = vmul.f32 %v4148_v19, %v3097_v25  ;;  %v3107_v47 = vmul.f32 %v4150_v26, %v5129_v46  ;;  %vm3113_vm6 = vweird.f32 %v4150_v26  ;;  %v5166_v18 = vmul.f32 %v5152_v44, %v5152_v44 }
0x1360   : > { %v3089_v14 = vmul.f32 0.5, %v3088_v27  ;;  %v2719_v54 = vrot.slane %v2718_v32, 4  ;;  %v2726_v58 = vrot.slane %v2725_v11, 4  ;;  %v5170_v5 = vmul.f32 %v5162_v56, %v5162_v56  ;;  %vm3114_vm11 = vmor %vm3112_vm5, %vm3113_vm6 }
0x1361   : > { %v4152_v17 = vpop.eup %4151  ;;  %v3099_v60 = vmul.f32 0.5, %v3098_v34  ;;  %v3108_v62 = vmul.f32 %v4150_v26, %v3107_v47  ;;  %v2732_v21 = vsel %vm2237_vm3, %v2545_v38, 0.0  ;;  %vm3122_vm7 = vweird.f32 %v5133_v3 }
0x1362   : > { %v3090_v48 = vsub.f32 1.5, %v3089_v14  ;;  %v3117_v31 = vmul.f32 %v4152_v17, %v5133_v3  ;;  %vm3123_vm8 = vweird.f32 %v4152_v17  ;;  %v2720_v36 = vadd.f32 %v2719_v54, %v2718_v32 }
0x1363   : > { %v3100_v50 = vsub.f32 1.5, %v3099_v60  ;;  %v3109_v30 = vmul.f32 0.5, %v3108_v62  ;;  %v2727_v4 = vadd.f32 %v2726_v58, %v2725_v11  ;;  %v2733_v25 = vrot.slane %v2732_v21, 4  ;;  %vm3124_vm12 = vmor %vm3122_vm7, %vm3123_vm8 }
0x1364   : > { %v3091_v16 = vmul.f32 %v4146_v22, %v3090_v48  ;;  %v3118_v27 = vmul.f32 %v4152_v17, %v3117_v31  ;;  %v2721_v34 = vrot.slane %v2720_v36, 2  ;;  %v2739_v47 = vsel %vm2237_vm3, %v2549_v9, 0.0 }
0x1365   : > { %v3101_v38 = vmul.f32 %v4148_v19, %v3100_v50  ;;  %v3110_v14 = vsub.f32 1.5, %v3109_v30  ;;  %v2728_v12 = vrot.slane %v2727_v4, 2  ;;  %v2734_v2 = vadd.f32 %v2733_v25, %v2732_v21 }
0x1366   : > { %v3095_v59 = vsel %vm3094_vm9, %v4146_v22, %v3091_v16  ;;  %v3119_v32 = vmul.f32 0.5, %v3118_v27  ;;  %v2722_v11 = vadd.f32 %v2721_v34, %v2720_v36  ;;  %v2740_v54 = vrot.slane %v2739_v47, 4 }
0x1367   : > { %v3105_v58 = vsel %vm3104_vm10, %v4148_v19, %v3101_v38  ;;  %v3111_v60 = vmul.f32 %v4150_v26, %v3110_v14  ;;  %3406 = vst [vmem:[#allocation1 + $0x20] ss:$4 sm:$0xff] %v3095_v59  ;;  %v2729_v9 = vadd.f32 %v2728_v12, %v2727_v4  ;;  %v2735_v62 = vrot.slane %v2734_v2, 2 }
0x1368   : > { %v3120_v23 = vsub.f32 1.5, %v3119_v32  ;;  %3408 = vst [vmem:[#allocation1 + $0x21] ss:$4 sm:$0xff] %v3105_v58  ;;  %v2723_v21 = vrot.slane %v2722_v11, 1  ;;  %v2741_v22 = vadd.f32 %v2740_v54, %v2739_v47  ;;  %v2128_v48 = vperm.slane %v2016_v35, %v4994_v39 }
0x1369   : > { %v3115_v41 = vsel %vm3114_vm11, %v4150_v26, %v3111_v60  ;;  %v2730_v31 = vrot.slane %v2729_v9, 1  ;;  %v2736_v50 = vadd.f32 %v2735_v62, %v2734_v2  ;;  %v2132_v36 = vperm.slane %v2016_v35, %v4996_v40 }
0x136a   : > { %v3121_v19 = vmul.f32 %v4152_v17, %v3120_v23  ;;  %3410 = vst [vmem:[#allocation1 + $0x22] ss:$4 sm:$0xff] %v3115_v41  ;;  %v2724_v59 = vadd.f32 %v2723_v21, %v2722_v11  ;;  %v2742_v12 = vrot.slane %v2741_v22, 2  ;;  %v2136_v30 = vperm.slane %v2016_v35, %v4998_v42 }
0x136b   : > { %v2731_v46 = vadd.f32 %v2730_v31, %v2729_v9  ;;  %v2737_v4 = vrot.slane %v2736_v50, 1  ;;  %v2140_v25 = vperm.slane %v2016_v35, %v5000_v43  ;;  %v2322_v26 = vsel %vm2237_vm3, %v2128_v48, 0.0 }
0x136c   : > { %v3125_v16 = vsel %vm3124_vm12, %v4152_v17, %v3121_v19  ;;  %v2743_v2 = vadd.f32 %v2742_v12, %v2741_v22  ;;  %v2894_v27 = vmul.f32 0.001953125, %v2724_v59  ;;  %v2323_v34 = vrot.slane %v2322_v26, 4 }
0x136d   : > { %3412 = vst [vmem:[#allocation1 + $0x23] ss:$4 sm:$0xff] %v3125_v16  ;;  %v2738_v47 = vadd.f32 %v2737_v4, %v2736_v50  ;;  %v2895_v38 = vmul.f32 0.001953125, %v2731_v46  ;;  %v2329_v14 = vsel %vm2237_vm3, %v2132_v36, 0.0  ;;  %v2336_v32 = vsel %vm2237_vm3, %v2136_v30, 0.0 }
0x136e   : > { %v2744_v11 = vrot.slane %v2743_v2, 1  ;;  %v2958_v3 = vsub.f32 %v2894_v27, %v5148_v20  ;;  %v2324_v54 = vadd.f32 %v2323_v34, %v2322_v26  ;;  %v2330_v58 = vrot.slane %v2329_v14, 4 }
0x136f   : > { %v2896_v60 = vmul.f32 0.001953125, %v2738_v47  ;;  %v2959_v35 = vsub.f32 %v2895_v38, %v5156_v53  ;;  %v2337_v9 = vrot.slane %v2336_v32, 4  ;;  %v2343_v17 = vsel %vm2237_vm3, %v2140_v25, 0.0  ;;  %v2056_v47 = vpop.xlane.xlu1 %2055 }
0x1370   : > { %v2745_v62 = vadd.f32 %v2744_v11, %v2743_v2  ;;  %v2990_v23 = vmax.f32 %v2958_v3, 0.0  ;;  %v2325_v21 = vrot.slane %v2324_v54, 2  ;;  %v2331_v22 = vadd.f32 %v2330_v58, %v2329_v14 }
0x1371   : > { %v2960_v48 = vsub.f32 %v2896_v60, %v5166_v18  ;;  %v2991_v41 = vmax.f32 %v2959_v35, 0.0  ;;  %v2338_v31 = vadd.f32 %v2337_v9, %v2336_v32  ;;  %v2344_v50 = vrot.slane %v2343_v17, 4 }
0x1372   : > { %v2897_v36 = vmul.f32 0.001953125, %v2745_v62  ;;  %v5199_v19 = vadd.f32 1e-05, %v2990_v23  ;;  %v2326_v20 = vadd.f32 %v2325_v21, %v2324_v54  ;;  %v2332_v59 = vrot.slane %v2331_v22, 2 }
0x1373   : > { %v2992_v12 = vmax.f32 %v2960_v48, 0.0  ;;  %v5201_v30 = vadd.f32 1e-05, %v2991_v41  ;;  %v2339_v53 = vrot.slane %v2338_v31, 2  ;;  %v2345_v46 = vadd.f32 %v2344_v50, %v2343_v17 }
0x1374   : > { %v2961_v4 = vsub.f32 %v2897_v36, %v5170_v5  ;;  %4153 = vrsqrt.f32 %v5199_v19  ;;  %v2327_v25 = vrot.slane %v2326_v20, 1  ;;  %v2333_v18 = vadd.f32 %v2332_v59, %v2331_v22  ;;  %v5333_v49 = vld.sshfl [vmem:[#allocation1 + $0x20] sm:$0xff pattern:$0x73625140] }
0x1375   : > { %v5205_v26 = vadd.f32 1e-05, %v2992_v12  ;;  %4155 = vrsqrt.f32 %v5201_v30  ;;  %v2340_v27 = vadd.f32 %v2339_v53, %v2338_v31  ;;  %v2346_v34 = vrot.slane %v2345_v46, 2 }
0x1376   : > { %v2993_v16 = vmax.f32 %v2961_v4, 0.0  ;;  %v2328_v2 = vadd.f32 %v2327_v25, %v2326_v20  ;;  %v2334_v38 = vrot.slane %v2333_v18, 1  ;;  %v2553_v54 = vperm.slane %v2056_v47, %v4994_v39 }
0x1377   : > { %4157 = vrsqrt.f32 %v5205_v26  ;;  %v2341_v32 = vrot.slane %v2340_v27, 1  ;;  %v2347_v5 = vadd.f32 %v2346_v34, %v2345_v46  ;;  %v2557_v58 = vperm.slane %v2056_v47, %v4996_v40 }
0x1378   : > { %v5209_v14 = vadd.f32 1e-05, %v2993_v16  ;;  %v5211_v11 = vmul.f32 0.001953125, %v2328_v2  ;;  %v2335_v3 = vadd.f32 %v2334_v38, %v2333_v18  ;;  %v2561_v60 = vperm.slane %v2056_v47, %v4998_v42 }
0x1379   : > { %v2342_v9 = vadd.f32 %v2341_v32, %v2340_v27  ;;  %v2348_v17 = vrot.slane %v2347_v5, 1  ;;  %v2565_v62 = vperm.slane %v2056_v47, %v5000_v43  ;;  %vm3132_vm13 = vweird.f32 %v5199_v19 }
0x137a   : > { %v4154_v35 = vpop.eup %4153  ;;  %4159 = vrsqrt.f32 %v5209_v14  ;;  %v5220_v22 = vmul.f32 0.001953125, %v2335_v3  ;;  %v5224_v48 = vmul.f32 %v5211_v11, %v5211_v11  ;;  %vm3142_vm15 = vweird.f32 %v5201_v30 }
0x137b   : > { %v4156_v23 = vpop.eup %4155  ;;  %v3127_v21 = vmul.f32 %v4154_v35, %v5199_v19  ;;  %vm3133_vm14 = vweird.f32 %v4154_v35  ;;  %v2349_v31 = vadd.f32 %v2348_v17, %v2347_v5  ;;  %v5228_v50 = vmul.f32 0.001953125, %v2342_v9 }
0x137c   : > { %v3137_v41 = vmul.f32 %v4156_v23, %v5201_v30  ;;  %vm3143_vm0 = vweird.f32 %v4156_v23  ;;  %v5232_v59 = vmul.f32 %v5220_v22, %v5220_v22  ;;  %v2746_v12 = vsel %vm2237_vm3, %v2553_v54, 0.0  ;;  %vm3134_vm6 = vmor %vm3132_vm13, %vm3133_vm14 }
0x137d   : > { %v4158_v36 = vpop.eup %4157  ;;  %v3128_v20 = vmul.f32 %v4154_v35, %v3127_v21  ;;  %v2753_v53 = vsel %vm2237_vm3, %v2557_v58, 0.0  ;;  %vm3152_vm1 = vweird.f32 %v5205_v26  ;;  %v5238_v25 = vmul.f32 0.001953125, %v2349_v31  ;;  %vm3144_vm7 = vmor %vm3142_vm15, %vm3143_vm0 }
0x137e   : > { %v3138_v46 = vmul.f32 %v4156_v23, %v3137_v41  ;;  %v3147_v4 = vmul.f32 %v4158_v36, %v5205_v26  ;;  %vm3153_vm2 = vweird.f32 %v4158_v36  ;;  %v5242_v16 = vmul.f32 %v5228_v50, %v5228_v50 }
0x137f   : > { %5864 = vst [vmem:[#allocation26_spill] sm:$0xff] %v5238_v25  ;;  %v3129_v18 = vmul.f32 0.5, %v3128_v20  ;;  %v2747_v2 = vrot.slane %v2746_v12, 4  ;;  %v2754_v27 = vrot.slane %v2753_v53, 4  ;;  %v5246_v32 = vmul.f32 %v5238_v25, %v5238_v25  ;;  %vm3154_vm8 = vmor %vm3152_vm1, %vm3153_vm2 }
0x1380   : > { %v4160_v34 = vpop.eup %4159  ;;  %v3139_v47 = vmul.f32 0.5, %v3138_v46  ;;  %v3148_v38 = vmul.f32 %v4158_v36, %v3147_v4  ;;  %v2760_v5 = vsel %vm2237_vm3, %v2561_v60, 0.0  ;;  %vm3162_vm4 = vweird.f32 %v5209_v14 }
0x1381   : > { %v3130_v3 = vsub.f32 1.5, %v3129_v18  ;;  %v3157_v54 = vmul.f32 %v4160_v34, %v5209_v14  ;;  %vm3163_vm5 = vweird.f32 %v4160_v34  ;;  %v2748_v58 = vadd.f32 %v2747_v2, %v2746_v12 }
0x1382   : > { %v3140_v9 = vsub.f32 1.5, %v3139_v47  ;;  %v3149_v17 = vmul.f32 0.5, %v3148_v38  ;;  %v2755_v21 = vadd.f32 %v2754_v27, %v2753_v53  ;;  %v2761_v41 = vrot.slane %v2760_v5, 4  ;;  %vm3164_vm9 = vmor %vm3162_vm4, %vm3163_vm5 }
0x1383   : > { %v3131_v31 = vmul.f32 %v4154_v35, %v3130_v3  ;;  %v3158_v20 = vmul.f32 %v4160_v34, %v3157_v54  ;;  %v2749_v46 = vrot.slane %v2748_v58, 2  ;;  %v2767_v4 = vsel %vm2237_vm3, %v2565_v62, 0.0 }
0x1384   : > { %v3141_v60 = vmul.f32 %v4156_v23, %v3140_v9  ;;  %v3150_v18 = vsub.f32 1.5, %v3149_v17  ;;  %v2756_v57 = vrot.slane %v2755_v21, 2  ;;  %v2762_v29 = vadd.f32 %v2761_v41, %v2760_v5 }
0x1385   : > { %v3135_v12 = vsel %vm3134_vm6, %v4154_v35, %v3131_v31  ;;  %v3159_v53 = vmul.f32 0.5, %v3158_v20  ;;  %v2750_v2 = vadd.f32 %v2749_v46, %v2748_v58  ;;  %v2768_v27 = vrot.slane %v2767_v4, 4 }
0x1386   : > { %v3145_v62 = vsel %vm3144_vm7, %v4156_v23, %v3141_v60  ;;  %v3151_v47 = vmul.f32 %v4158_v36, %v3150_v18  ;;  %3415 = vst [vmem:[#allocation1] ss:$4 sm:$0xff] %v3135_v12  ;;  %v2757_v19 = vadd.f32 %v2756_v57, %v2755_v21  ;;  %v2763_v38 = vrot.slane %v2762_v29, 2 }
0x1387   : > { %v3160_v5 = vsub.f32 1.5, %v3159_v53  ;;  %3416 = vst [vmem:[#allocation1 + $0x1] ss:$4 sm:$0xff] %v3145_v62  ;;  %v2751_v3 = vrot.slane %v2750_v2, 1  ;;  %v2769_v35 = vadd.f32 %v2768_v27, %v2767_v4  ;;  %v2144_v54 = vperm.slane %v2019_v28, %v4994_v39 }
0x1388   : > { %v3155_v30 = vsel %vm3154_vm8, %v4158_v36, %v3151_v47  ;;  %v2758_v9 = vrot.slane %v2757_v19, 1  ;;  %v2764_v17 = vadd.f32 %v2763_v38, %v2762_v29  ;;  %v2148_v58 = vperm.slane %v2019_v28, %v4996_v40 }
0x1389   : > { %v3161_v23 = vmul.f32 %v4160_v34, %v3160_v5  ;;  %3417 = vst [vmem:[#allocation1 + $0x2] ss:$4 sm:$0xff] %v3155_v30  ;;  %v2752_v41 = vadd.f32 %v2751_v3, %v2750_v2  ;;  %v2770_v57 = vrot.slane %v2769_v35, 2  ;;  %v2152_v21 = vperm.slane %v2019_v28, %v4998_v42 }
0x138a   : > { %v2759_v26 = vadd.f32 %v2758_v9, %v2757_v19  ;;  %v2765_v31 = vrot.slane %v2764_v17, 1  ;;  %v2156_v20 = vperm.slane %v2019_v28, %v5000_v43  ;;  %v2350_v36 = vsel %vm2237_vm3, %v2144_v54, 0.0 }
0x138b   : > { %v3165_v46 = vsel %vm3164_vm9, %v4160_v34, %v3161_v23  ;;  %v2771_v29 = vadd.f32 %v2770_v57, %v2769_v35  ;;  %v2898_v4 = vmul.f32 0.001953125, %v2752_v41  ;;  %v2351_v60 = vrot.slane %v2350_v36, 4 }
0x138c   : > { %3418 = vst [vmem:[#allocation1 + $0x3] ss:$4 sm:$0xff] %v3165_v46  ;;  %v2766_v18 = vadd.f32 %v2765_v31, %v2764_v17  ;;  %v2899_v12 = vmul.f32 0.001953125, %v2759_v26  ;;  %v2357_v53 = vsel %vm2237_vm3, %v2148_v58, 0.0  ;;  %v2364_v2 = vsel %vm2237_vm3, %v2152_v21, 0.0 }
0x138d   : > { %v2772_v27 = vrot.slane %v2771_v29, 1  ;;  %v2962_v14 = vsub.f32 %v2898_v4, %v5224_v48  ;;  %v2352_v62 = vadd.f32 %v2351_v60, %v2350_v36  ;;  %v2358_v47 = vrot.slane %v2357_v53, 4 }
0x138e   : > { %v2900_v19 = vmul.f32 0.001953125, %v2766_v18  ;;  %v2963_v28 = vsub.f32 %v2899_v12, %v5232_v59  ;;  %v2365_v38 = vrot.slane %v2364_v2, 4  ;;  %v2371_v34 = vsel %vm2237_vm3, %v2156_v20, 0.0  ;;  %v2059_v12 = vpop.xlane.xlu1 %2058 }
0x138f   : > { %v2773_v5 = vadd.f32 %v2772_v27, %v2771_v29  ;;  %v2994_v3 = vmax.f32 %v2962_v14, 0.0  ;;  %v2353_v35 = vrot.slane %v2352_v62, 2  ;;  %v2359_v54 = vadd.f32 %v2358_v47, %v2357_v53 }
0x1390   : > { %v2964_v30 = vsub.f32 %v2900_v19, %v5242_v16  ;;  %v2995_v9 = vmax.f32 %v2963_v28, 0.0  ;;  %v2366_v17 = vadd.f32 %v2365_v38, %v2364_v2  ;;  %v2372_v58 = vrot.slane %v2371_v34, 4 }
0x1391   : > { %v2901_v23 = vmul.f32 0.001953125, %v2773_v5  ;;  %v5277_v41 = vadd.f32 1e-05, %v2994_v3  ;;  %v2354_v48 = vadd.f32 %v2353_v35, %v2352_v62  ;;  %v2360_v57 = vrot.slane %v2359_v54, 2 }
0x1392   : > { %v2996_v21 = vmax.f32 %v2964_v30, 0.0  ;;  %v5279_v26 = vadd.f32 1e-05, %v2995_v9  ;;  %v2367_v59 = vrot.slane %v2366_v17, 2  ;;  %v2373_v31 = vadd.f32 %v2372_v58, %v2371_v34 }
0x1393   : > { %v2965_v20 = vsub.f32 %v2901_v23, %v5246_v32  ;;  %4161 = vrsqrt.f32 %v5277_v41  ;;  %v2355_v36 = vrot.slane %v2354_v48, 1  ;;  %v2361_v16 = vadd.f32 %v2360_v57, %v2359_v54 }
0x1394   : > { %v5283_v46 = vadd.f32 1e-05, %v2996_v21  ;;  %4163 = vrsqrt.f32 %v5279_v26  ;;  %v2368_v60 = vadd.f32 %v2367_v59, %v2366_v17  ;;  %v2374_v18 = vrot.slane %v2373_v31, 2 }
0x1395   : > { %v2997_v29 = vmax.f32 %v2965_v20, 0.0  ;;  %v2356_v4 = vadd.f32 %v2355_v36, %v2354_v48  ;;  %v2362_v53 = vrot.slane %v2361_v16, 1  ;;  %v2569_v47 = vperm.slane %v2059_v12, %v4994_v39 }
0x1396   : > { %4165 = vrsqrt.f32 %v5283_v46  ;;  %v2369_v27 = vrot.slane %v2368_v60, 1  ;;  %v2375_v32 = vadd.f32 %v2374_v18, %v2373_v31  ;;  %v2573_v19 = vperm.slane %v2059_v12, %v4996_v40 }
0x1397   : > { %v5287_v2 = vadd.f32 1e-05, %v2997_v29  ;;  %v5289_v14 = vmul.f32 0.001953125, %v2356_v4  ;;  %v2363_v62 = vadd.f32 %v2362_v53, %v2361_v16  ;;  %v2577_v28 = vperm.slane %v2059_v12, %v4998_v42 }
0x1398   : > { %v2370_v34 = vadd.f32 %v2369_v27, %v2368_v60  ;;  %v2376_v5 = vrot.slane %v2375_v32, 1  ;;  %v2581_v3 = vperm.slane %v2059_v12, %v5000_v43  ;;  %vm3172_vm10 = vweird.f32 %v5277_v41 }
0x1399   : > { %v4162_v38 = vpop.eup %4161  ;;  %4167 = vrsqrt.f32 %v5287_v2  ;;  %v5298_v30 = vmul.f32 0.001953125, %v2363_v62  ;;  %v5302_v9 = vmul.f32 %v5289_v14, %v5289_v14  ;;  %vm3182_vm12 = vweird.f32 %v5279_v26 }
0x139a   : > { %v4164_v35 = vpop.eup %4163  ;;  %v3167_v54 = vmul.f32 %v4162_v38, %v5277_v41  ;;  %vm3173_vm11 = vweird.f32 %v4162_v38  ;;  %v2377_v58 = vadd.f32 %v2376_v5, %v2375_v32  ;;  %v5306_v23 = vmul.f32 0.001953125, %v2370_v34 }
0x139b   : > { %v3177_v17 = vmul.f32 %v4164_v35, %v5279_v26  ;;  %vm3183_vm13 = vweird.f32 %v4164_v35  ;;  %v5310_v21 = vmul.f32 %v5298_v30, %v5298_v30  ;;  %v2774_v59 = vsel %vm2237_vm3, %v2569_v47, 0.0  ;;  %vm3174_vm2 = vmor %vm3172_vm10, %vm3173_vm11 }
0x139c   : > { %v4166_v48 = vpop.eup %4165  ;;  %v3168_v57 = vmul.f32 %v4162_v38, %v3167_v54  ;;  %v2781_v31 = vsel %vm2237_vm3, %v2573_v19, 0.0  ;;  %vm3192_vm14 = vweird.f32 %v5283_v46  ;;  %v5316_v16 = vmul.f32 0.001953125, %v2377_v58  ;;  %vm3184_vm4 = vmor %vm3182_vm12, %vm3183_vm13 }
0x139d   : > { %v3178_v20 = vmul.f32 %v4164_v35, %v3177_v17  ;;  %v3187_v36 = vmul.f32 %v4166_v48, %v5283_v46  ;;  %vm3193_vm15 = vweird.f32 %v4166_v48  ;;  %v5320_v4 = vmul.f32 %v5306_v23, %v5306_v23 }
0x139e   : > { %v3169_v29 = vmul.f32 0.5, %v3168_v57  ;;  %v2775_v60 = vrot.slane %v2774_v59, 4  ;;  %v2782_v18 = vrot.slane %v2781_v31, 4  ;;  %v5324_v32 = vmul.f32 %v5316_v16, %v5316_v16  ;;  %vm3194_vm5 = vmor %vm3192_vm14, %vm3193_vm15 }
0x139f   : > { %v4168_v12 = vpop.eup %4167  ;;  %v3179_v53 = vmul.f32 0.5, %v3178_v20  ;;  %v3188_v27 = vmul.f32 %v4166_v48, %v3187_v36  ;;  %v2788_v62 = vsel %vm2237_vm3, %v2577_v28, 0.0  ;;  %vm3202_vm0 = vweird.f32 %v5287_v2 }
0x13a0   : > { %v3170_v47 = vsub.f32 1.5, %v3169_v29  ;;  %v3197_v19 = vmul.f32 %v4168_v12, %v5287_v2  ;;  %vm3203_vm1 = vweird.f32 %v4168_v12  ;;  %v2776_v34 = vadd.f32 %v2775_v60, %v2774_v59 }
0x13a1   : > { %v3180_v5 = vsub.f32 1.5, %v3179_v53  ;;  %v3189_v54 = vmul.f32 0.5, %v3188_v27  ;;  %v2783_v17 = vadd.f32 %v2782_v18, %v2781_v31  ;;  %v2789_v58 = vrot.slane %v2788_v62, 4  ;;  %vm3204_vm6 = vmor %vm3202_vm0, %vm3203_vm1 }
0x13a2   : > { %v3171_v57 = vmul.f32 %v4162_v38, %v3170_v47  ;;  %v3198_v20 = vmul.f32 %v4168_v12, %v3197_v19  ;;  %v2777_v36 = vrot.slane %v2776_v34, 2  ;;  %v2795_v33 = vsel %vm2237_vm3, %v2581_v3, 0.0 }
0x13a3   : > { %v3181_v28 = vmul.f32 %v4164_v35, %v3180_v5  ;;  %v3190_v29 = vsub.f32 1.5, %v3189_v54  ;;  %v2784_v45 = vrot.slane %v2783_v17, 2  ;;  %v2790_v6 = vadd.f32 %v2789_v58, %v2788_v62 }
0x13a4   : > { %v3175_v59 = vsel %vm3174_vm2, %v4162_v38, %v3171_v57  ;;  %v3199_v31 = vmul.f32 0.5, %v3198_v20  ;;  %v2778_v60 = vadd.f32 %v2777_v36, %v2776_v34  ;;  %v2796_v18 = vrot.slane %v2795_v33, 4 }
0x13a5   : > { %v3185_v3 = vsel %vm3184_vm4, %v4164_v35, %v3181_v28  ;;  %v3191_v53 = vmul.f32 %v4166_v48, %v3190_v29  ;;  %3419 = vst [vmem:[#allocation1 + $0x20] ss:$4 sm:$0xff] %v3175_v59  ;;  %v2785_v41 = vadd.f32 %v2784_v45, %v2783_v17  ;;  %v2791_v27 = vrot.slane %v2790_v6, 2 }
0x13a6   : > { %v3200_v62 = vsub.f32 1.5, %v3199_v31  ;;  %3420 = vst [vmem:[#allocation1 + $0x21] ss:$4 sm:$0xff] %v3185_v3  ;;  %v2779_v47 = vrot.slane %v2778_v60, 1  ;;  %v2797_v38 = vadd.f32 %v2796_v18, %v2795_v33  ;;  %v2160_v19 = vperm.slane %v2022_v51, %v4994_v39 }
0x13a7   : > { %v3195_v26 = vsel %vm3194_vm5, %v4166_v48, %v3191_v53  ;;  %v2786_v5 = vrot.slane %v2785_v41, 1  ;;  %v2792_v54 = vadd.f32 %v2791_v27, %v2790_v6  ;;  %v2164_v34 = vperm.slane %v2022_v51, %v4996_v40 }
0x13a8   : > { %v3201_v35 = vmul.f32 %v4168_v12, %v3200_v62  ;;  %3421 = vst [vmem:[#allocation1 + $0x22] ss:$4 sm:$0xff] %v3195_v26  ;;  %v2780_v58 = vadd.f32 %v2779_v47, %v2778_v60  ;;  %v2798_v45 = vrot.slane %v2797_v38, 2  ;;  %v2168_v17 = vperm.slane %v2022_v51, %v4998_v42 }
0x13a9   : > { %v2787_v46 = vadd.f32 %v2786_v5, %v2785_v41  ;;  %v2793_v57 = vrot.slane %v2792_v54, 1  ;;  %v2172_v33 = vperm.slane %v2022_v51, %v5000_v43  ;;  %v2378_v48 = vsel %vm2237_vm3, %v2160_v19, 0.0 }
0x13aa   : > { %v3205_v20 = vsel %vm3204_vm6, %v4168_v12, %v3201_v35  ;;  %v2799_v6 = vadd.f32 %v2798_v45, %v2797_v38  ;;  %v2902_v36 = vmul.f32 0.001953125, %v2780_v58  ;;  %v2379_v28 = vrot.slane %v2378_v48, 4 }
0x13ab   : > { %3422 = vst [vmem:[#allocation1 + $0x23] ss:$4 sm:$0xff] %v3205_v20  ;;  %v2794_v29 = vadd.f32 %v2793_v57, %v2792_v54  ;;  %v2903_v59 = vmul.f32 0.001953125, %v2787_v46  ;;  %v2385_v31 = vsel %vm2237_vm3, %v2164_v34, 0.0  ;;  %v2392_v60 = vsel %vm2237_vm3, %v2168_v17, 0.0 }
0x13ac   : > { %v2800_v18 = vrot.slane %v2799_v6, 1  ;;  %v2966_v2 = vsub.f32 %v2902_v36, %v5302_v9  ;;  %v2380_v3 = vadd.f32 %v2379_v28, %v2378_v48  ;;  %v2386_v53 = vrot.slane %v2385_v31, 4 }
0x13ad   : > { %v2904_v41 = vmul.f32 0.001953125, %v2794_v29  ;;  %v2967_v51 = vsub.f32 %v2903_v59, %v5310_v21  ;;  %v2393_v27 = vrot.slane %v2392_v60, 4  ;;  %v2399_v12 = vsel %vm2237_vm3, %v2172_v33, 0.0  ;;  %v2062_v59 = vpop.xlane.xlu2 %2061 }
0x13ae   : > { %v2801_v62 = vadd.f32 %v2800_v18, %v2799_v6  ;;  %v2998_v47 = vmax.f32 %v2966_v2, 0.0  ;;  %v2381_v38 = vrot.slane %v2380_v3, 2  ;;  %v2387_v19 = vadd.f32 %v2386_v53, %v2385_v31 }
0x13af   : > { %v2968_v26 = vsub.f32 %v2904_v41, %v5320_v4  ;;  %v2999_v5 = vmax.f32 %v2967_v51, 0.0  ;;  %v2394_v54 = vadd.f32 %v2393_v27, %v2392_v60  ;;  %v2400_v34 = vrot.slane %v2399_v12, 4 }
0x13b0   : > { %v2905_v35 = vmul.f32 0.001953125, %v2801_v62  ;;  %v5355_v58 = vadd.f32 1e-05, %v2998_v47  ;;  %v2382_v9 = vadd.f32 %v2381_v38, %v2380_v3  ;;  %v2388_v45 = vrot.slane %v2387_v19, 2 }
0x13b1   : > { %v3000_v17 = vmax.f32 %v2968_v26, 0.0  ;;  %v5357_v46 = vadd.f32 1e-05, %v2999_v5  ;;  %v2395_v21 = vrot.slane %v2394_v54, 2  ;;  %v2401_v57 = vadd.f32 %v2400_v34, %v2399_v12 }
0x13b2   : > { %v2969_v33 = vsub.f32 %v2905_v35, %v5324_v32  ;;  %4169 = vrsqrt.f32 %v5355_v58  ;;  %v2383_v48 = vrot.slane %v2382_v9, 1  ;;  %v2389_v4 = vadd.f32 %v2388_v45, %v2387_v19 }
0x13b3   : > { %v5361_v20 = vadd.f32 1e-05, %v3000_v17  ;;  %4171 = vrsqrt.f32 %v5357_v46  ;;  %v2396_v28 = vadd.f32 %v2395_v21, %v2394_v54  ;;  %v2402_v29 = vrot.slane %v2401_v57, 2 }
0x13b4   : > { %v3001_v6 = vmax.f32 %v2969_v33, 0.0  ;;  %v2384_v36 = vadd.f32 %v2383_v48, %v2382_v9  ;;  %v2390_v31 = vrot.slane %v2389_v4, 1  ;;  %v2585_v53 = vperm.slane %v2062_v59, %v4994_v39 }
0x13b5   : > { %4173 = vrsqrt.f32 %v5361_v20  ;;  %v2397_v18 = vrot.slane %v2396_v28, 1  ;;  %v2403_v32 = vadd.f32 %v2402_v29, %v2401_v57  ;;  %v2589_v41 = vperm.slane %v2062_v59, %v4996_v40 }
0x13b6   : > { %v5365_v60 = vadd.f32 1e-05, %v3001_v6  ;;  %v5367_v2 = vmul.f32 0.001953125, %v2384_v36  ;;  %v2391_v3 = vadd.f32 %v2390_v31, %v2389_v4  ;;  %v2593_v51 = vperm.slane %v2062_v59, %v4998_v42 }
0x13b7   : > { %v2398_v12 = vadd.f32 %v2397_v18, %v2396_v28  ;;  %v2404_v62 = vrot.slane %v2403_v32, 1  ;;  %v2597_v47 = vperm.slane %v2062_v59, %v5000_v43  ;;  %vm3212_vm7 = vweird.f32 %v5355_v58 }
0x13b8   : > { %5865 = vst [vmem:[#allocation27_spill] sm:$0xff] %v5367_v2  ;;  %v4170_v27 = vpop.eup %4169  ;;  %4175 = vrsqrt.f32 %v5365_v60  ;;  %v5376_v26 = vmul.f32 0.001953125, %v2391_v3  ;;  %v5380_v5 = vmul.f32 %v5367_v2, %v5367_v2  ;;  %vm3222_vm9 = vweird.f32 %v5357_v46 }
0x13b9   : > { %v4172_v38 = vpop.eup %4171  ;;  %v3207_v19 = vmul.f32 %v4170_v27, %v5355_v58  ;;  %vm3213_vm8 = vweird.f32 %v4170_v27  ;;  %v2405_v34 = vadd.f32 %v2404_v62, %v2403_v32  ;;  %v5384_v35 = vmul.f32 0.001953125, %v2398_v12 }
0x13ba   : > { %5866 = vst [vmem:[#allocation28_spill] sm:$0xff] %v5376_v26  ;;  %v3217_v54 = vmul.f32 %v4172_v38, %v5357_v46  ;;  %vm3223_vm10 = vweird.f32 %v4172_v38  ;;  %v5388_v17 = vmul.f32 %v5376_v26, %v5376_v26  ;;  %v2802_v21 = vsel %vm2237_vm3, %v2585_v53, 0.0  ;;  %vm3214_vm15 = vmor %vm3212_vm7, %vm3213_vm8  ;;  %v5411_v26 = vld.sshfl [vmem:[#allocation1] sm:$0xff pattern:$0x73625140] }
0x13bb   : > { %5867 = vst [vmem:[#allocation29_spill] sm:$0xff] %v5384_v35  ;;  %v4174_v9 = vpop.eup %4173  ;;  %v3208_v45 = vmul.f32 %v4170_v27, %v3207_v19  ;;  %v2809_v57 = vsel %vm2237_vm3, %v2589_v41, 0.0  ;;  %vm3232_vm11 = vweird.f32 %v5361_v20  ;;  %v5394_v4 = vmul.f32 0.001953125, %v2405_v34  ;;  %vm3224_vm0 = vmor %vm3222_vm9, %vm3223_vm10 }
0x13bc   : > { %v3218_v33 = vmul.f32 %v4172_v38, %v3217_v54  ;;  %v3227_v48 = vmul.f32 %v4174_v9, %v5361_v20  ;;  %vm3233_vm12 = vweird.f32 %v4174_v9  ;;  %v5398_v36 = vmul.f32 %v5384_v35, %v5384_v35  ;;  %v2025_v35 = vpop.xlane.xlu0 %2024 }
0x13bd   : > { %5868 = vst [vmem:[#allocation30_spill] sm:$0xff] %v5394_v4  ;;  %v3209_v6 = vmul.f32 0.5, %v3208_v45  ;;  %v2803_v28 = vrot.slane %v2802_v21, 4  ;;  %v2810_v29 = vrot.slane %v2809_v57, 4  ;;  %v5402_v32 = vmul.f32 %v5394_v4, %v5394_v4  ;;  %vm3234_vm1 = vmor %vm3232_vm11, %vm3233_vm12 }
0x13be   : > { %v4176_v59 = vpop.eup %4175  ;;  %v3219_v31 = vmul.f32 0.5, %v3218_v33  ;;  %v3228_v18 = vmul.f32 %v4174_v9, %v3227_v48  ;;  %v2816_v3 = vsel %vm2237_vm3, %v2593_v51, 0.0  ;;  %vm3242_vm13 = vweird.f32 %v5365_v60 }
0x13bf   : > { %v3210_v53 = vsub.f32 1.5, %v3209_v6  ;;  %v3237_v41 = vmul.f32 %v4176_v59, %v5365_v60  ;;  %vm3243_vm14 = vweird.f32 %v4176_v59  ;;  %v2804_v12 = vadd.f32 %v2803_v28, %v2802_v21 }
0x13c0   : > { %v3220_v62 = vsub.f32 1.5, %v3219_v31  ;;  %v3229_v19 = vmul.f32 0.5, %v3228_v18  ;;  %v2811_v54 = vadd.f32 %v2810_v29, %v2809_v57  ;;  %v2817_v34 = vrot.slane %v2816_v3, 4  ;;  %vm3244_vm2 = vmor %vm3242_vm13, %vm3243_vm14 }
0x13c1   : > { %v3211_v45 = vmul.f32 %v4170_v27, %v3210_v53  ;;  %v3238_v33 = vmul.f32 %v4176_v59, %v3237_v41  ;;  %v2805_v48 = vrot.slane %v2804_v12, 2  ;;  %v2823_v15 = vsel %vm2237_vm3, %v2597_v47, 0.0 }
0x13c2   : > { %v3221_v51 = vmul.f32 %v4172_v38, %v3220_v62  ;;  %v3230_v6 = vsub.f32 1.5, %v3229_v19  ;;  %v2812_v13 = vrot.slane %v2811_v54, 2  ;;  %v2818_v4 = vadd.f32 %v2817_v34, %v2816_v3 }
0x13c3   : > { %v3215_v21 = vsel %vm3214_vm15, %v4170_v27, %v3211_v45  ;;  %v3239_v57 = vmul.f32 0.5, %v3238_v33  ;;  %v2806_v28 = vadd.f32 %v2805_v48, %v2804_v12  ;;  %v2824_v29 = vrot.slane %v2823_v15, 4 }
0x13c4   : > { %v3225_v47 = vsel %vm3224_vm0, %v4172_v38, %v3221_v51  ;;  %v3231_v31 = vmul.f32 %v4174_v9, %v3230_v6  ;;  %3425 = vst [vmem:[#allocation1] ss:$4 sm:$0xff] %v3215_v21  ;;  %v2813_v58 = vadd.f32 %v2812_v13, %v2811_v54  ;;  %v2819_v18 = vrot.slane %v2818_v4, 2 }
0x13c5   : > { %v3240_v3 = vsub.f32 1.5, %v3239_v57  ;;  %3426 = vst [vmem:[#allocation1 + $0x1] ss:$4 sm:$0xff] %v3225_v47  ;;  %v2807_v53 = vrot.slane %v2806_v28, 1  ;;  %v2825_v27 = vadd.f32 %v2824_v29, %v2823_v15  ;;  %v2176_v41 = vperm.slane %v2025_v35, %v4994_v39 }
0x13c6   : > { %v3235_v46 = vsel %vm3234_vm1, %v4174_v9, %v3231_v31  ;;  %v2814_v62 = vrot.slane %v2813_v58, 1  ;;  %v2820_v19 = vadd.f32 %v2819_v18, %v2818_v4  ;;  %v2180_v12 = vperm.slane %v2025_v35, %v4996_v40 }
0x13c7   : > { %v3241_v38 = vmul.f32 %v4176_v59, %v3240_v3  ;;  %3427 = vst [vmem:[#allocation1 + $0x2] ss:$4 sm:$0xff] %v3235_v46  ;;  %v2808_v34 = vadd.f32 %v2807_v53, %v2806_v28  ;;  %v2826_v13 = vrot.slane %v2825_v27, 2  ;;  %v2184_v54 = vperm.slane %v2025_v35, %v4998_v42 }
0x13c8   : > { %v2815_v20 = vadd.f32 %v2814_v62, %v2813_v58  ;;  %v2821_v45 = vrot.slane %v2820_v19, 1  ;;  %v2188_v15 = vperm.slane %v2025_v35, %v5000_v43  ;;  %v2406_v9 = vsel %vm2237_vm3, %v2176_v41, 0.0 }
0x13c9   : > { %v3245_v33 = vsel %vm3244_vm2, %v4176_v59, %v3241_v38  ;;  %v2827_v4 = vadd.f32 %v2826_v13, %v2825_v27  ;;  %v2906_v48 = vmul.f32 0.001953125, %v2808_v34  ;;  %v2407_v51 = vrot.slane %v2406_v9, 4 }
0x13ca   : > { %3428 = vst [vmem:[#allocation1 + $0x3] ss:$4 sm:$0xff] %v3245_v33  ;;  %v2822_v6 = vadd.f32 %v2821_v45, %v2820_v19  ;;  %v2907_v21 = vmul.f32 0.001953125, %v2815_v20  ;;  %v2413_v57 = vsel %vm2237_vm3, %v2180_v12, 0.0  ;;  %v2420_v28 = vsel %vm2237_vm3, %v2184_v54, 0.0 }
0x13cb   : > { %v2828_v29 = vrot.slane %v2827_v4, 1  ;;  %v2970_v60 = vsub.f32 %v2906_v48, %v5380_v5  ;;  %v2408_v47 = vadd.f32 %v2407_v51, %v2406_v9  ;;  %v2414_v31 = vrot.slane %v2413_v57, 4 }
0x13cc   : > { %v2908_v58 = vmul.f32 0.001953125, %v2822_v6  ;;  %v2971_v35 = vsub.f32 %v2907_v21, %v5388_v17  ;;  %v2421_v18 = vrot.slane %v2420_v28, 4  ;;  %v2427_v59 = vsel %vm2237_vm3, %v2188_v15, 0.0  ;;  %v2065_v21 = vpop.xlane.xlu2 %2064 }
0x13cd   : > { %v2829_v3 = vadd.f32 %v2828_v29, %v2827_v4  ;;  %v3002_v53 = vmax.f32 %v2970_v60, 0.0  ;;  %v2409_v27 = vrot.slane %v2408_v47, 2  ;;  %v2415_v41 = vadd.f32 %v2414_v31, %v2413_v57 }
0x13ce   : > { %v2972_v46 = vsub.f32 %v2908_v58, %v5398_v36  ;;  %v3003_v62 = vmax.f32 %v2971_v35, 0.0  ;;  %v2422_v19 = vadd.f32 %v2421_v18, %v2420_v28  ;;  %v2428_v12 = vrot.slane %v2427_v59, 4 }
0x13cf   : > { %v2909_v38 = vmul.f32 0.001953125, %v2829_v3  ;;  %v5433_v34 = vadd.f32 1e-05, %v3002_v53  ;;  %v2410_v5 = vadd.f32 %v2409_v27, %v2408_v47  ;;  %v2416_v13 = vrot.slane %v2415_v41, 2 }
0x13d0   : > { %v3004_v54 = vmax.f32 %v2972_v46, 0.0  ;;  %v5435_v20 = vadd.f32 1e-05, %v3003_v62  ;;  %v2423_v17 = vrot.slane %v2422_v19, 2  ;;  %v2429_v45 = vadd.f32 %v2428_v12, %v2427_v59 }
0x13d1   : > { %v2973_v15 = vsub.f32 %v2909_v38, %v5402_v32  ;;  %4177 = vrsqrt.f32 %v5433_v34  ;;  %v2411_v9 = vrot.slane %v2410_v5, 1  ;;  %v2417_v36 = vadd.f32 %v2416_v13, %v2415_v41 }
0x13d2   : > { %v5439_v33 = vadd.f32 1e-05, %v3004_v54  ;;  %4179 = vrsqrt.f32 %v5435_v20  ;;  %v2424_v51 = vadd.f32 %v2423_v17, %v2422_v19  ;;  %v2430_v6 = vrot.slane %v2429_v45, 2 }
0x13d3   : > { %v3005_v4 = vmax.f32 %v2973_v15, 0.0  ;;  %v2412_v48 = vadd.f32 %v2411_v9, %v2410_v5  ;;  %v2418_v57 = vrot.slane %v2417_v36, 1  ;;  %v2601_v47 = vperm.slane %v2065_v21, %v4994_v39 }
0x13d4   : > { %4181 = vrsqrt.f32 %v5439_v33  ;;  %v2425_v29 = vrot.slane %v2424_v51, 1  ;;  %v2431_v32 = vadd.f32 %v2430_v6, %v2429_v45  ;;  %v2605_v31 = vperm.slane %v2065_v21, %v4996_v40 }
0x13d5   : > { %v5443_v28 = vadd.f32 1e-05, %v3005_v4  ;;  %v2419_v60 = vadd.f32 %v2418_v57, %v2417_v36  ;;  %v5448_v35 = vmul.f32 0.001953125, %v2412_v48  ;;  %vm3252_vm4 = vweird.f32 %v5433_v34 }
0x13d6   : > { %v2432_v3 = vrot.slane %v2431_v32, 1  ;;  %v2609_v53 = vperm.slane %v2065_v21, %v4998_v42  ;;  %vm3262_vm6 = vweird.f32 %v5435_v20  ;;  %v2426_v41 = vadd.f32 %v2425_v29, %v2424_v51 }
0x13d7   : > { %v4178_v58 = vpop.eup %4177  ;;  %4183 = vrsqrt.f32 %v5443_v28  ;;  %v2613_v46 = vperm.slane %v2065_v21, %v5000_v43  ;;  %v5456_v12 = vmul.f32 0.001953125, %v2419_v60  ;;  %v2830_v38 = vsel %vm2237_vm3, %v2601_v47, 0.0 }
0x13d8   : > { %v4180_v18 = vpop.eup %4179  ;;  %v3247_v59 = vmul.f32 %v4178_v58, %v5433_v34  ;;  %vm3253_vm5 = vweird.f32 %v4178_v58  ;;  %v2837_v5 = vsel %vm2237_vm3, %v2605_v31, 0.0  ;;  %vm3272_vm8 = vweird.f32 %v5439_v33 }
0x13d9   : > { %v3257_v27 = vmul.f32 %v4180_v18, %v5435_v20  ;;  %vm3263_vm7 = vweird.f32 %v4180_v18  ;;  %v5464_v17 = vmul.f32 %v5448_v35, %v5448_v35  ;;  %v2433_v15 = vadd.f32 %v2432_v3, %v2431_v32  ;;  %vm3254_vm12 = vmor %vm3252_vm4, %vm3253_vm5 }
0x13da   : > { %v4182_v62 = vpop.eup %4181  ;;  %v3248_v19 = vmul.f32 %v4178_v58, %v3247_v59  ;;  %v2831_v9 = vrot.slane %v2830_v38, 4  ;;  %v2838_v36 = vrot.slane %v2837_v5, 4  ;;  %v2844_v6 = vsel %vm2237_vm3, %v2609_v53, 0.0  ;;  %vm3264_vm13 = vmor %vm3262_vm6, %vm3263_vm7 }
0x13db   : > { %v3258_v13 = vmul.f32 %v4180_v18, %v3257_v27  ;;  %v3267_v54 = vmul.f32 %v4182_v62, %v5439_v33  ;;  %vm3273_vm9 = vweird.f32 %v4182_v62  ;;  %vm3282_vm10 = vweird.f32 %v5443_v28 }
0x13dc   : > { %v3249_v45 = vmul.f32 0.5, %v3248_v19  ;;  %v2832_v29 = vadd.f32 %v2831_v9, %v2830_v38  ;;  %v2839_v31 = vadd.f32 %v2838_v36, %v2837_v5  ;;  %v2845_v59 = vrot.slane %v2844_v6, 4  ;;  %v376_v38 = vld [vmem:[%s5816_s6] sm:$0xff]  ;;  %vm3274_vm14 = vmor %vm3272_vm8, %vm3273_vm9 }
0x13dd   : > { %v4184_v4 = vpop.eup %4183  ;;  %v3259_v48 = vmul.f32 0.5, %v3258_v13  ;;  %v3268_v51 = vmul.f32 %v4182_v62, %v3267_v54  ;;  %v2851_v19 = vsel %vm2237_vm3, %v2613_v46, 0.0  ;;  %v5476_v9 = vld.sshfl [vmem:[#allocation1 + $0x20] sm:$0xff pattern:$0x73625140] }
0x13de   : > { %v3250_v21 = vsub.f32 1.5, %v3249_v45  ;;  %v3277_v57 = vmul.f32 %v4184_v4, %v5443_v28  ;;  %vm3283_vm11 = vweird.f32 %v4184_v4  ;;  %v2833_v27 = vrot.slane %v2832_v29, 2 }
0x13df   : > { %v3260_v60 = vsub.f32 1.5, %v3259_v48  ;;  %v3269_v47 = vmul.f32 0.5, %v3268_v51  ;;  %v2840_v54 = vrot.slane %v2839_v31, 2  ;;  %v2846_v45 = vadd.f32 %v2845_v59, %v2844_v6  ;;  %vm3284_vm15 = vmor %vm3282_vm10, %vm3283_vm11 }
0x13e0   : > { %v3251_v32 = vmul.f32 %v4178_v58, %v3250_v21  ;;  %v3278_v3 = vmul.f32 %v4184_v4, %v3277_v57  ;;  %v2834_v36 = vadd.f32 %v2833_v27, %v2832_v29  ;;  %v2852_v48 = vrot.slane %v2851_v19, 4 }
0x13e1   : > { %v3261_v53 = vmul.f32 %v4180_v18, %v3260_v60  ;;  %v3270_v13 = vsub.f32 1.5, %v3269_v47  ;;  %v2841_v21 = vadd.f32 %v2840_v54, %v2839_v31  ;;  %v2847_v57 = vrot.slane %v2846_v45, 2 }
0x13e2   : > { %v3255_v5 = vsel %vm3254_vm12, %v4178_v58, %v3251_v32  ;;  %v3279_v46 = vmul.f32 0.5, %v3278_v3  ;;  %v2835_v60 = vrot.slane %v2834_v36, 1  ;;  %v2853_v58 = vadd.f32 %v2852_v48, %v2851_v19  ;;  %v2028_v32 = vpop.xlane.xlu1 %2027 }
0x13e3   : > { %v3265_v34 = vsel %vm3264_vm13, %v4180_v18, %v3261_v53  ;;  %v3271_v51 = vmul.f32 %v4182_v62, %v3270_v13  ;;  %3429 = vst [vmem:[#allocation1 + $0x20] ss:$4 sm:$0xff] %v3255_v5  ;;  %v5485_v47 = vmul.f32 %v5255_v37, %v376_v38  ;;  %v5487_v59 = vmul.f32 0.001953125, %v2426_v41 }
0x13e4   : > { %v3280_v6 = vsub.f32 1.5, %v3279_v46  ;;  %3430 = vst [vmem:[#allocation1 + $0x21] ss:$4 sm:$0xff] %v3265_v34  ;;  %v2842_v29 = vrot.slane %v2841_v21, 1  ;;  %v2848_v18 = vadd.f32 %v2847_v57, %v2846_v45  ;;  %v5489_v31 = vmul.f32 0.001953125, %v2433_v15 }
0x13e5   : > { %v3275_v20 = vsel %vm3274_vm14, %v4182_v62, %v3271_v51  ;;  %v2836_v27 = vadd.f32 %v2835_v60, %v2834_v36  ;;  %v2854_v33 = vrot.slane %v2853_v58, 2  ;;  %3645 = vperm.xlu1 %4081, %v5485_v47   ;;  %v2943_v37 = vmul.f32 %v5456_v12, %v5456_v12 }
0x13e6   : > { %v3281_v3 = vmul.f32 %v4184_v4, %v3280_v6  ;;  %3431 = vst [vmem:[#allocation1 + $0x22] ss:$4 sm:$0xff] %v3275_v20  ;;  %v2843_v41 = vadd.f32 %v2842_v29, %v2841_v21  ;;  %v2849_v62 = vrot.slane %v2848_v18, 1  ;;  %v2192_v54 = vperm.slane %v2028_v32, %v4994_v39 }
0x13e7   : > { %v2855_v53 = vadd.f32 %v2854_v33, %v2853_v58  ;;  %v2910_v13 = vmul.f32 0.001953125, %v2836_v27  ;;  %v2944_v15 = vmul.f32 %v5487_v59, %v5487_v59  ;;  %v2945_v28 = vmul.f32 %v5489_v31, %v5489_v31 }
0x13e8   : > { %v3285_v19 = vsel %vm3284_vm15, %v4184_v4, %v3281_v3  ;;  %v2850_v45 = vadd.f32 %v2849_v62, %v2848_v18  ;;  %v2911_v38 = vmul.f32 0.001953125, %v2843_v41  ;;  %v2196_v36 = vperm.slane %v2028_v32, %v4996_v40 }
0x13e9   : > { %3432 = vst [vmem:[#allocation1 + $0x23] ss:$4 sm:$0xff] %v3285_v19  ;;  %v2856_v5 = vrot.slane %v2855_v53, 1  ;;  %v2974_v46 = vsub.f32 %v2910_v13, %v5464_v17  ;;  %v2200_v34 = vperm.slane %v2028_v32, %v4998_v42  ;;  %v2204_v51 = vperm.slane %v2028_v32, %v5000_v43 }
0x13ea   : > { %v2912_v48 = vmul.f32 0.001953125, %v2850_v45  ;;  %v2975_v4 = vsub.f32 %v2911_v38, %v2943_v37  ;;  %v2434_v6 = vsel %vm2237_vm3, %v2192_v54, 0.0  ;;  %v2441_v60 = vsel %vm2237_vm3, %v2196_v36, 0.0 }
0x13eb   : > { %v2857_v21 = vadd.f32 %v2856_v5, %v2855_v53  ;;  %v3006_v57 = vmax.f32 %v2974_v46, 0.0  ;;  %v2435_v29 = vrot.slane %v2434_v6, 4  ;;  %v2442_v18 = vrot.slane %v2441_v60, 4  ;;  %v5518_v46 = vpop.xlane.xlu0 %2067 }
0x13ec   : > { %v2976_v58 = vsub.f32 %v2912_v48, %v2944_v15  ;;  %v3007_v20 = vmax.f32 %v2975_v4, 0.0  ;;  %v2448_v27 = vsel %vm2237_vm3, %v2200_v34, 0.0  ;;  %v2455_v33 = vsel %vm2237_vm3, %v2204_v51, 0.0 }
0x13ed   : > { %v2913_v3 = vmul.f32 0.001953125, %v2857_v21  ;;  %v5508_v17 = vadd.f32 1e-05, %v3006_v57  ;;  %v2436_v32 = vadd.f32 %v2435_v29, %v2434_v6  ;;  %v2443_v62 = vadd.f32 %v2442_v18, %v2441_v60 }
0x13ee   : > { %v3008_v37 = vmax.f32 %v2976_v58, 0.0  ;;  %v5512_v41 = vadd.f32 1e-05, %v3007_v20  ;;  %v2449_v53 = vrot.slane %v2448_v27, 4  ;;  %v2456_v5 = vrot.slane %v2455_v33, 4 }
0x13ef   : > { %v2977_v19 = vsub.f32 %v2913_v3, %v2945_v28  ;;  %4185 = vrsqrt.f32 %v5508_v17  ;;  %v2437_v54 = vrot.slane %v2436_v32, 2  ;;  %v2444_v45 = vrot.slane %v2443_v62, 2 }
0x13f0   : > { %v5515_v13 = vadd.f32 1e-05, %v3008_v37  ;;  %4187 = vrsqrt.f32 %v5512_v41  ;;  %v2450_v38 = vadd.f32 %v2449_v53, %v2448_v27  ;;  %v2457_v4 = vadd.f32 %v2456_v5, %v2455_v33 }
0x13f1   : > { %v3009_v15 = vmax.f32 %v2977_v19, 0.0  ;;  %v2438_v36 = vadd.f32 %v2437_v54, %v2436_v32  ;;  %v2445_v51 = vadd.f32 %v2444_v45, %v2443_v62  ;;  %v2617_v21 = vperm.slane %v5518_v46, %v4994_v39 }
0x13f2   : > { %4189 = vrsqrt.f32 %v5515_v13  ;;  %v2451_v28 = vrot.slane %v2450_v38, 2  ;;  %v2458_v20 = vrot.slane %v2457_v4, 2  ;;  %vm3292_vm0 = vweird.f32 %v5508_v17 }
0x13f3   : > { %v5521_v48 = vadd.f32 1e-05, %v3009_v15  ;;  %v2439_v34 = vrot.slane %v2438_v36, 1  ;;  %vm3302_vm1 = vweird.f32 %v5512_v41  ;;  %v2621_v18 = vperm.slane %v5518_v46, %v4996_v40 }
0x13f4   : > { %v2452_v6 = vadd.f32 %v2451_v28, %v2450_v38  ;;  %v2446_v33 = vrot.slane %v2445_v51, 1  ;;  %v2858_v37 = vsel %vm2237_vm3, %v2617_v21, 0.0  ;;  %vm3312_vm2 = vweird.f32 %v5515_v13 }
0x13f5   : > { %v4186_v57 = vpop.eup %4185  ;;  %4191 = vrsqrt.f32 %v5521_v48  ;;  %v2440_v39 = vadd.f32 %v2439_v34, %v2438_v36  ;;  %v2625_v53 = vperm.slane %v5518_v46, %v4998_v42  ;;  %v2459_v15 = vadd.f32 %v2458_v20, %v2457_v4 }
0x13f6   : > { %v4188_v60 = vpop.eup %4187  ;;  %v3287_v58 = vmul.f32 %v4186_v57, %v5508_v17  ;;  %v2453_v19 = vrot.slane %v2452_v6, 1  ;;  %vm3293_vm4 = vweird.f32 %v4186_v57  ;;  %v2629_v40 = vperm.slane %v5518_v46, %v5000_v43 }
0x13f7   : > { %v3297_v29 = vmul.f32 %v4188_v60, %v5512_v41  ;;  %vm3303_vm5 = vweird.f32 %v4188_v60  ;;  %v2859_v36 = vrot.slane %v2858_v37, 4  ;;  %v2447_v21 = vadd.f32 %v2446_v33, %v2445_v51  ;;  %vm3294_vm7 = vmor %vm3292_vm0, %vm3293_vm4  ;;  %v5550_v33 = vld.sshfl [vmem:[#allocation1] sm:$0xff pattern:$0x73625140] }
0x13f8   : > { %v4190_v3 = vpop.eup %4189  ;;  %v3288_v27 = vmul.f32 %v4186_v57, %v3287_v58  ;;  %v5540_v58 = vmul.f32 0.001953125, %v2440_v39  ;;  %v2454_v42 = vadd.f32 %v2453_v19, %v2452_v6  ;;  %v2460_v20 = vrot.slane %v2459_v15, 1  ;;  %v377_v39 = vld [vmem:[%s5816_s6 + $0x8] sm:$0xff]  ;;  %vm3304_vm8 = vmor %vm3302_vm1, %vm3303_vm5 }
0x13f9   : > { %v3298_v32 = vmul.f32 %v4188_v60, %v3297_v29  ;;  %v3307_v62 = vmul.f32 %v4190_v3, %v5515_v13  ;;  %vm3313_vm6 = vweird.f32 %v4190_v3  ;;  %v2860_v25 = vadd.f32 %v2859_v36, %v2858_v37 }
0x13fa   : > { %v3289_v54 = vmul.f32 0.5, %v3288_v27  ;;  %v2872_v51 = vsel %vm2237_vm3, %v2625_v53, 0.0  ;;  %vm3314_vm10 = vmor %vm3312_vm2, %vm3313_vm6  ;;  %v5560_v41 = vmul.f32 %v5333_v49, %v377_v39  ;;  %vm3322_vm11 = vweird.f32 %v5521_v48  ;;  %v378_v49 = vld [vmem:[%s5816_s6 + $0x10] sm:$0xff] }
0x13fb   : > { %v4192_v45 = vpop.eup %4191  ;;  %v3299_v38 = vmul.f32 0.5, %v3298_v32  ;;  %v3308_v5 = vmul.f32 %v4190_v3, %v3307_v62  ;;  %v2865_v32 = vsel %vm2237_vm3, %v2621_v18, 0.0  ;;  %v2861_v17 = vrot.slane %v2860_v25, 2 }
0x13fc   : > { %v3290_v28 = vsub.f32 1.5, %v3289_v54  ;;  %v3317_v34 = vmul.f32 %v4192_v45, %v5521_v48  ;;  %vm3323_vm9 = vweird.f32 %v4192_v45  ;;  %v2866_v18 = vrot.slane %v2865_v32, 4  ;;  %3649 = vperm.xlu2 %4082, %v5560_v41  }
0x13fd   : > { %v3300_v29 = vsub.f32 1.5, %v3299_v38  ;;  %v3309_v2 = vmul.f32 0.5, %v3308_v5  ;;  %v2873_v19 = vrot.slane %v2872_v51, 4  ;;  %v2862_v54 = vadd.f32 %v2861_v17, %v2860_v25  ;;  %vm3324_vm12 = vmor %vm3322_vm11, %vm3323_vm9 }
0x13fe   : > { %v3291_v27 = vmul.f32 %v4186_v57, %v3290_v28  ;;  %v3318_v4 = vmul.f32 %v4192_v45, %v3317_v34  ;;  %v2867_v5 = vadd.f32 %v2866_v18, %v2865_v32  ;;  %v2461_v13 = vadd.f32 %v2460_v20, %v2459_v15 }
0x13ff   : > { %v3301_v43 = vmul.f32 %v4188_v60, %v3300_v29  ;;  %v3310_v46 = vsub.f32 1.5, %v3309_v2  ;;  %v2874_v36 = vadd.f32 %v2873_v19, %v2872_v51  ;;  %v2863_v34 = vrot.slane %v2862_v54, 1 }
0x1400   : > { %v3295_v6 = vsel %vm3294_vm7, %v4186_v57, %v3291_v27  ;;  %v3319_v37 = vmul.f32 0.5, %v3318_v4  ;;  %v2879_v57 = vsel %vm2237_vm3, %v2629_v40, 0.0  ;;  %v2868_v25 = vrot.slane %v2867_v5, 2 }
0x1401   : > { %v3305_v62 = vsel %vm3304_vm8, %v4188_v60, %v3301_v43  ;;  %v3311_v2 = vmul.f32 %v4190_v3, %v3310_v46  ;;  %3435 = vst [vmem:[#allocation1] ss:$4 sm:$0xff] %v3295_v6  ;;  %v2880_v60 = vrot.slane %v2879_v57, 4  ;;  %v2875_v29 = vrot.slane %v2874_v36, 2 }
0x1402   : > { %v3320_v53 = vsub.f32 1.5, %v3319_v37  ;;  %3436 = vst [vmem:[#allocation1 + $0x1] ss:$4 sm:$0xff] %v3305_v62  ;;  %v5571_v48 = vmul.f32 0.001953125, %v2447_v21  ;;  %v2946_v4 = vmul.f32 %v5540_v58, %v5540_v58  ;;  %v2864_v43 = vadd.f32 %v2863_v34, %v2862_v54  ;;  %v380_v54 = vld [vmem:[%s5816_s6 + $0x20] sm:$0xff] }
0x1403   : > { %v3315_v38 = vsel %vm3314_vm10, %v4190_v3, %v3311_v2  ;;  %v2881_v40 = vadd.f32 %v2880_v60, %v2879_v57  ;;  %v379_v3 = vld [vmem:[%s5816_s6 + $0x18] sm:$0xff]  ;;  %v5575_v15 = vmul.f32 0.001953125, %v2454_v42  ;;  %v2869_v20 = vadd.f32 %v2868_v25, %v2867_v5 }
0x1404   : > { %v3321_v28 = vmul.f32 %v4192_v45, %v3320_v53  ;;  %3437 = vst [vmem:[#allocation1 + $0x2] ss:$4 sm:$0xff] %v3315_v38  ;;  %v2876_v46 = vadd.f32 %v2875_v29, %v2874_v36  ;;  %v2914_v51 = vmul.f32 0.001953125, %v2864_v43  ;;  %v5578_v39 = vmul.f32 %v5411_v26, %v378_v49  ;;  %v3434_v36 = vld.sshfl [vmem:[#allocation1 + $0x20] sm:$0xff pattern:$0x73625140] }
0x1405   : > { %v2882_v32 = vrot.slane %v2881_v40, 2  ;;  %v5581_v6 = vmul.f32 %v5476_v9, %v379_v3  ;;  %v2870_v21 = vrot.slane %v2869_v20, 1  ;;  %v3469_v62 = vrot.slane %v5485_v47, 2 }
0x1406   : > { %v3325_v27 = vsel %vm3324_vm12, %v4192_v45, %v3321_v28  ;;  %v5583_v45 = vmul.f32 0.001953125, %v2461_v13  ;;  %v2877_v37 = vrot.slane %v2876_v46, 1  ;;  %v3470_v42 = vrot.slane %v5485_v47, 4  ;;  %3653 = vperm.xlu0 %4080, %v5578_v39  }
0x1407   : > { %3438 = vst [vmem:[#allocation1 + $0x3] ss:$4 sm:$0xff] %v3325_v27  ;;  %v2883_v17 = vadd.f32 %v2882_v32, %v2881_v40  ;;  %v2947_v2 = vmul.f32 %v5571_v48, %v5571_v48  ;;  %v2978_v18 = vsub.f32 %v2914_v51, %v2946_v4  ;;  %3657 = vperm.xlu1 %4081, %v5581_v6   ;;  %v3471_v57 = vrot.slane %v5485_v47, 6  ;;  %v381_v4 = vld [vmem:[%s5816_s6 + $0x28] sm:$0xff] }
0x1408   : > { %v2948_v26 = vmul.f32 %v5575_v15, %v5575_v15  ;;  %v2871_v9 = vadd.f32 %v2870_v21, %v2869_v20  ;;  %v2878_v19 = vadd.f32 %v2877_v37, %v2876_v46  ;;  %v3517_v38 = vmul.f32 %v5485_v47, %v5018_v63 }
0x1409   : > { %v2884_v53 = vrot.slane %v2883_v17, 1  ;;  %v3010_v5 = vmax.f32 %v2978_v18, 0.0  ;;  %v2949_v60 = vmul.f32 %v5583_v45, %v5583_v45  ;;  %v3518_v29 = vmul.f32 %v3469_v62, %v5020_v0  ;;  %v382_v0 = vld [vmem:[%s5816_s6 + $0x30] sm:$0xff] }
0x140a   : > { %v2915_v34 = vmul.f32 0.001953125, %v2871_v9  ;;  %v2916_v13 = vmul.f32 0.001953125, %v2878_v19  ;;  %v5603_v49 = vmul.f32 %v5550_v33, %v380_v54  ;;  %v3519_v3 = vmul.f32 %v3470_v42, %v5022_v10 }
0x140b   : > { %v2885_v28 = vadd.f32 %v2884_v53, %v2883_v17  ;;  %v3042_v40 = vadd.f32 1e-05, %v3010_v5  ;;  %v3520_v43 = vmul.f32 %v3471_v57, %v5024_v1  ;;  %v5614_v46 = vmul.f32 %v3434_v36, %v381_v4 }
0x140c   : > { %v2979_v63 = vsub.f32 %v2915_v34, %v2947_v2  ;;  %v2980_v47 = vsub.f32 %v2916_v13, %v2948_v26  ;;  %v3475_v17 = vrot.slane %v5578_v39, 2  ;;  %v3476_v42 = vrot.slane %v5578_v39, 4  ;;  %v384_v26 = vld [vmem:[%s5817_s7] sm:$0xff] }
0x140d   : > { %v2917_v27 = vmul.f32 0.001953125, %v2885_v28  ;;  %4193 = vrsqrt.f32 %v3042_v40  ;;  %3665 = vperm.xlu2 %4082, %v5614_v46   ;;  %v3477_v18 = vrot.slane %v5578_v39, 6  ;;  %v3525_v9 = vmul.f32 %v5578_v39, %v5135_v7 }
0x140e   : > { %v3443_v25 = vld.sshfl [vmem:[#allocation1] sm:$0xff pattern:$0x73625140]  ;;  %v3011_v20 = vmax.f32 %v2979_v63, 0.0  ;;  %v3012_v10 = vmax.f32 %v2980_v47, 0.0  ;;  %3661 = vperm.xlu0 %4080, %v5603_v49   ;;  %v3526_v53 = vmul.f32 %v3475_v17, %v5144_v52  ;;  %v3527_v57 = vmul.f32 %v3476_v42, %v5152_v44 }
0x140f   : > { %3581 = vst [vmem:[#allocation1] ss:$4 sm:$0xff] %v3517_v38  ;;  %v2981_v33 = vsub.f32 %v2917_v27, %v2949_v60  ;;  %v5618_v1 = vmul.f32 %v3443_v25, %v382_v0  ;;  %v3528_v60 = vmul.f32 %v3477_v18, %v5162_v56  ;;  %vm3332_vm13 = vweird.f32 %v3042_v40 }
0x1410   : > { %3583 = vst [vmem:[#allocation1 + $0x1] ss:$4 sm:$0xff] %v3518_v29  ;;  %v3043_v51 = vadd.f32 1e-05, %v3011_v20  ;;  %v5616_v21 = vadd.f32 1e-05, %v3012_v10  ;;  %v3533_v0 = vmul.f32 %v5603_v49, %v5289_v14 }
0x1411   : > { %3585 = vst [vmem:[#allocation1 + $0x2] ss:$4 sm:$0xff] %v3519_v3  ;;  %v3013_v32 = vmax.f32 %v2981_v33, 0.0  ;;  %3669 = vperm.xlu1 %4081, %v5618_v1   ;;  %v3481_v3 = vrot.slane %v5603_v49, 2  ;;  %v3482_v20 = vrot.slane %v5603_v49, 4  ;;  %v3483_v42 = vrot.slane %v5603_v49, 6 }
0x1412   : > { %3587 = vst [vmem:[#allocation1 + $0x3] ss:$4 sm:$0xff] %v3520_v43  ;;  %4195 = vrsqrt.f32 %v3043_v51  ;;  %vm3342_vm1 = vweird.f32 %v3043_v51  ;;  %vm3352_vm5 = vweird.f32 %v5616_v21  ;;  %v3472_v49 = vrot.slane %v5560_v41, 2 }
0x1413   : > { %v5621_v37 = vadd.f32 1e-05, %v3013_v32  ;;  %v4194_v62 = vpop.eup %4193  ;;  %4197 = vrsqrt.f32 %v5616_v21 }
0x1414   : > { %v3327_v2 = vmul.f32 %v4194_v62, %v3042_v40  ;;  %vm3333_vm3 = vweird.f32 %v4194_v62  ;;  %v3534_v40 = vmul.f32 %v3481_v3, %v5298_v30  ;;  %v5870_v3 = vld [vmem:[#allocation27_spill] sm:$0xff] }
0x1415   : > { %4199 = vrsqrt.f32 %v5621_v37  ;;  %vm3334_vm14 = vmor %vm3332_vm13, %vm3333_vm3  ;;  %vm3362_vm7 = vweird.f32 %v5621_v37 }
0x1416   : > { %v3328_v19 = vmul.f32 %v4194_v62, %v3327_v2 }
0x1418   : > { %v4196_v5 = vpop.eup %4195  ;;  %v3329_v36 = vmul.f32 0.5, %v3328_v19  ;;  %v3521_v19 = vmul.f32 %v5560_v41, %v5069_v24  ;;  %v3541_v24 = vmul.f32 %v5618_v1, %v5448_v35  ;;  %v3479_v35 = vrot.slane %v5581_v6, 4 }
0x1419   : > { %v3596_v54 = vld.sshfl [vmem:[#allocation1] sm:$0xff pattern:$0x73625140]  ;;  %v4198_v28 = vpop.eup %4197  ;;  %v3337_v34 = vmul.f32 %v4196_v5, %v3043_v51  ;;  %vm3343_vm15 = vweird.f32 %v4196_v5  ;;  %v3535_v51 = vmul.f32 %v3482_v20, %v5306_v23  ;;  %v3522_v23 = vmul.f32 %v3472_v49, %v5071_v55 }
0x141a   : > { %v3636_v38 = vsub.f32 %v384_v26, %v3596_v54  ;;  %3598 = vst [vmem:[#allocation1] ss:$4 sm:$0xff] %v3525_v9  ;;  %v3330_v25 = vsub.f32 1.5, %v3329_v36  ;;  %v3347_v7 = vmul.f32 %v4198_v28, %v5616_v21  ;;  %vm3353_vm0 = vweird.f32 %v4198_v28  ;;  %vm3344_vm4 = vmor %vm3342_vm1, %vm3343_vm15 }
0x141b   : > { %3599 = vst [vmem:[#allocation1 + $0x1] ss:$4 sm:$0xff] %v3526_v53  ;;  %v4200_v13 = vpop.eup %4199  ;;  %v3338_v52 = vmul.f32 %v4196_v5, %v3337_v34  ;;  %vm3354_vm6 = vmor %vm3352_vm5, %vm3353_vm0  ;;  %v3536_v26 = vmul.f32 %v3483_v42, %v5316_v16  ;;  %v3473_v21 = vrot.slane %v5560_v41, 4  ;;  %v3474_v9 = vrot.slane %v5560_v41, 6  ;;  %v389_v42 = vld [vmem:[%s5817_s7 + $0x28] sm:$0xff] }
0x141c   : > { %3710 = vperm.xlu2 %4082, %v3636_v38   ;;  %3600 = vst [vmem:[#allocation1 + $0x2] ss:$4 sm:$0xff] %v3527_v57  ;;  %v3357_v44 = vmul.f32 %v4200_v13, %v5621_v37  ;;  %v3331_v39 = vmul.f32 %v4194_v62, %v3330_v25  ;;  %v3348_v29 = vmul.f32 %v4198_v28, %v3347_v7  ;;  %vm3363_vm2 = vweird.f32 %v4200_v13  ;;  %v383_v37 = vld [vmem:[%s5816_s6 + $0x38] sm:$0xff] }
0x141d   : > { %3601 = vst [vmem:[#allocation1 + $0x3] ss:$4 sm:$0xff] %v3528_v60  ;;  %v3339_v56 = vmul.f32 0.5, %v3338_v52  ;;  %vm3364_vm8 = vmor %vm3362_vm7, %vm3363_vm2  ;;  %v3487_v16 = vrot.slane %v5618_v1, 2  ;;  %v3523_v54 = vmul.f32 %v3473_v21, %v5075_v61  ;;  %v3488_v57 = vrot.slane %v5618_v1, 4  ;;  %v386_v61 = vld [vmem:[%s5817_s7 + $0x10] sm:$0xff] }
0x141e   : > { %v3358_v27 = vmul.f32 %v4200_v13, %v3357_v44  ;;  %v3335_v63 = vsel %vm3334_vm14, %v4194_v62, %v3331_v39  ;;  %v3349_v47 = vmul.f32 0.5, %v3348_v29  ;;  %v3489_v36 = vrot.slane %v5618_v1, 6  ;;  %v5869_v52 = vld [vmem:[#allocation26_spill] sm:$0xff]  ;;  %v388_v39 = vld [vmem:[%s5817_s7 + $0x20] sm:$0xff] }
0x141f   : > { %v3340_v4 = vsub.f32 1.5, %v3339_v56  ;;  %3439 = vst [vmem:[#allocation1 + $0x20] ss:$4 sm:$0xff] %v3335_v63  ;;  %v3542_v55 = vmul.f32 %v3487_v16, %v5456_v12  ;;  %v3543_v41 = vmul.f32 %v3488_v57, %v5487_v59  ;;  %v3480_v1 = vrot.slane %v5581_v6, 6  ;;  %v385_v12 = vld [vmem:[%s5817_s7 + $0x8] sm:$0xff] }
0x1420   : > { %v3359_v43 = vmul.f32 0.5, %v3358_v27  ;;  %v3350_v33 = vsub.f32 1.5, %v3349_v47  ;;  %v3529_v59 = vmul.f32 %v5581_v6, %v5211_v11  ;;  %v3531_v25 = vmul.f32 %v3479_v35, %v5228_v50  ;;  %v387_v50 = vld [vmem:[%s5817_s7 + $0x18] sm:$0xff] }
0x1421   : > { %v3341_v10 = vmul.f32 %v4196_v5, %v3340_v4  ;;  %v3532_v44 = vmul.f32 %v3480_v1, %v5869_v52  ;;  %v3484_v11 = vrot.slane %v5614_v46, 2  ;;  %v3486_v29 = vrot.slane %v5614_v46, 6  ;;  %v5871_v27 = vld [vmem:[#allocation28_spill] sm:$0xff]  ;;  %v5872_v4 = vld [vmem:[#allocation29_spill] sm:$0xff] }
0x1422   : > { %v3360_v32 = vsub.f32 1.5, %v3359_v43  ;;  %v3351_v62 = vmul.f32 %v4198_v28, %v3350_v33  ;;  %v3537_v56 = vmul.f32 %v5614_v46, %v5870_v3  ;;  %v5873_v33 = vld [vmem:[#allocation30_spill] sm:$0xff]  ;;  %v4203_v1 = vld [vmem:[%s4461_s20 + $0x30] sm:$0xff] }
0x1423   : > { %v3345_v2 = vsel %vm3344_vm4, %v4196_v5, %v3341_v10  ;;  %v3524_v5 = vmul.f32 %v3474_v9, %v5085_v8  ;;  %v3544_v8 = vmul.f32 %v3489_v36, %v5489_v31  ;;  %v3538_v63 = vmul.f32 %v3484_v11, %v5871_v27  ;;  %v5880_v3 = vld [vmem:[#allocation14_spill] sm:$0xff]  ;;  %v5881_v27 = vld [vmem:[#allocation15_spill] sm:$0xff] }
0x1424   : > { %v3606_v17 = vld.sshfl [vmem:[#allocation1] sm:$0xff pattern:$0x73625140]  ;;  %v3361_v14 = vmul.f32 %v4200_v13, %v3360_v32  ;;  %v3355_v18 = vsel %vm3354_vm6, %v4198_v28, %v3351_v62  ;;  %3440 = vst [vmem:[#allocation1 + $0x21] ss:$4 sm:$0xff] %v3345_v2  ;;  %v3478_v28 = vrot.slane %v5581_v6, 2  ;;  %v3540_v20 = vmul.f32 %v3486_v29, %v5873_v33 }
0x1425   : > { %3608 = vst [vmem:[#allocation1] ss:$4 sm:$0xff] %v3533_v0  ;;  %v3638_v34 = vsub.f32 %v386_v61, %v3606_v17  ;;  %v5879_v29 = vld [vmem:[#allocation23_spill] sm:$0xff]  ;;  %v5882_v33 = vld [vmem:[#allocation12_spill] sm:$0xff] }
0x1426   : > { %3609 = vst [vmem:[#allocation1 + $0x1] ss:$4 sm:$0xff] %v3534_v40  ;;  %v3365_v30 = vsel %vm3364_vm8, %v4200_v13, %v3361_v14  ;;  %v3530_v13 = vmul.f32 %v3478_v28, %v5220_v22  ;;  %v3485_v22 = vrot.slane %v5614_v46, 4  ;;  %v390_v40 = vld [vmem:[%s5817_s7 + $0x30] sm:$0xff] }
0x1427   : > { %3441 = vst [vmem:[#allocation1 + $0x22] ss:$4 sm:$0xff] %v3355_v18 }
0x1428   : > { %3442 = vst [vmem:[#allocation1 + $0x23] ss:$4 sm:$0xff] %v3365_v30  ;;  %v3539_v43 = vmul.f32 %v3485_v22, %v5872_v4 }
0x1429   : > { %3610 = vst [vmem:[#allocation1 + $0x2] ss:$4 sm:$0xff] %v3535_v51 }
0x142a   : > { %3611 = vst [vmem:[#allocation1 + $0x3] ss:$4 sm:$0xff] %v3536_v26 }
0x142f   : > { %v3444_v53 = vld.sshfl [vmem:[#allocation1 + $0x20] sm:$0xff pattern:$0x73625140] }
0x1430   : > { %3589 = vst [vmem:[#allocation1 + $0x20] ss:$4 sm:$0xff] %v3521_v19  ;;  %v5661_v38 = vmul.f32 %v3444_v53, %v383_v37  ;;  %v5874_v37 = vld [vmem:[#allocation10_spill] sm:$0xff] }
0x1431   : > { %3591 = vst [vmem:[#allocation1 + $0x21] ss:$4 sm:$0xff] %v3522_v23  ;;  %v3616_v60 = vld.sshfl [vmem:[#allocation1] sm:$0xff pattern:$0x73625140]  ;;  %v4201_v23 = vld [vmem:[%s4461_s20] sm:$0xff] }
0x1432   : > { %3593 = vst [vmem:[#allocation1 + $0x22] ss:$4 sm:$0xff] %v3523_v54  ;;  %3673 = vperm.xlu0 %4080, %v5661_v38   ;;  %v3640_v6 = vsub.f32 %v388_v39, %v3616_v60  ;;  %v3490_v46 = vrot.slane %v5661_v38, 2  ;;  %v3491_v17 = vrot.slane %v5661_v38, 4  ;;  %v3492_v62 = vrot.slane %v5661_v38, 6  ;;  %v4202_v54 = vld [vmem:[%s4461_s20 + $0x8] sm:$0xff] }
0x1433   : > { %3595 = vst [vmem:[#allocation1 + $0x23] ss:$4 sm:$0xff] %v3524_v5  ;;  %v3545_v2 = vmul.f32 %v5661_v38, %v5540_v58  ;;  %v391_v58 = vld [vmem:[%s5817_s7 + $0x38] sm:$0xff] }
0x1434   : > { %3618 = vst [vmem:[#allocation1] ss:$4 sm:$0xff] %v3541_v24  ;;  %v3546_v14 = vmul.f32 %v3490_v46, %v5571_v48  ;;  %v3547_v30 = vmul.f32 %v3491_v17, %v5575_v15  ;;  %v3548_v26 = vmul.f32 %v3492_v62, %v5583_v45  ;;  %v5875_v45 = vld [vmem:[#allocation11_spill] sm:$0xff]  ;;  %v4207_v62 = vld [vmem:[%s4461_s20 + $0x20] sm:$0xff] }
0x1435   : > { %3619 = vst [vmem:[#allocation1 + $0x1] ss:$4 sm:$0xff] %v3542_v55 }
0x1436   : > { %3620 = vst [vmem:[#allocation1 + $0x2] ss:$4 sm:$0xff] %v3543_v41 }
0x1437   : > { %3621 = vst [vmem:[#allocation1 + $0x3] ss:$4 sm:$0xff] %v3544_v8  ;;  %v5876_v8 = vld [vmem:[#allocation16_spill] sm:$0xff] }
0x143a   : > { %v3597_v31 = vld.sshfl [vmem:[#allocation1 + $0x20] sm:$0xff pattern:$0x73625140]  ;;  %3720 = vperm.xlu0 %4080, %v3638_v34  }
0x143b   : > { %v3637_v7 = vsub.f32 %v385_v12, %v3597_v31  ;;  %3602 = vst [vmem:[#allocation1 + $0x20] ss:$4 sm:$0xff] %v3529_v59  ;;  %v5877_v34 = vld [vmem:[#allocation17_spill] sm:$0xff] }
0x143c   : > { %3603 = vst [vmem:[#allocation1 + $0x21] ss:$4 sm:$0xff] %v3530_v13  ;;  %v4204_v59 = vld [vmem:[%s4461_s20 + $0x38] sm:$0xff] }
0x143d   : > { %3715 = vperm.xlu1 %4081, %v3637_v7   ;;  %3604 = vst [vmem:[#allocation1 + $0x22] ss:$4 sm:$0xff] %v3531_v25 }
0x143e   : > { %3605 = vst [vmem:[#allocation1 + $0x23] ss:$4 sm:$0xff] %v3532_v44  ;;  %v3626_v10 = vld.sshfl [vmem:[#allocation1] sm:$0xff pattern:$0x73625140] }
0x143f   : > { %v3642_v32 = vsub.f32 %v390_v40, %v3626_v10  ;;  %v5883_v40 = vld [vmem:[#allocation13_spill] sm:$0xff] }
0x1445   : > { %3730 = vperm.xlu1 %4081, %v3640_v6   ;;  %v3607_v47 = vld.sshfl [vmem:[#allocation1 + $0x20] sm:$0xff pattern:$0x73625140]  ;;  %v5878_v6 = vld [vmem:[#allocation22_spill] sm:$0xff] }
0x1446   : > { %v3639_v0 = vsub.f32 %v387_v50, %v3607_v47  ;;  %3612 = vst [vmem:[#allocation1 + $0x20] ss:$4 sm:$0xff] %v3537_v56  ;;  %v4205_v47 = vld [vmem:[%s4461_s20 + $0x60] sm:$0xff] }
0x1447   : > { %3613 = vst [vmem:[#allocation1 + $0x21] ss:$4 sm:$0xff] %v3538_v63 }
0x1448   : > { %3725 = vperm.xlu2 %4082, %v3639_v0   ;;  %3614 = vst [vmem:[#allocation1 + $0x22] ss:$4 sm:$0xff] %v3539_v43  ;;  %v4206_v43 = vld [vmem:[%s4461_s20 + $0x68] sm:$0xff] }
0x1449   : > { %3615 = vst [vmem:[#allocation1 + $0x23] ss:$4 sm:$0xff] %v3540_v20 }
0x1450   : > { %3740 = vperm.xlu2 %4082, %v3642_v32   ;;  %v3617_v18 = vld.sshfl [vmem:[#allocation1 + $0x20] sm:$0xff pattern:$0x73625140] }
0x1451   : > { %v3641_v51 = vsub.f32 %v389_v42, %v3617_v18  ;;  %3622 = vst [vmem:[#allocation1 + $0x20] ss:$4 sm:$0xff] %v3545_v2  ;;  %v4208_v2 = vld [vmem:[%s4461_s20 + $0x28] sm:$0xff] }
0x1452   : > { %3623 = vst [vmem:[#allocation1 + $0x21] ss:$4 sm:$0xff] %v3546_v14 }
0x1453   : > { %3735 = vperm.xlu0 %4080, %v3641_v51   ;;  %3624 = vst [vmem:[#allocation1 + $0x22] ss:$4 sm:$0xff] %v3547_v30 }
0x1454   : > { %3625 = vst [vmem:[#allocation1 + $0x23] ss:$4 sm:$0xff] %v3548_v26 }
0x1456   : > { %v3650_v21 = vpop.permute.xlu2 %3649 }
0x1457   : > { %v3646_v15 = vpop.permute.xlu1 %3645  ;;  %v3678_v20 = vmul.f32 %v3650_v21, %v5882_v33  ;;  %v3679_v10 = vmul.f32 %v3650_v21, %v5883_v40  ;;  %v4210_v21 = vld [vmem:[%s4461_s20 + $0x18] sm:$0xff] }
0x1458   : > { %v3676_v19 = vmul.f32 %v3646_v15, %v5874_v37  ;;  %v3677_v53 = vmul.f32 %v3646_v15, %v5875_v45 }
0x1459   : > { %v3695_v15 = vadd.f32 %v4210_v21, %v3679_v10 }
0x145a   : > { %v3692_v16 = vadd.f32 %v4201_v23, %v3676_v19  ;;  %v3693_v57 = vadd.f32 %v4202_v54, %v3677_v53 }
0x145b   : > { %v3627_v49 = vld.sshfl [vmem:[#allocation1 + $0x20] sm:$0xff pattern:$0x73625140] }
0x145c   : > { %v3643_v48 = vsub.f32 %v391_v58, %v3627_v49  ;;  %v4209_v49 = vld [vmem:[%s4461_s20 + $0x10] sm:$0xff] }
0x145e   : > { %3745 = vperm.xlu1 %4081, %v3643_v48   ;;  %v3694_v48 = vadd.f32 %v4209_v49, %v3678_v20 }
0x1467   : > { %v5716_v9 = vpop.permute.xlu2 %3665 }
0x1476   : > { %v3711_v38 = vpop.permute.xlu2 %3710 }
0x1477   : > { %v3748_v5 = vadd.f32 %v3711_v38, %v3692_v16  ;;  %v3749_v36 = vadd.f32 %v3711_v38, %v3693_v57  ;;  %v5884_v16 = vld [vmem:[#allocation18_spill] sm:$0xff]  ;;  %v5885_v57 = vld [vmem:[#allocation19_spill] sm:$0xff] }
0x1478   : > { %v3654_v55 = vpop.permute.xlu0 %3653 }
0x1479   : > { %v3764_v60 = vmax.f32 %v3748_v5, 0.0  ;;  %v3765_v24 = vmax.f32 %v3749_v36, 0.0  ;;  %v3658_v61 = vpop.permute.xlu1 %3657  ;;  %v3680_v56 = vmul.f32 %v3654_v55, %v5880_v3  ;;  %v3681_v63 = vmul.f32 %v3654_v55, %v5881_v27  ;;  %v4212_v55 = vld [vmem:[%s4461_s20 + $0x48] sm:$0xff]  ;;  %v4215_v27 = vld [vmem:[%s4461_s20 + $0x70] sm:$0xff] }
0x147a   : > { %v3682_v28 = vmul.f32 %v3658_v61, %v5876_v8  ;;  %v3683_v35 = vmul.f32 %v3658_v61, %v5877_v34 }
0x147b   : > { %3780 = vst [vmem:[%s5724_s25] sm:$0xff] %v3764_v60  ;;  %v3696_v42 = vadd.f32 %v4207_v62, %v3680_v56  ;;  %v3697_v14 = vadd.f32 %v4208_v2, %v3681_v63  ;;  %v4211_v60 = vld [vmem:[%s4461_s20 + $0x40] sm:$0xff]  ;;  %v5889_v56 = vld [vmem:[#allocation25_spill] sm:$0xff] }
0x147c   : > { %3781 = vst [vmem:[%s5724_s25 + $0x8] sm:$0xff] %v3765_v24  ;;  %v3698_v12 = vadd.f32 %v4203_v1, %v3682_v28  ;;  %v3699_v13 = vadd.f32 %v4204_v59, %v3683_v35  ;;  %v5887_v59 = vld [vmem:[#allocation21_spill] sm:$0xff] }
0x1480   : > { %v3662_v41 = vpop.permute.xlu0 %3661 }
0x1481   : > { %v3684_v54 = vmul.f32 %v3662_v41, %v5884_v16  ;;  %v3685_v38 = vmul.f32 %v3662_v41, %v5885_v57  ;;  %v5886_v41 = vld [vmem:[#allocation20_spill] sm:$0xff] }
0x1483   : > { %v3670_v25 = vpop.permute.xlu1 %3669  ;;  %v3700_v24 = vadd.f32 %v4211_v60, %v3684_v54  ;;  %v3701_v61 = vadd.f32 %v4212_v55, %v3685_v38 }
0x1484   : > { %v3688_v22 = vmul.f32 %v3670_v25, %v5878_v6  ;;  %v3689_v50 = vmul.f32 %v3670_v25, %v5879_v29 }
0x1486   : > { %v3704_v4 = vadd.f32 %v4205_v47, %v3688_v22  ;;  %v3705_v0 = vadd.f32 %v4206_v43, %v3689_v50  ;;  %v5888_v50 = vld [vmem:[#allocation24_spill] sm:$0xff]  ;;  %v4216_v47 = vld [vmem:[%s4461_s20 + $0x78] sm:$0xff] }
0x14a2   : > { %v3726_v31 = vpop.permute.xlu2 %3725 }
0x14a3   : > { %v3754_v7 = vadd.f32 %v3726_v31, %v3698_v12  ;;  %v3755_v52 = vadd.f32 %v3726_v31, %v3699_v13  ;;  %v3686_v12 = vmul.f32 %v5716_v9, %v5886_v41  ;;  %v3687_v13 = vmul.f32 %v5716_v9, %v5887_v59  ;;  %v4213_v31 = vld [vmem:[%s4461_s20 + $0x50] sm:$0xff] }
0x14a4   : > { %v5732_v44 = vpop.permute.xlu0 %3673 }
0x14a5   : > { %v3770_v39 = vmax.f32 %v3754_v7, 0.0  ;;  %v3771_v11 = vmax.f32 %v3755_v52, 0.0  ;;  %v3702_v25 = vadd.f32 %v4213_v31, %v3686_v12  ;;  %v4214_v7 = vld [vmem:[%s4461_s20 + $0x58] sm:$0xff]  ;;  %v3690_v3 = vmul.f32 %v5732_v44, %v5888_v50 }
0x14a6   : > { %v3703_v52 = vadd.f32 %v4214_v7, %v3687_v13  ;;  %v3691_v9 = vmul.f32 %v5732_v44, %v5889_v56 }
0x14a7   : > { %3786 = vst [vmem:[%s5724_s25 + $0x30] sm:$0xff] %v3770_v39  ;;  %v3706_v63 = vadd.f32 %v4215_v27, %v3690_v3 }
0x14a8   : > { %3787 = vst [vmem:[%s5724_s25 + $0x38] sm:$0xff] %v3771_v11 }
0x14aa   : > { %v3741_v46 = vpop.permute.xlu2 %3740 }
0x14ab   : > { %v3760_v32 = vadd.f32 %v3741_v46, %v3704_v4  ;;  %v3761_v17 = vadd.f32 %v3741_v46, %v3705_v0  ;;  %v3707_v4 = vadd.f32 %v4216_v47, %v3691_v9 }
0x14ac   : > { %v3721_v18 = vpop.permute.xlu0 %3720 }
0x14ad   : > { %v3776_v30 = vmax.f32 %v3760_v32, 0.0  ;;  %v3777_v51 = vmax.f32 %v3761_v17, 0.0  ;;  %v3752_v26 = vadd.f32 %v3721_v18, %v3696_v42  ;;  %v3753_v58 = vadd.f32 %v3721_v18, %v3697_v14 }
0x14af   : > { %3792 = vst [vmem:[%s5724_s25 + $0x60] sm:$0xff] %v3776_v30  ;;  %v3768_v37 = vmax.f32 %v3752_v26, 0.0  ;;  %v3769_v19 = vmax.f32 %v3753_v58, 0.0  ;;  %v3716_v45 = vpop.permute.xlu1 %3715 }
0x14b0   : > { %3793 = vst [vmem:[%s5724_s25 + $0x68] sm:$0xff] %v3777_v51  ;;  %v3750_v53 = vadd.f32 %v3716_v45, %v3694_v48  ;;  %v3751_v23 = vadd.f32 %v3716_v45, %v3695_v15 }
0x14b1   : > { %3784 = vst [vmem:[%s5724_s25 + $0x20] sm:$0xff] %v3768_v37 }
0x14b2   : > { %3785 = vst [vmem:[%s5724_s25 + $0x28] sm:$0xff] %v3769_v19  ;;  %v3766_v5 = vmax.f32 %v3750_v53, 0.0  ;;  %v3767_v36 = vmax.f32 %v3751_v23, 0.0 }
0x14b4   : > { %3782 = vst [vmem:[%s5724_s25 + $0x10] sm:$0xff] %v3766_v5 }
0x14b5   : > { %3783 = vst [vmem:[%s5724_s25 + $0x18] sm:$0xff] %v3767_v36 }
0x14b7   : > { %v3731_v8 = vpop.permute.xlu1 %3730 }
0x14b8   : > { %v3756_v28 = vadd.f32 %v3731_v8, %v3700_v24  ;;  %v3757_v34 = vadd.f32 %v3731_v8, %v3701_v61 }
0x14ba   : > { %v3772_v35 = vmax.f32 %v3756_v28, 0.0  ;;  %v3773_v1 = vmax.f32 %v3757_v34, 0.0 }
0x14bc   : > { %3788 = vst [vmem:[%s5724_s25 + $0x40] sm:$0xff] %v3772_v35 }
0x14bd   : > { %3789 = vst [vmem:[%s5724_s25 + $0x48] sm:$0xff] %v3773_v1 }
0x14c5   : > { %v3736_v39 = vpop.permute.xlu0 %3735 }
0x14c6   : > { %v3758_v11 = vadd.f32 %v3736_v39, %v3702_v25  ;;  %v3759_v6 = vadd.f32 %v3736_v39, %v3703_v52 }
0x14c8   : > { %v3774_v22 = vmax.f32 %v3758_v11, 0.0  ;;  %v3775_v29 = vmax.f32 %v3759_v6, 0.0 }
0x14ca   : > { %3790 = vst [vmem:[%s5724_s25 + $0x50] sm:$0xff] %v3774_v22 }
0x14cb   : > { %3791 = vst [vmem:[%s5724_s25 + $0x58] sm:$0xff] %v3775_v29 }
0x14d0   : > { %v3746_v43 = vpop.permute.xlu1 %3745 }
0x14d1   : > { %v3762_v0 = vadd.f32 %v3746_v43, %v3706_v63  ;;  %v3763_v33 = vadd.f32 %v3746_v43, %v3707_v4 }
0x14d3   : > { %v3778_v20 = vmax.f32 %v3762_v0, 0.0  ;;  %v3779_v44 = vmax.f32 %v3763_v33, 0.0 }
0x14d5   : > { %3794 = vst [vmem:[%s5724_s25 + $0x70] sm:$0xff] %v3778_v20 }
0x14d6   : > { %3795 = vst [vmem:[%s5724_s25 + $0x78] sm:$0xff] %v3779_v44 }
0x14d7   : > { %4274 = shalt.err (!%p4271_p7)
}
0x14d8   : > { %s4322_s26 = smov 256   ;;  %s4323_s25 = smov 16  }
0x14d9   : > { %4027 = dma.vmem_to_hbm [thread:$0]  (%p4419_p11), %s3810_s9, 2048, %s3812_s21, %s3797_s15, %s4322_s26, %s4322_s26, %s4323_s25  }
0x14da PF: > { %s3826_s29 = sand.u32 1, %s4301_s27   ;;  %p5890_p5 = scmp.ge.s32.totalorder %s4313_s30, 2 }
0x14db   : > { %s3827_s10 = scalar_lea.sflag [#allocation4], %s3826_s29 }
0x14dc   : > { %p4034_p8 = pnand %p5890_p5, %p4423_p12 }
0x14de   : > { %p4035_p10 = pneg %p4034_p8 }
0x14e0   : > { %4296 = dma.done.wait (%p4035_p10), %s3827_s10, 2048  }
0x14e1   : > { %4298 = vsyncadd (%p4035_p10), %s3827_s10, 4294965248  ;;  %s5891_s12 = sld [smem:[#allocation8_spill]]  ;;  %p21_p2 = scmp.ge.s32.totalorder %s4394_s11, 4  }
0x14e2   : > { %s5892_s29 = sld [smem:[#allocation9_spill]]  ;;  %s5893_s27 = smov %s4305_s28 }
0x14e3   : > { %s5895_s30 = smov %s4394_s11  ;;  %23 = sbr.rel (!%p21_p2) target bundleno = 5 (0x5), region = 114 }
0x14e7   : > { %s5894_s28 = smov %s5891_s12 }
0x14e8   :  { %3833 = vsyncpa [#allocation3], 1 }
0x14e9   :  { %3835 = vsyncpa [#allocation3 + $0x1], 1 }
0x14ea   :  { %3836 = vsyncpa [#allocation4], 1 }
0x14eb   :  { %3838 = vsyncpa [#allocation4 + $0x1], 1 }

</bundles_post_ra>
